<compile_context>
chip_gen: v7x
topology: tpu7x:2x2x1
jax: 0.10.0
libtpu: 0.0.40
codegen_flags: <defaults>
</compile_context>

<pallas_src>
import functools
import math

import jax
import jax.numpy as jnp
from jax.experimental import pallas as pl
from jax.experimental.pallas import tpu as pltpu

# ---------------- hyperparameters (from MyViT.__init__) ----------------
CIN, COUT, KSZ, STRIDE, PAD = 3, 32, 5, 4, 1
HIDDEN_D = 8
N_HEADS = 2
D_HEAD = HIDDEN_D // N_HEADS
N_BLOCKS = 2
OUT_D = 10
INPUT_D = 32 * 25          # = 800 (the nn.Linear(input_d, hidden_d) input width)
EPS_LN = 1e-5
EPS_BN = 1e-5


# ---------------- the fused Pallas kernel ----------------
def _fused_vit_kernel(cols_ref, cw_ref, cb_ref, mw_ref, mb_ref, rep_ref, pos_ref,
                      lng_ref, lnb_ref, wh_ref, bh_ref, hw_ref, hb_ref, o_ref,
                      *, n_blocks, n_heads, d_head):
    # --- Conv2d + BatchNorm(eval) + ReLU as one lane-dense matmul: (32,75)@(75,800) ---
    # TODO(synk): Dropout(p=0.5) and BatchNorm are reproduced in eval mode (identity /
    # running stats folded into the conv weights); training-mode RNG dropout is not.
    pre = jnp.dot(cw_ref[...], cols_ref[0], preferred_element_type=jnp.float32)
    pre = jnp.maximum(pre + cb_ref[...], 0.0)                       # (32, 800), f32

    # --- linear_mapper on the 32 unique channel rows (bf16 MXU, f32 accumulate) ---
    tok = jnp.dot(pre.astype(jnp.bfloat16), mw_ref[...],
                  preferred_element_type=jnp.float32) + mb_ref[...]  # (32, 8)

    # --- replicate tokens N times + class token + positional embeddings ---
    # rep is a (T, 32) 0/1 replication matrix (row 0 zero); the class token has been
    # folded into row 0 of pos_ref on the host side, so x matches the reference's
    # cat([class_token, tokens, tokens, ...]) + positional_embeddings.
    x = jnp.dot(rep_ref[...], tok, preferred_element_type=jnp.float32) + pos_ref[...]

    scale = 1.0 / math.sqrt(d_head)
    for i in range(n_blocks):
        # LayerNorm
        mu = jnp.mean(x, axis=-1, keepdims=True)
        var = jnp.mean(jnp.square(x - mu), axis=-1, keepdims=True)
        xn = (x - mu) * jax.lax.rsqrt(var + EPS_LN)
        xn = xn * lng_ref[i] + lnb_ref[i]

        # Multi-head self-attention: each head uses full-width weights that are zero
        # outside its 4-column block, so no sub-vreg slicing / concatenation is needed.
        msa = jnp.zeros_like(x)
        for h in range(n_heads):
            base = i * 3 * n_heads + h
            q = jnp.dot(xn, wh_ref[base], preferred_element_type=jnp.float32) + bh_ref[base]
            k = jnp.dot(xn, wh_ref[base + n_heads],
                        preferred_element_type=jnp.float32) + bh_ref[base + n_heads]
            v = jnp.dot(xn, wh_ref[base + 2 * n_heads],
                        preferred_element_type=jnp.float32) + bh_ref[base + 2 * n_heads]
            # q/k/v are (T, 8) but nonzero only in head h's columns, so q @ k.T equals
            # the per-head (T, T) scores and attn @ v fills only head h's columns.
            s = jax.lax.dot_general(q, k, (((1,), (1,)), ((), ())),
                                    preferred_element_type=jnp.float32) * scale
            m = jnp.max(s, axis=-1, keepdims=True)
            e = jnp.exp(s - m)
            attn = e / jnp.sum(e, axis=-1, keepdims=True)
            msa = msa + jnp.dot(attn, v, preferred_element_type=jnp.float32)
        x = x + msa

    # --- classification head (Linear + Softmax) on the class-token row ---
    logits = jnp.dot(x[0:1, :], hw_ref[...],
                     preferred_element_type=jnp.float32) + hb_ref[...]   # (1, 10)
    m = jnp.max(logits, axis=-1, keepdims=True)
    e = jnp.exp(logits - m)
    o_ref[0] = (e / jnp.sum(e, axis=-1, keepdims=True)).astype(o_ref.dtype)


def fused_vit(cols_bf, cw, cb, mw, mb, rep, pos_cls, lng, lnb, wh, bh, hw, hb):
    N, KK, P = cols_bf.shape

    def full(a):
        return pl.BlockSpec(a.shape, lambda b, nd=a.ndim: (0,) * nd)

    kernel = functools.partial(_fused_vit_kernel, n_blocks=N_BLOCKS,
                               n_heads=N_HEADS, d_head=D_HEAD)
    return pl.pallas_call(
        kernel,
        out_shape=jax.ShapeDtypeStruct((N, 1, OUT_D), jnp.float32),
        grid_spec=pltpu.PrefetchScalarGridSpec(
            num_scalar_prefetch=0,
            grid=(N,),
            in_specs=[
                pl.BlockSpec((1, KK, P), lambda b: (b, 0, 0)),   # im2col cols, bf16
                full(cw), full(cb),                              # conv (BN folded)
                full(mw), full(mb),                              # linear mapper
                full(rep), full(pos_cls),                        # replication + pos(+cls)
                full(lng), full(lnb),                            # LayerNorm params
                full(wh), full(bh),                              # per-head QKV (padded)
                full(hw), full(hb),                              # classification head
            ],
            out_specs=pl.BlockSpec((1, 1, OUT_D), lambda b: (b, 0, 0)),
        ),
        compiler_params=pltpu.CompilerParams(dimension_semantics=("parallel",)),
    )(cols_bf, cw, cb, mw, mb, rep, pos_cls, lng, lnb, wh, bh, hw, hb)


# ---------------- plain-JAX glue (host/XLA side) ----------------
def im2col(images):
    """(N,C,H,W) -> (N, Cin*K*K, Ho*Wo) in the layout the kernel consumes directly."""
    N, C, H, W = images.shape
    Ho = (H + 2 * PAD - KSZ) // STRIDE + 1
    Wo = (W + 2 * PAD - KSZ) // STRIDE + 1
    xp = jnp.pad(images, ((0, 0), (0, 0), (PAD, PAD), (PAD, PAD)))
    patches = []
    for kh in range(KSZ):
        for kw in range(KSZ):
            patches.append(xp[:, :, kh::STRIDE, kw::STRIDE][:, :, :Ho, :Wo])
    cols = jnp.stack(patches, axis=2)                 # (N, C, K*K, Ho, Wo)
    cols = cols.reshape(N, C * KSZ * KSZ, Ho * Wo)    # flattened as (c, kh, kw)
    return cols, Ho, Wo


def get_positional_embeddings(seq_len, d):
    i = jnp.arange(seq_len, dtype=jnp.float32)[:, None]
    j = jnp.arange(d, dtype=jnp.float32)[None, :]
    even = (jnp.arange(d) % 2 == 0)[None, :]
    ang_even = i / jnp.power(10000.0, j / d)
    ang_odd = i / jnp.power(10000.0, (j - 1) / d)
    return jnp.where(even, jnp.sin(ang_even), jnp.cos(ang_odd)).astype(jnp.float32)


def replication_matrix(n):
    """(T, 32) matrix: row 0 zero (class token), row 1+32*r+c selects channel c."""
    T = COUT * n + 1
    rows = jnp.arange(T)
    col_of_row = (rows - 1) % COUT
    R = (rows[:, None] >= 1) & (col_of_row[:, None] == jnp.arange(COUT)[None, :])
    return R.astype(jnp.float32)


def init_params(key):
    ks = jax.random.split(key, 4 + N_BLOCKS)

    def linear(k, fan_in, fan_out):
        kw, kb = jax.random.split(k)
        bound = 1.0 / math.sqrt(fan_in)
        W = jax.random.uniform(kw, (fan_out, fan_in), jnp.float32, -bound, bound)
        b = jax.random.uniform(kb, (fan_out,), jnp.float32, -bound, bound)
        return W, b

    params = {}
    # Conv2d(3,32,5,stride=4,pad=1) + eval-mode BatchNorm2d folded in (channel-major
    # so the conv output (32, 800) is lane-dense).
    kw_, kb_ = jax.random.split(ks[0])
    bound = 1.0 / math.sqrt(CIN * KSZ * KSZ)
    conv_w = jax.random.uniform(kw_, (COUT, CIN, KSZ, KSZ), jnp.float32, -bound, bound)
    conv_b = jax.random.uniform(kb_, (COUT,), jnp.float32, -bound, bound)
    bn_gamma, bn_beta = jnp.ones((COUT,)), jnp.zeros((COUT,))
    bn_mean, bn_var = jnp.zeros((COUT,)), jnp.ones((COUT,))
    scale = bn_gamma / jnp.sqrt(bn_var + EPS_BN)
    params["conv_w"] = (conv_w.reshape(COUT, -1) * scale[:, None]).astype(jnp.bfloat16)
    params["conv_b"] = ((conv_b - bn_mean) * scale + bn_beta)[:, None]       # (32, 1)

    W, b = linear(ks[1], INPUT_D, HIDDEN_D)
    params["map_w"] = W.T.astype(jnp.bfloat16)      # (800, 8)
    params["map_b"] = b[None, :]                    # (1, 8)

    params["class_token"] = jax.random.uniform(ks[2], (1, HIDDEN_D), jnp.float32, 0.0, 1.0)

    # Per-head Linear(d_head, d_head) padded to full-width (8,8)/(1,8) with zeros
    # outside the head's block, stacked as (N_BLOCKS*3*N_HEADS, ...).
    ln_g, ln_b, w_heads, b_heads = [], [], [], []
    for bidx in range(N_BLOCKS):
        kb_heads = jax.random.split(ks[3 + bidx], 3 * N_HEADS)
        for j in range(3):                       # q, k, v
            for h in range(N_HEADS):
                Wh, bh = linear(kb_heads[j * N_HEADS + h], D_HEAD, D_HEAD)
                wfull = jnp.zeros((HIDDEN_D, HIDDEN_D), jnp.float32)
                wfull = wfull.at[h * D_HEAD:(h + 1) * D_HEAD,
                                 h * D_HEAD:(h + 1) * D_HEAD].set(Wh.T)
                bfull = jnp.zeros((HIDDEN_D,), jnp.float32)
                bfull = bfull.at[h * D_HEAD:(h + 1) * D_HEAD].set(bh)
                w_heads.append(wfull)
                b_heads.append(bfull[None, :])
        ln_g.append(jnp.ones((1, HIDDEN_D), jnp.float32))
        ln_b.append(jnp.zeros((1, HIDDEN_D), jnp.float32))
    params["ln_g"] = jnp.stack(ln_g)            # (N_BLOCKS, 1, 8)
    params["ln_b"] = jnp.stack(ln_b)            # (N_BLOCKS, 1, 8)
    params["w_heads"] = jnp.stack(w_heads)      # (N_BLOCKS*3*N_HEADS, 8, 8)
    params["b_heads"] = jnp.stack(b_heads)      # (N_BLOCKS*3*N_HEADS, 1, 8)

    W, b = linear(ks[3 + N_BLOCKS], HIDDEN_D, OUT_D)
    params["head_w"] = W.T                      # (8, 10)
    params["head_b"] = b[None, :]               # (1, 10)
    return params


def my_vit_forward(params, images):
    N = images.shape[0]
    cols, Ho, Wo = im2col(images)               # (N, 75, 800), no XLA transpose needed
    assert Ho * Wo == INPUT_D, "conv output must flatten to 32*25 = 800 positions"

    T = COUT * N + 1
    # TODO(synk): the reference registers embeddings for n_patches**2+1 = 50 tokens,
    # which is shape-incompatible with its own 32*N+1 tokens; we generate the sinusoid
    # table (same formula) for the actual token count so the broadcast add is valid.
    pos = get_positional_embeddings(T, HIDDEN_D)
    pos_cls = pos.at[0:1, :].add(params["class_token"])   # fold class token into row 0
    rep = replication_matrix(N)

    out = fused_vit(cols.astype(jnp.bfloat16),
                    params["conv_w"], params["conv_b"],
                    params["map_w"], params["map_b"],
                    rep, pos_cls,
                    params["ln_g"], params["ln_b"],
                    params["w_heads"], params["b_heads"],
                    params["head_w"], params["head_b"])
    return out.reshape(N, OUT_D)


if __name__ == "__main__":
    key = jax.random.PRNGKey(0)
    pkey, xkey = jax.random.split(key)
    params = init_params(pkey)
    # Smallest NCHW input whose conv output (k=5, s=4, p=1) is 32x25 = 800 positions,
    # as required by nn.Linear(32*25, hidden_d).
    images = jax.random.normal(xkey, (2, 3, 127, 99), jnp.float32)

    out = jax.jit(my_vit_forward)(params, images)
    out = jax.block_until_ready(out)

    assert out.shape == (2, OUT_D)
    assert bool(jnp.all(jnp.isfinite(out)))
    # softmax rows sum to 1
    assert bool(jnp.allclose(jnp.sum(out, axis=-1), 1.0, atol=1e-5))
    print("KERNEL_OK")
</pallas_src>

<mosaic_0001>
module attributes {stable_mosaic.version = 11 : i64} {
  func.func @_fused_vit_kernel(%arg0: i32, %arg1: memref<1x75x800xbf16, #tpu.memory_space<vmem>>, %arg2: memref<32x75xbf16, #tpu.memory_space<vmem>>, %arg3: memref<32x1xf32, #tpu.memory_space<vmem>>, %arg4: memref<800x8xbf16, #tpu.memory_space<vmem>>, %arg5: memref<1x8xf32, #tpu.memory_space<vmem>>, %arg6: memref<65x32xf32, #tpu.memory_space<vmem>>, %arg7: memref<65x8xf32, #tpu.memory_space<vmem>>, %arg8: memref<2x1x8xf32, #tpu.memory_space<vmem>>, %arg9: memref<2x1x8xf32, #tpu.memory_space<vmem>>, %arg10: memref<12x8x8xf32, #tpu.memory_space<vmem>>, %arg11: memref<12x1x8xf32, #tpu.memory_space<vmem>>, %arg12: memref<8x10xf32, #tpu.memory_space<vmem>>, %arg13: memref<1x10xf32, #tpu.memory_space<vmem>>, %arg14: memref<1x1x10xf32, #tpu.memory_space<vmem>>) attributes {dimension_semantics = [#tpu.dimension_semantics<parallel>], iteration_bounds = array<i64: 2>, scalar_prefetch = 0 : i64, scratch_operands = 0 : i64, tpu.core_type = #tpu.core_type<tc>, window_params = [{transform_indices = @transform_0, window_bounds = array<i64: 1, 75, 800>}, {pipeline_mode = #tpu.pipeline_mode<synchronous>, transform_indices = @transform_1, window_bounds = array<i64: 32, 75>}, {pipeline_mode = #tpu.pipeline_mode<synchronous>, transform_indices = @transform_2, window_bounds = array<i64: 32, 1>}, {pipeline_mode = #tpu.pipeline_mode<synchronous>, transform_indices = @transform_3, window_bounds = array<i64: 800, 8>}, {pipeline_mode = #tpu.pipeline_mode<synchronous>, transform_indices = @transform_4, window_bounds = array<i64: 1, 8>}, {pipeline_mode = #tpu.pipeline_mode<synchronous>, transform_indices = @transform_5, window_bounds = array<i64: 65, 32>}, {pipeline_mode = #tpu.pipeline_mode<synchronous>, transform_indices = @transform_6, window_bounds = array<i64: 65, 8>}, {pipeline_mode = #tpu.pipeline_mode<synchronous>, transform_indices = @transform_7, window_bounds = array<i64: 2, 1, 8>}, {pipeline_mode = #tpu.pipeline_mode<synchronous>, transform_indices = @transform_8, window_bounds = array<i64: 2, 1, 8>}, {pipeline_mode = #tpu.pipeline_mode<synchronous>, transform_indices = @transform_9, window_bounds = array<i64: 12, 8, 8>}, {pipeline_mode = #tpu.pipeline_mode<synchronous>, transform_indices = @transform_10, window_bounds = array<i64: 12, 1, 8>}, {pipeline_mode = #tpu.pipeline_mode<synchronous>, transform_indices = @transform_11, window_bounds = array<i64: 8, 10>}, {pipeline_mode = #tpu.pipeline_mode<synchronous>, transform_indices = @transform_12, window_bounds = array<i64: 1, 10>}, {transform_indices = @transform_13, window_bounds = array<i64: 1, 1, 10>}]} {
    %c0 = arith.constant 0 : index
    %c0_0 = arith.constant 0 : index
    %0 = vector.load %arg2[%c0, %c0_0] : memref<32x75xbf16, #tpu.memory_space<vmem>>, vector<32x75xbf16>
    %c0_1 = arith.constant 0 : index
    %c0_2 = arith.constant 0 : index
    %c0_3 = arith.constant 0 : index
    %1 = vector.load %arg1[%c0_1, %c0_2, %c0_3] : memref<1x75x800xbf16, #tpu.memory_space<vmem>>, vector<1x75x800xbf16>
    %2 = vector.shape_cast %1 : vector<1x75x800xbf16> to vector<75x800xbf16>
    %cst = arith.constant dense<0.000000e+00> : vector<32x800xf32>
    %3 = tpu.matmul %0, %2, %cst {dimension_numbers = #tpu.dot_dimension_numbers<[1], [0], [0], [1], [0, 0, 1, 1], [], []>} : vector<32x75xbf16>, vector<75x800xbf16>, vector<32x800xf32> -> vector<32x800xf32>
    %c0_4 = arith.constant 0 : index
    %c0_5 = arith.constant 0 : index
    %4 = vector.load %arg3[%c0_4, %c0_5] : memref<32x1xf32, #tpu.memory_space<vmem>>, vector<32x1xf32>
    %5 = vector.broadcast %4 : vector<32x1xf32> to vector<32x800xf32>
    %6 = arith.addf %3, %5 : vector<32x800xf32>
    %cst_6 = arith.constant 0.000000e+00 : f32
    %7 = vector.broadcast %cst_6 : f32 to vector<32x800xf32>
    %8 = arith.maximumf %6, %7 : vector<32x800xf32>
    %9 = arith.truncf %8 : vector<32x800xf32> to vector<32x800xbf16>
    %c0_7 = arith.constant 0 : index
    %c0_8 = arith.constant 0 : index
    %10 = vector.load %arg4[%c0_7, %c0_8] : memref<800x8xbf16, #tpu.memory_space<vmem>>, vector<800x8xbf16>
    %cst_9 = arith.constant dense<0.000000e+00> : vector<32x8xf32>
    %11 = tpu.matmul %9, %10, %cst_9 {dimension_numbers = #tpu.dot_dimension_numbers<[1], [0], [0], [1], [0, 0, 1, 1], [], []>} : vector<32x800xbf16>, vector<800x8xbf16>, vector<32x8xf32> -> vector<32x8xf32>
    %c0_10 = arith.constant 0 : index
    %c0_11 = arith.constant 0 : index
    %12 = vector.load %arg5[%c0_10, %c0_11] : memref<1x8xf32, #tpu.memory_space<vmem>>, vector<1x8xf32>
    %13 = vector.broadcast %12 : vector<1x8xf32> to vector<32x8xf32>
    %14 = arith.addf %11, %13 : vector<32x8xf32>
    %c0_12 = arith.constant 0 : index
    %c0_13 = arith.constant 0 : index
    %15 = vector.load %arg6[%c0_12, %c0_13] : memref<65x32xf32, #tpu.memory_space<vmem>>, vector<65x32xf32>
    %cst_14 = arith.constant dense<0.000000e+00> : vector<65x8xf32>
    %16 = tpu.matmul %15, %14, %cst_14 {dimension_numbers = #tpu.dot_dimension_numbers<[1], [0], [0], [1], [0, 0, 1, 1], [], []>} : vector<65x32xf32>, vector<32x8xf32>, vector<65x8xf32> -> vector<65x8xf32>
    %c0_15 = arith.constant 0 : index
    %c0_16 = arith.constant 0 : index
    %17 = vector.load %arg7[%c0_15, %c0_16] : memref<65x8xf32, #tpu.memory_space<vmem>>, vector<65x8xf32>
    %18 = arith.addf %16, %17 : vector<65x8xf32>
    %cst_17 = arith.constant dense<0.000000e+00> : vector<65xf32>
    %19 = vector.multi_reduction <add>, %18, %cst_17 [1] : vector<65x8xf32> to vector<65xf32>
    %20 = vector.shape_cast %19 : vector<65xf32> to vector<65x1xf32>
    %cst_18 = arith.constant 8.000000e+00 : f32
    %21 = vector.broadcast %cst_18 : f32 to vector<65x1xf32>
    %22 = arith.divf %20, %21 : vector<65x1xf32>
    %23 = vector.broadcast %22 : vector<65x1xf32> to vector<65x8xf32>
    %24 = arith.subf %18, %23 : vector<65x8xf32>
    %25 = arith.mulf %24, %24 : vector<65x8xf32>
    %cst_19 = arith.constant dense<0.000000e+00> : vector<65xf32>
    %26 = vector.multi_reduction <add>, %25, %cst_19 [1] : vector<65x8xf32> to vector<65xf32>
    %27 = vector.shape_cast %26 : vector<65xf32> to vector<65x1xf32>
    %cst_20 = arith.constant 8.000000e+00 : f32
    %28 = vector.broadcast %cst_20 : f32 to vector<65x1xf32>
    %29 = arith.divf %27, %28 : vector<65x1xf32>
    %30 = vector.broadcast %22 : vector<65x1xf32> to vector<65x8xf32>
    %31 = arith.subf %18, %30 : vector<65x8xf32>
    %cst_21 = arith.constant 9.99999974E-6 : f32
    %32 = vector.broadcast %cst_21 : f32 to vector<65x1xf32>
    %33 = arith.addf %29, %32 : vector<65x1xf32>
    %34 = math.rsqrt %33 : vector<65x1xf32>
    %35 = vector.broadcast %34 : vector<65x1xf32> to vector<65x8xf32>
    %36 = arith.mulf %31, %35 : vector<65x8xf32>
    %c0_22 = arith.constant 0 : index
    %c0_23 = arith.constant 0 : index
    %c0_24 = arith.constant 0 : index
    %37 = vector.load %arg8[%c0_22, %c0_23, %c0_24] : memref<2x1x8xf32, #tpu.memory_space<vmem>>, vector<1x1x8xf32>
    %38 = vector.shape_cast %37 : vector<1x1x8xf32> to vector<1x8xf32>
    %39 = vector.broadcast %38 : vector<1x8xf32> to vector<65x8xf32>
    %40 = arith.mulf %36, %39 : vector<65x8xf32>
    %c0_25 = arith.constant 0 : index
    %c0_26 = arith.constant 0 : index
    %c0_27 = arith.constant 0 : index
    %41 = vector.load %arg9[%c0_25, %c0_26, %c0_27] : memref<2x1x8xf32, #tpu.memory_space<vmem>>, vector<1x1x8xf32>
    %42 = vector.shape_cast %41 : vector<1x1x8xf32> to vector<1x8xf32>
    %43 = vector.broadcast %42 : vector<1x8xf32> to vector<65x8xf32>
    %44 = arith.addf %40, %43 : vector<65x8xf32>
    %cst_28 = arith.constant 0.000000e+00 : f32
    %45 = vector.broadcast %cst_28 : f32 to vector<65x8xf32>
    %c0_29 = arith.constant 0 : index
    %c0_30 = arith.constant 0 : index
    %c0_31 = arith.constant 0 : index
    %46 = vector.load %arg10[%c0_29, %c0_30, %c0_31] : memref<12x8x8xf32, #tpu.memory_space<vmem>>, vector<1x8x8xf32>
    %47 = vector.shape_cast %46 : vector<1x8x8xf32> to vector<8x8xf32>
    %cst_32 = arith.constant dense<0.000000e+00> : vector<65x8xf32>
    %48 = tpu.matmul %44, %47, %cst_32 {dimension_numbers = #tpu.dot_dimension_numbers<[1], [0], [0], [1], [0, 0, 1, 1], [], []>} : vector<65x8xf32>, vector<8x8xf32>, vector<65x8xf32> -> vector<65x8xf32>
    %c0_33 = arith.constant 0 : index
    %c0_34 = arith.constant 0 : index
    %c0_35 = arith.constant 0 : index
    %49 = vector.load %arg11[%c0_33, %c0_34, %c0_35] : memref<12x1x8xf32, #tpu.memory_space<vmem>>, vector<1x1x8xf32>
    %50 = vector.shape_cast %49 : vector<1x1x8xf32> to vector<1x8xf32>
    %51 = vector.broadcast %50 : vector<1x8xf32> to vector<65x8xf32>
    %52 = arith.addf %48, %51 : vector<65x8xf32>
    %c2 = arith.constant 2 : index
    %c0_36 = arith.constant 0 : index
    %c0_37 = arith.constant 0 : index
    %53 = vector.load %arg10[%c2, %c0_36, %c0_37] : memref<12x8x8xf32, #tpu.memory_space<vmem>>, vector<1x8x8xf32>
    %54 = vector.shape_cast %53 : vector<1x8x8xf32> to vector<8x8xf32>
    %cst_38 = arith.constant dense<0.000000e+00> : vector<65x8xf32>
    %55 = tpu.matmul %44, %54, %cst_38 {dimension_numbers = #tpu.dot_dimension_numbers<[1], [0], [0], [1], [0, 0, 1, 1], [], []>} : vector<65x8xf32>, vector<8x8xf32>, vector<65x8xf32> -> vector<65x8xf32>
    %c2_39 = arith.constant 2 : index
    %c0_40 = arith.constant 0 : index
    %c0_41 = arith.constant 0 : index
    %56 = vector.load %arg11[%c2_39, %c0_40, %c0_41] : memref<12x1x8xf32, #tpu.memory_space<vmem>>, vector<1x1x8xf32>
    %57 = vector.shape_cast %56 : vector<1x1x8xf32> to vector<1x8xf32>
    %58 = vector.broadcast %57 : vector<1x8xf32> to vector<65x8xf32>
    %59 = arith.addf %55, %58 : vector<65x8xf32>
    %c4 = arith.constant 4 : index
    %c0_42 = arith.constant 0 : index
    %c0_43 = arith.constant 0 : index
    %60 = vector.load %arg10[%c4, %c0_42, %c0_43] : memref<12x8x8xf32, #tpu.memory_space<vmem>>, vector<1x8x8xf32>
    %61 = vector.shape_cast %60 : vector<1x8x8xf32> to vector<8x8xf32>
    %cst_44 = arith.constant dense<0.000000e+00> : vector<65x8xf32>
    %62 = tpu.matmul %44, %61, %cst_44 {dimension_numbers = #tpu.dot_dimension_numbers<[1], [0], [0], [1], [0, 0, 1, 1], [], []>} : vector<65x8xf32>, vector<8x8xf32>, vector<65x8xf32> -> vector<65x8xf32>
    %c4_45 = arith.constant 4 : index
    %c0_46 = arith.constant 0 : index
    %c0_47 = arith.constant 0 : index
    %63 = vector.load %arg11[%c4_45, %c0_46, %c0_47] : memref<12x1x8xf32, #tpu.memory_space<vmem>>, vector<1x1x8xf32>
    %64 = vector.shape_cast %63 : vector<1x1x8xf32> to vector<1x8xf32>
    %65 = vector.broadcast %64 : vector<1x8xf32> to vector<65x8xf32>
    %66 = arith.addf %62, %65 : vector<65x8xf32>
    %cst_48 = arith.constant dense<0.000000e+00> : vector<65x65xf32>
    %67 = tpu.matmul %52, %59, %cst_48 {dimension_numbers = #tpu.dot_dimension_numbers<[1], [1], [0], [0], [0, 0, 1, 0], [], []>} : vector<65x8xf32>, vector<65x8xf32>, vector<65x65xf32> -> vector<65x65xf32>
    %cst_49 = arith.constant 5.000000e-01 : f32
    %68 = vector.broadcast %cst_49 : f32 to vector<65x65xf32>
    %69 = arith.mulf %67, %68 : vector<65x65xf32>
    %cst_50 = arith.constant dense<0xFF800000> : vector<65xf32>
    %70 = vector.multi_reduction <maximumf>, %69, %cst_50 [1] : vector<65x65xf32> to vector<65xf32>
    %71 = vector.shape_cast %70 : vector<65xf32> to vector<65x1xf32>
    %72 = vector.broadcast %71 : vector<65x1xf32> to vector<65x65xf32>
    %73 = arith.subf %69, %72 : vector<65x65xf32>
    %74 = math.exp %73 : vector<65x65xf32>
    %cst_51 = arith.constant dense<0.000000e+00> : vector<65xf32>
    %75 = vector.multi_reduction <add>, %74, %cst_51 [1] : vector<65x65xf32> to vector<65xf32>
    %76 = vector.shape_cast %75 : vector<65xf32> to vector<65x1xf32>
    %77 = vector.broadcast %76 : vector<65x1xf32> to vector<65x65xf32>
    %78 = arith.divf %74, %77 : vector<65x65xf32>
    %cst_52 = arith.constant dense<0.000000e+00> : vector<65x8xf32>
    %79 = tpu.matmul %78, %66, %cst_52 {dimension_numbers = #tpu.dot_dimension_numbers<[1], [0], [0], [1], [0, 0, 1, 1], [], []>} : vector<65x65xf32>, vector<65x8xf32>, vector<65x8xf32> -> vector<65x8xf32>
    %80 = arith.addf %45, %79 : vector<65x8xf32>
    %c1 = arith.constant 1 : index
    %c0_53 = arith.constant 0 : index
    %c0_54 = arith.constant 0 : index
    %81 = vector.load %arg10[%c1, %c0_53, %c0_54] : memref<12x8x8xf32, #tpu.memory_space<vmem>>, vector<1x8x8xf32>
    %82 = vector.shape_cast %81 : vector<1x8x8xf32> to vector<8x8xf32>
    %cst_55 = arith.constant dense<0.000000e+00> : vector<65x8xf32>
    %83 = tpu.matmul %44, %82, %cst_55 {dimension_numbers = #tpu.dot_dimension_numbers<[1], [0], [0], [1], [0, 0, 1, 1], [], []>} : vector<65x8xf32>, vector<8x8xf32>, vector<65x8xf32> -> vector<65x8xf32>
    %c1_56 = arith.constant 1 : index
    %c0_57 = arith.constant 0 : index
    %c0_58 = arith.constant 0 : index
    %84 = vector.load %arg11[%c1_56, %c0_57, %c0_58] : memref<12x1x8xf32, #tpu.memory_space<vmem>>, vector<1x1x8xf32>
    %85 = vector.shape_cast %84 : vector<1x1x8xf32> to vector<1x8xf32>
    %86 = vector.broadcast %85 : vector<1x8xf32> to vector<65x8xf32>
    %87 = arith.addf %83, %86 : vector<65x8xf32>
    %c3 = arith.constant 3 : index
    %c0_59 = arith.constant 0 : index
    %c0_60 = arith.constant 0 : index
    %88 = vector.load %arg10[%c3, %c0_59, %c0_60] : memref<12x8x8xf32, #tpu.memory_space<vmem>>, vector<1x8x8xf32>
    %89 = vector.shape_cast %88 : vector<1x8x8xf32> to vector<8x8xf32>
    %cst_61 = arith.constant dense<0.000000e+00> : vector<65x8xf32>
    %90 = tpu.matmul %44, %89, %cst_61 {dimension_numbers = #tpu.dot_dimension_numbers<[1], [0], [0], [1], [0, 0, 1, 1], [], []>} : vector<65x8xf32>, vector<8x8xf32>, vector<65x8xf32> -> vector<65x8xf32>
    %c3_62 = arith.constant 3 : index
    %c0_63 = arith.constant 0 : index
    %c0_64 = arith.constant 0 : index
    %91 = vector.load %arg11[%c3_62, %c0_63, %c0_64] : memref<12x1x8xf32, #tpu.memory_space<vmem>>, vector<1x1x8xf32>
    %92 = vector.shape_cast %91 : vector<1x1x8xf32> to vector<1x8xf32>
    %93 = vector.broadcast %92 : vector<1x8xf32> to vector<65x8xf32>
    %94 = arith.addf %90, %93 : vector<65x8xf32>
    %c5 = arith.constant 5 : index
    %c0_65 = arith.constant 0 : index
    %c0_66 = arith.constant 0 : index
    %95 = vector.load %arg10[%c5, %c0_65, %c0_66] : memref<12x8x8xf32, #tpu.memory_space<vmem>>, vector<1x8x8xf32>
    %96 = vector.shape_cast %95 : vector<1x8x8xf32> to vector<8x8xf32>
    %cst_67 = arith.constant dense<0.000000e+00> : vector<65x8xf32>
    %97 = tpu.matmul %44, %96, %cst_67 {dimension_numbers = #tpu.dot_dimension_numbers<[1], [0], [0], [1], [0, 0, 1, 1], [], []>} : vector<65x8xf32>, vector<8x8xf32>, vector<65x8xf32> -> vector<65x8xf32>
    %c5_68 = arith.constant 5 : index
    %c0_69 = arith.constant 0 : index
    %c0_70 = arith.constant 0 : index
    %98 = vector.load %arg11[%c5_68, %c0_69, %c0_70] : memref<12x1x8xf32, #tpu.memory_space<vmem>>, vector<1x1x8xf32>
    %99 = vector.shape_cast %98 : vector<1x1x8xf32> to vector<1x8xf32>
    %100 = vector.broadcast %99 : vector<1x8xf32> to vector<65x8xf32>
    %101 = arith.addf %97, %100 : vector<65x8xf32>
    %cst_71 = arith.constant dense<0.000000e+00> : vector<65x65xf32>
    %102 = tpu.matmul %87, %94, %cst_71 {dimension_numbers = #tpu.dot_dimension_numbers<[1], [1], [0], [0], [0, 0, 1, 0], [], []>} : vector<65x8xf32>, vector<65x8xf32>, vector<65x65xf32> -> vector<65x65xf32>
    %cst_72 = arith.constant 5.000000e-01 : f32
    %103 = vector.broadcast %cst_72 : f32 to vector<65x65xf32>
    %104 = arith.mulf %102, %103 : vector<65x65xf32>
    %cst_73 = arith.constant dense<0xFF800000> : vector<65xf32>
    %105 = vector.multi_reduction <maximumf>, %104, %cst_73 [1] : vector<65x65xf32> to vector<65xf32>
    %106 = vector.shape_cast %105 : vector<65xf32> to vector<65x1xf32>
    %107 = vector.broadcast %106 : vector<65x1xf32> to vector<65x65xf32>
    %108 = arith.subf %104, %107 : vector<65x65xf32>
    %109 = math.exp %108 : vector<65x65xf32>
    %cst_74 = arith.constant dense<0.000000e+00> : vector<65xf32>
    %110 = vector.multi_reduction <add>, %109, %cst_74 [1] : vector<65x65xf32> to vector<65xf32>
    %111 = vector.shape_cast %110 : vector<65xf32> to vector<65x1xf32>
    %112 = vector.broadcast %111 : vector<65x1xf32> to vector<65x65xf32>
    %113 = arith.divf %109, %112 : vector<65x65xf32>
    %cst_75 = arith.constant dense<0.000000e+00> : vector<65x8xf32>
    %114 = tpu.matmul %113, %101, %cst_75 {dimension_numbers = #tpu.dot_dimension_numbers<[1], [0], [0], [1], [0, 0, 1, 1], [], []>} : vector<65x65xf32>, vector<65x8xf32>, vector<65x8xf32> -> vector<65x8xf32>
    %115 = arith.addf %80, %114 : vector<65x8xf32>
    %116 = arith.addf %18, %115 : vector<65x8xf32>
    %cst_76 = arith.constant dense<0.000000e+00> : vector<65xf32>
    %117 = vector.multi_reduction <add>, %116, %cst_76 [1] : vector<65x8xf32> to vector<65xf32>
    %118 = vector.shape_cast %117 : vector<65xf32> to vector<65x1xf32>
    %cst_77 = arith.constant 8.000000e+00 : f32
    %119 = vector.broadcast %cst_77 : f32 to vector<65x1xf32>
    %120 = arith.divf %118, %119 : vector<65x1xf32>
    %121 = vector.broadcast %120 : vector<65x1xf32> to vector<65x8xf32>
    %122 = arith.subf %116, %121 : vector<65x8xf32>
    %123 = arith.mulf %122, %122 : vector<65x8xf32>
    %cst_78 = arith.constant dense<0.000000e+00> : vector<65xf32>
    %124 = vector.multi_reduction <add>, %123, %cst_78 [1] : vector<65x8xf32> to vector<65xf32>
    %125 = vector.shape_cast %124 : vector<65xf32> to vector<65x1xf32>
    %cst_79 = arith.constant 8.000000e+00 : f32
    %126 = vector.broadcast %cst_79 : f32 to vector<65x1xf32>
    %127 = arith.divf %125, %126 : vector<65x1xf32>
    %128 = vector.broadcast %120 : vector<65x1xf32> to vector<65x8xf32>
    %129 = arith.subf %116, %128 : vector<65x8xf32>
    %cst_80 = arith.constant 9.99999974E-6 : f32
    %130 = vector.broadcast %cst_80 : f32 to vector<65x1xf32>
    %131 = arith.addf %127, %130 : vector<65x1xf32>
    %132 = math.rsqrt %131 : vector<65x1xf32>
    %133 = vector.broadcast %132 : vector<65x1xf32> to vector<65x8xf32>
    %134 = arith.mulf %129, %133 : vector<65x8xf32>
    %c1_81 = arith.constant 1 : index
    %c0_82 = arith.constant 0 : index
    %c0_83 = arith.constant 0 : index
    %135 = vector.load %arg8[%c1_81, %c0_82, %c0_83] : memref<2x1x8xf32, #tpu.memory_space<vmem>>, vector<1x1x8xf32>
    %136 = vector.shape_cast %135 : vector<1x1x8xf32> to vector<1x8xf32>
    %137 = vector.broadcast %136 : vector<1x8xf32> to vector<65x8xf32>
    %138 = arith.mulf %134, %137 : vector<65x8xf32>
    %c1_84 = arith.constant 1 : index
    %c0_85 = arith.constant 0 : index
    %c0_86 = arith.constant 0 : index
    %139 = vector.load %arg9[%c1_84, %c0_85, %c0_86] : memref<2x1x8xf32, #tpu.memory_space<vmem>>, vector<1x1x8xf32>
    %140 = vector.shape_cast %139 : vector<1x1x8xf32> to vector<1x8xf32>
    %141 = vector.broadcast %140 : vector<1x8xf32> to vector<65x8xf32>
    %142 = arith.addf %138, %141 : vector<65x8xf32>
    %cst_87 = arith.constant 0.000000e+00 : f32
    %143 = vector.broadcast %cst_87 : f32 to vector<65x8xf32>
    %c6 = arith.constant 6 : index
    %c0_88 = arith.constant 0 : index
    %c0_89 = arith.constant 0 : index
    %144 = vector.load %arg10[%c6, %c0_88, %c0_89] : memref<12x8x8xf32, #tpu.memory_space<vmem>>, vector<1x8x8xf32>
    %145 = vector.shape_cast %144 : vector<1x8x8xf32> to vector<8x8xf32>
    %cst_90 = arith.constant dense<0.000000e+00> : vector<65x8xf32>
    %146 = tpu.matmul %142, %145, %cst_90 {dimension_numbers = #tpu.dot_dimension_numbers<[1], [0], [0], [1], [0, 0, 1, 1], [], []>} : vector<65x8xf32>, vector<8x8xf32>, vector<65x8xf32> -> vector<65x8xf32>
    %c6_91 = arith.constant 6 : index
    %c0_92 = arith.constant 0 : index
    %c0_93 = arith.constant 0 : index
    %147 = vector.load %arg11[%c6_91, %c0_92, %c0_93] : memref<12x1x8xf32, #tpu.memory_space<vmem>>, vector<1x1x8xf32>
    %148 = vector.shape_cast %147 : vector<1x1x8xf32> to vector<1x8xf32>
    %149 = vector.broadcast %148 : vector<1x8xf32> to vector<65x8xf32>
    %150 = arith.addf %146, %149 : vector<65x8xf32>
    %c8 = arith.constant 8 : index
    %c0_94 = arith.constant 0 : index
    %c0_95 = arith.constant 0 : index
    %151 = vector.load %arg10[%c8, %c0_94, %c0_95] : memref<12x8x8xf32, #tpu.memory_space<vmem>>, vector<1x8x8xf32>
    %152 = vector.shape_cast %151 : vector<1x8x8xf32> to vector<8x8xf32>
    %cst_96 = arith.constant dense<0.000000e+00> : vector<65x8xf32>
    %153 = tpu.matmul %142, %152, %cst_96 {dimension_numbers = #tpu.dot_dimension_numbers<[1], [0], [0], [1], [0, 0, 1, 1], [], []>} : vector<65x8xf32>, vector<8x8xf32>, vector<65x8xf32> -> vector<65x8xf32>
    %c8_97 = arith.constant 8 : index
    %c0_98 = arith.constant 0 : index
    %c0_99 = arith.constant 0 : index
    %154 = vector.load %arg11[%c8_97, %c0_98, %c0_99] : memref<12x1x8xf32, #tpu.memory_space<vmem>>, vector<1x1x8xf32>
    %155 = vector.shape_cast %154 : vector<1x1x8xf32> to vector<1x8xf32>
    %156 = vector.broadcast %155 : vector<1x8xf32> to vector<65x8xf32>
    %157 = arith.addf %153, %156 : vector<65x8xf32>
    %c10 = arith.constant 10 : index
    %c0_100 = arith.constant 0 : index
    %c0_101 = arith.constant 0 : index
    %158 = vector.load %arg10[%c10, %c0_100, %c0_101] : memref<12x8x8xf32, #tpu.memory_space<vmem>>, vector<1x8x8xf32>
    %159 = vector.shape_cast %158 : vector<1x8x8xf32> to vector<8x8xf32>
    %cst_102 = arith.constant dense<0.000000e+00> : vector<65x8xf32>
    %160 = tpu.matmul %142, %159, %cst_102 {dimension_numbers = #tpu.dot_dimension_numbers<[1], [0], [0], [1], [0, 0, 1, 1], [], []>} : vector<65x8xf32>, vector<8x8xf32>, vector<65x8xf32> -> vector<65x8xf32>
    %c10_103 = arith.constant 10 : index
    %c0_104 = arith.constant 0 : index
    %c0_105 = arith.constant 0 : index
    %161 = vector.load %arg11[%c10_103, %c0_104, %c0_105] : memref<12x1x8xf32, #tpu.memory_space<vmem>>, vector<1x1x8xf32>
    %162 = vector.shape_cast %161 : vector<1x1x8xf32> to vector<1x8xf32>
    %163 = vector.broadcast %162 : vector<1x8xf32> to vector<65x8xf32>
    %164 = arith.addf %160, %163 : vector<65x8xf32>
    %cst_106 = arith.constant dense<0.000000e+00> : vector<65x65xf32>
    %165 = tpu.matmul %150, %157, %cst_106 {dimension_numbers = #tpu.dot_dimension_numbers<[1], [1], [0], [0], [0, 0, 1, 0], [], []>} : vector<65x8xf32>, vector<65x8xf32>, vector<65x65xf32> -> vector<65x65xf32>
    %cst_107 = arith.constant 5.000000e-01 : f32
    %166 = vector.broadcast %cst_107 : f32 to vector<65x65xf32>
    %167 = arith.mulf %165, %166 : vector<65x65xf32>
    %cst_108 = arith.constant dense<0xFF800000> : vector<65xf32>
    %168 = vector.multi_reduction <maximumf>, %167, %cst_108 [1] : vector<65x65xf32> to vector<65xf32>
    %169 = vector.shape_cast %168 : vector<65xf32> to vector<65x1xf32>
    %170 = vector.broadcast %169 : vector<65x1xf32> to vector<65x65xf32>
    %171 = arith.subf %167, %170 : vector<65x65xf32>
    %172 = math.exp %171 : vector<65x65xf32>
    %cst_109 = arith.constant dense<0.000000e+00> : vector<65xf32>
    %173 = vector.multi_reduction <add>, %172, %cst_109 [1] : vector<65x65xf32> to vector<65xf32>
    %174 = vector.shape_cast %173 : vector<65xf32> to vector<65x1xf32>
    %175 = vector.broadcast %174 : vector<65x1xf32> to vector<65x65xf32>
    %176 = arith.divf %172, %175 : vector<65x65xf32>
    %cst_110 = arith.constant dense<0.000000e+00> : vector<65x8xf32>
    %177 = tpu.matmul %176, %164, %cst_110 {dimension_numbers = #tpu.dot_dimension_numbers<[1], [0], [0], [1], [0, 0, 1, 1], [], []>} : vector<65x65xf32>, vector<65x8xf32>, vector<65x8xf32> -> vector<65x8xf32>
    %178 = arith.addf %143, %177 : vector<65x8xf32>
    %c7 = arith.constant 7 : index
    %c0_111 = arith.constant 0 : index
    %c0_112 = arith.constant 0 : index
    %179 = vector.load %arg10[%c7, %c0_111, %c0_112] : memref<12x8x8xf32, #tpu.memory_space<vmem>>, vector<1x8x8xf32>
    %180 = vector.shape_cast %179 : vector<1x8x8xf32> to vector<8x8xf32>
    %cst_113 = arith.constant dense<0.000000e+00> : vector<65x8xf32>
    %181 = tpu.matmul %142, %180, %cst_113 {dimension_numbers = #tpu.dot_dimension_numbers<[1], [0], [0], [1], [0, 0, 1, 1], [], []>} : vector<65x8xf32>, vector<8x8xf32>, vector<65x8xf32> -> vector<65x8xf32>
    %c7_114 = arith.constant 7 : index
    %c0_115 = arith.constant 0 : index
    %c0_116 = arith.constant 0 : index
    %182 = vector.load %arg11[%c7_114, %c0_115, %c0_116] : memref<12x1x8xf32, #tpu.memory_space<vmem>>, vector<1x1x8xf32>
    %183 = vector.shape_cast %182 : vector<1x1x8xf32> to vector<1x8xf32>
    %184 = vector.broadcast %183 : vector<1x8xf32> to vector<65x8xf32>
    %185 = arith.addf %181, %184 : vector<65x8xf32>
    %c9 = arith.constant 9 : index
    %c0_117 = arith.constant 0 : index
    %c0_118 = arith.constant 0 : index
    %186 = vector.load %arg10[%c9, %c0_117, %c0_118] : memref<12x8x8xf32, #tpu.memory_space<vmem>>, vector<1x8x8xf32>
    %187 = vector.shape_cast %186 : vector<1x8x8xf32> to vector<8x8xf32>
    %cst_119 = arith.constant dense<0.000000e+00> : vector<65x8xf32>
    %188 = tpu.matmul %142, %187, %cst_119 {dimension_numbers = #tpu.dot_dimension_numbers<[1], [0], [0], [1], [0, 0, 1, 1], [], []>} : vector<65x8xf32>, vector<8x8xf32>, vector<65x8xf32> -> vector<65x8xf32>
    %c9_120 = arith.constant 9 : index
    %c0_121 = arith.constant 0 : index
    %c0_122 = arith.constant 0 : index
    %189 = vector.load %arg11[%c9_120, %c0_121, %c0_122] : memref<12x1x8xf32, #tpu.memory_space<vmem>>, vector<1x1x8xf32>
    %190 = vector.shape_cast %189 : vector<1x1x8xf32> to vector<1x8xf32>
    %191 = vector.broadcast %190 : vector<1x8xf32> to vector<65x8xf32>
    %192 = arith.addf %188, %191 : vector<65x8xf32>
    %c11 = arith.constant 11 : index
    %c0_123 = arith.constant 0 : index
    %c0_124 = arith.constant 0 : index
    %193 = vector.load %arg10[%c11, %c0_123, %c0_124] : memref<12x8x8xf32, #tpu.memory_space<vmem>>, vector<1x8x8xf32>
    %194 = vector.shape_cast %193 : vector<1x8x8xf32> to vector<8x8xf32>
    %cst_125 = arith.constant dense<0.000000e+00> : vector<65x8xf32>
    %195 = tpu.matmul %142, %194, %cst_125 {dimension_numbers = #tpu.dot_dimension_numbers<[1], [0], [0], [1], [0, 0, 1, 1], [], []>} : vector<65x8xf32>, vector<8x8xf32>, vector<65x8xf32> -> vector<65x8xf32>
    %c11_126 = arith.constant 11 : index
    %c0_127 = arith.constant 0 : index
    %c0_128 = arith.constant 0 : index
    %196 = vector.load %arg11[%c11_126, %c0_127, %c0_128] : memref<12x1x8xf32, #tpu.memory_space<vmem>>, vector<1x1x8xf32>
    %197 = vector.shape_cast %196 : vector<1x1x8xf32> to vector<1x8xf32>
    %198 = vector.broadcast %197 : vector<1x8xf32> to vector<65x8xf32>
    %199 = arith.addf %195, %198 : vector<65x8xf32>
    %cst_129 = arith.constant dense<0.000000e+00> : vector<65x65xf32>
    %200 = tpu.matmul %185, %192, %cst_129 {dimension_numbers = #tpu.dot_dimension_numbers<[1], [1], [0], [0], [0, 0, 1, 0], [], []>} : vector<65x8xf32>, vector<65x8xf32>, vector<65x65xf32> -> vector<65x65xf32>
    %cst_130 = arith.constant 5.000000e-01 : f32
    %201 = vector.broadcast %cst_130 : f32 to vector<65x65xf32>
    %202 = arith.mulf %200, %201 : vector<65x65xf32>
    %cst_131 = arith.constant dense<0xFF800000> : vector<65xf32>
    %203 = vector.multi_reduction <maximumf>, %202, %cst_131 [1] : vector<65x65xf32> to vector<65xf32>
    %204 = vector.shape_cast %203 : vector<65xf32> to vector<65x1xf32>
    %205 = vector.broadcast %204 : vector<65x1xf32> to vector<65x65xf32>
    %206 = arith.subf %202, %205 : vector<65x65xf32>
    %207 = math.exp %206 : vector<65x65xf32>
    %cst_132 = arith.constant dense<0.000000e+00> : vector<65xf32>
    %208 = vector.multi_reduction <add>, %207, %cst_132 [1] : vector<65x65xf32> to vector<65xf32>
    %209 = vector.shape_cast %208 : vector<65xf32> to vector<65x1xf32>
    %210 = vector.broadcast %209 : vector<65x1xf32> to vector<65x65xf32>
    %211 = arith.divf %207, %210 : vector<65x65xf32>
    %cst_133 = arith.constant dense<0.000000e+00> : vector<65x8xf32>
    %212 = tpu.matmul %211, %199, %cst_133 {dimension_numbers = #tpu.dot_dimension_numbers<[1], [0], [0], [1], [0, 0, 1, 1], [], []>} : vector<65x65xf32>, vector<65x8xf32>, vector<65x8xf32> -> vector<65x8xf32>
    %213 = arith.addf %178, %212 : vector<65x8xf32>
    %214 = arith.addf %116, %213 : vector<65x8xf32>
    %215 = vector.extract_strided_slice %214 {offsets = [0, 0], sizes = [1, 8], strides = [1, 1]} : vector<65x8xf32> to vector<1x8xf32>
    %c0_134 = arith.constant 0 : index
    %c0_135 = arith.constant 0 : index
    %216 = vector.load %arg12[%c0_134, %c0_135] : memref<8x10xf32, #tpu.memory_space<vmem>>, vector<8x10xf32>
    %cst_136 = arith.constant dense<0.000000e+00> : vector<1x10xf32>
    %217 = tpu.matmul %215, %216, %cst_136 {dimension_numbers = #tpu.dot_dimension_numbers<[1], [0], [0], [1], [0, 0, 1, 1], [], []>} : vector<1x8xf32>, vector<8x10xf32>, vector<1x10xf32> -> vector<1x10xf32>
    %c0_137 = arith.constant 0 : index
    %c0_138 = arith.constant 0 : index
    %218 = vector.load %arg13[%c0_137, %c0_138] : memref<1x10xf32, #tpu.memory_space<vmem>>, vector<1x10xf32>
    %219 = arith.addf %217, %218 : vector<1x10xf32>
    %cst_139 = arith.constant dense<0xFF800000> : vector<1xf32>
    %220 = vector.multi_reduction <maximumf>, %219, %cst_139 [1] : vector<1x10xf32> to vector<1xf32>
    %221 = vector.shape_cast %220 : vector<1xf32> to vector<1x1xf32>
    %222 = vector.broadcast %221 : vector<1x1xf32> to vector<1x10xf32>
    %223 = arith.subf %219, %222 : vector<1x10xf32>
    %224 = math.exp %223 : vector<1x10xf32>
    %cst_140 = arith.constant dense<0.000000e+00> : vector<1xf32>
    %225 = vector.multi_reduction <add>, %224, %cst_140 [1] : vector<1x10xf32> to vector<1xf32>
    %226 = vector.shape_cast %225 : vector<1xf32> to vector<1x1xf32>
    %227 = vector.broadcast %226 : vector<1x1xf32> to vector<1x10xf32>
    %228 = arith.divf %224, %227 : vector<1x10xf32>
    %c0_141 = arith.constant 0 : index
    %c0_142 = arith.constant 0 : index
    %c0_143 = arith.constant 0 : index
    %229 = vector.load %arg14[%c0_141, %c0_142, %c0_143] : memref<1x1x10xf32, #tpu.memory_space<vmem>>, vector<1x1x10xf32>
    %230 = vector.shape_cast %229 : vector<1x1x10xf32> to vector<1x10xf32>
    %231 = vector.shape_cast %228 : vector<1x10xf32> to vector<1x1x10xf32>
    tpu.vector_store %arg14[%c0_141, %c0_142, %c0_143], %231 {strides = array<i32>} : memref<1x1x10xf32, #tpu.memory_space<vmem>>, vector<1x1x10xf32>,
    return
  }
  func.func @transform_0(%arg0: i32) -> (i32, i32, i32) {
    %c0_i32 = arith.constant 0 : i32
    %c0_i32_0 = arith.constant 0 : i32
    %c0_i32_1 = arith.constant 0 : i32
    return %arg0, %c0_i32, %c0_i32_0 : i32, i32, i32
  }
  func.func @transform_1(%arg0: i32) -> (i32, i32) {
    %c0_i32 = arith.constant 0 : i32
    %c0_i32_0 = arith.constant 0 : i32
    %c0_i32_1 = arith.constant 0 : i32
    return %c0_i32, %c0_i32_0 : i32, i32
  }
  func.func @transform_2(%arg0: i32) -> (i32, i32) {
    %c0_i32 = arith.constant 0 : i32
    %c0_i32_0 = arith.constant 0 : i32
    %c0_i32_1 = arith.constant 0 : i32
    return %c0_i32, %c0_i32_0 : i32, i32
  }
  func.func @transform_3(%arg0: i32) -> (i32, i32) {
    %c0_i32 = arith.constant 0 : i32
    %c0_i32_0 = arith.constant 0 : i32
    %c0_i32_1 = arith.constant 0 : i32
    return %c0_i32, %c0_i32_0 : i32, i32
  }
  func.func @transform_4(%arg0: i32) -> (i32, i32) {
    %c0_i32 = arith.constant 0 : i32
    %c0_i32_0 = arith.constant 0 : i32
    %c0_i32_1 = arith.constant 0 : i32
    return %c0_i32, %c0_i32_0 : i32, i32
  }
  func.func @transform_5(%arg0: i32) -> (i32, i32) {
    %c0_i32 = arith.constant 0 : i32
    %c0_i32_0 = arith.constant 0 : i32
    %c0_i32_1 = arith.constant 0 : i32
    return %c0_i32, %c0_i32_0 : i32, i32
  }
  func.func @transform_6(%arg0: i32) -> (i32, i32) {
    %c0_i32 = arith.constant 0 : i32
    %c0_i32_0 = arith.constant 0 : i32
    %c0_i32_1 = arith.constant 0 : i32
    return %c0_i32, %c0_i32_0 : i32, i32
  }
  func.func @transform_7(%arg0: i32) -> (i32, i32, i32) {
    %c0_i32 = arith.constant 0 : i32
    %c0_i32_0 = arith.constant 0 : i32
    %c0_i32_1 = arith.constant 0 : i32
    %c0_i32_2 = arith.constant 0 : i32
    return %c0_i32, %c0_i32_0, %c0_i32_1 : i32, i32, i32
  }
  func.func @transform_8(%arg0: i32) -> (i32, i32, i32) {
    %c0_i32 = arith.constant 0 : i32
    %c0_i32_0 = arith.constant 0 : i32
    %c0_i32_1 = arith.constant 0 : i32
    %c0_i32_2 = arith.constant 0 : i32
    return %c0_i32, %c0_i32_0, %c0_i32_1 : i32, i32, i32
  }
  func.func @transform_9(%arg0: i32) -> (i32, i32, i32) {
    %c0_i32 = arith.constant 0 : i32
    %c0_i32_0 = arith.constant 0 : i32
    %c0_i32_1 = arith.constant 0 : i32
    %c0_i32_2 = arith.constant 0 : i32
    return %c0_i32, %c0_i32_0, %c0_i32_1 : i32, i32, i32
  }
  func.func @transform_10(%arg0: i32) -> (i32, i32, i32) {
    %c0_i32 = arith.constant 0 : i32
    %c0_i32_0 = arith.constant 0 : i32
    %c0_i32_1 = arith.constant 0 : i32
    %c0_i32_2 = arith.constant 0 : i32
    return %c0_i32, %c0_i32_0, %c0_i32_1 : i32, i32, i32
  }
  func.func @transform_11(%arg0: i32) -> (i32, i32) {
    %c0_i32 = arith.constant 0 : i32
    %c0_i32_0 = arith.constant 0 : i32
    %c0_i32_1 = arith.constant 0 : i32
    return %c0_i32, %c0_i32_0 : i32, i32
  }
  func.func @transform_12(%arg0: i32) -> (i32, i32) {
    %c0_i32 = arith.constant 0 : i32
    %c0_i32_0 = arith.constant 0 : i32
    %c0_i32_1 = arith.constant 0 : i32
    return %c0_i32, %c0_i32_0 : i32, i32
  }
  func.func @transform_13(%arg0: i32) -> (i32, i32, i32) {
    %c0_i32 = arith.constant 0 : i32
    %c0_i32_0 = arith.constant 0 : i32
    %c0_i32_1 = arith.constant 0 : i32
    return %arg0, %c0_i32, %c0_i32_0 : i32, i32, i32
  }
}

</mosaic_0001>

<bundles_post_ra>
// kernel: my_vit_forward.1
= control target key start
LH: loop header
LB: loop body
LE: loop exit
PB: predicated region body
PF: predicated region fallthrough
CT: control target
= control target key end

     0   :  { %18 = vsyncpa [#allocation3], 0  ;;  %s9572_s0 = inlined_call_operand.vmem [shape: bf16[2,75,800], index: 0, kind: input, shape index: {}]   ;;  %s9573_s1 = inlined_call_operand.vmem [shape: bf16[32,75], index: 1, kind: input, shape index: {}]   ;;  %s9574_s2 = inlined_call_operand.vmem [shape: f32[32,1], index: 2, kind: input, shape index: {}]   ;;  %s9575_s3 = inlined_call_operand.vmem [shape: bf16[800,8], index: 3, kind: input, shape index: {}]   ;;  %s9576_s4 = inlined_call_operand.vmem [shape: f32[1,8], index: 4, kind: input, shape index: {}]   ;;  %s9577_s5 = inlined_call_operand.vmem [shape: f32[65,32], index: 5, kind: input, shape index: {}]   ;;  %s9578_s6 = inlined_call_operand.vmem [shape: f32[65,8], index: 6, kind: input, shape index: {}]   ;;  %s9579_s7 = inlined_call_operand.vmem [shape: f32[2,1,8], index: 7, kind: input, shape index: {}]   ;;  %s9580_s8 = inlined_call_operand.vmem [shape: f32[2,1,8], index: 8, kind: input, shape index: {}]   ;;  %s9581_s9 = inlined_call_operand.vmem [shape: f32[12,8,8], index: 9, kind: input, shape index: {}]   ;;  %s9582_s10 = inlined_call_operand.vmem [shape: f32[12,1,8], index: 10, kind: input, shape index: {}]   ;;  %s9583_s11 = inlined_call_operand.vmem [shape: f32[8,10], index: 11, kind: input, shape index: {}]   ;;  %s9584_s12 = inlined_call_operand.vmem [shape: f32[1,10], index: 12, kind: input, shape index: {}]   ;;  %s9585_s13 = inlined_call_operand.hbm [shape: f32[2,1,10], index: 13, kind: output, shape index: {}]  }
   0x1   :  { %20 = vsyncpa [#allocation3 + $0x1], 0  ;;  %s7448_s25 = smov 0   ;;  %s7450_s26 = smov 0  }
   0x2   :  { %s7452_s27 = smov 0   ;;  %s7454_s28 = smov 0  }
   0x3 LB: > { %9591 = sst [smem:[#allocation5_spill]] %s7358_s25  ;;  %s7469_s29 = sadd.s32 4294967295, %s7370_s28   ;;  %s7370_s28 = sphi %s7454_s28, %s9602_s28   ;;  %s7366_s27 = sphi %s7452_s27, %s9604_s27   ;;  %s7362_s26 = sphi %s7450_s26, %s9606_s26   ;;  %s7358_s25 = sphi %s7448_s25, %s9605_s25  }
   0x4   : > { %9592 = sst [smem:[#allocation6_spill]] %s7366_s27  ;;  %s5333_s30 = sadd.s32 4294967294, %s7370_s28  }
   0x5   : > { %s7473_s14 = sadd.s32 1, %s7370_s28   ;;  %s311_s15 = sadd.s32 1, %s7366_s27 }
   0x6   : > { %9593 = sst [smem:[#allocation7_spill]] %s7473_s14  ;;  %s308_s16 = ssub.s32 %s7370_s28, %s7473_s14 }
   0x7   : > { %p321_p0 = scmp.ne.s32.totalorder %s7366_s27, %s7362_s26  ;;  %p309_p1 = scmp.eq.s32.totalorder %s308_s16, 0 }
   0x8   : > { %p322_p2 = scmp.eq.s32.totalorder %s7469_s29, 1  ;;  %p327_p3 = scmp.ne.s32.totalorder %s7362_s26, %s7358_s25 }
   0x9   : > { %p328_p4 = scmp.eq.s32.totalorder %s5333_s30, 1  ;;  %p5336_p7 = scmp.ge.s32.totalorder %s7370_s28, 1 }
   0xa   : > { %s7484_s17 = scalar_select %p309_p1, %s7366_s27, %s311_s15  }
   0xb   : > { %p7486_p5 = por %p322_p2, %p321_p0  ;;  %p7490_p6 = por %p328_p4, %p327_p3 }
   0xc   : > { %9594 = sst [smem:[#allocation8_spill]] %s7484_s17  ;;  %p390_p8 = scmp.lt.s32.totalorder %s7370_s28, 3 }
   0xd   : > { %s9596_s19 = scalar_select %p7490_p6, 1, 0 }
   0xe   : > { %p391_p9 = pnand %p5336_p7, %p390_p8 }
   0xf   : > { %9597 = sst [smem:[#allocation9_spill]] %s9596_s19  ;;  %p433_p10 = scmp.lt.s32.totalorder (!%p391_p9), %s7469_s29, 1  ;;  %v7372_v0 = vmov (!%p391_p9), 0   ;;  %v483_v1 = vld [vmem:[%s9574_s2] sm:$0xff] (!%p391_p9)  ;;  %v485_v2 = vld [vmem:[%s9574_s2 + $0x10] sm:$0xff] (!%p391_p9)  ;;  %v484_v3 = vld [vmem:[%s9574_s2 + $0x8] sm:$0xff] (!%p391_p9) }
  0x10   : > { %394 = sbr.rel (%p391_p9) target bundleno = 4500 (0x1194), region = 72  ;;  %754 = vmatprep.mubr.bf16.mxu0 (!%p391_p9), %v7372_v0  ;;  %807 = vmatprep.mubr.bf16.mxu1 (!%p391_p9), %v7372_v0  ;;  %v486_v4 = vld [vmem:[%s9574_s2 + $0x18] sm:$0xff] (!%p391_p9)  ;;  %vm697_vm0 = vcmask (!%p391_p9), 1044480   ;;  %vm698_vm1 = vcmask (!%p391_p9), 1045504   ;;  %v7373_v14 = vmov (!%p391_p9), 65535   ;;  %v7052_v34 = vld [vmem:[%s9573_s1] sm:$0xff] (!%p391_p9)  }
  0x11   : > { %7020 = vset.pattern.permute.xlu0 (!%p391_p9), %v7372_v0  ;;  %7021 = vset.pattern.permute.xlu1 (!%p391_p9), %v7372_v0  ;;  %v699_v15 = vsel (!%p391_p9), %vm697_vm0, 4294967295, %v7373_v14  ;;  %vm690_vm2 = vcmask (!%p391_p9), 613376   ;;  %v7065_v41 = vld [vmem:[%s9573_s1 + $0x8] sm:$0xff] (!%p391_p9)   ;;  %v7074_v52 = vld [vmem:[%s9575_s3 + $0x40] sm:$0xff] (!%p391_p9)   ;;  %v7082_v60 = vld [vmem:[%s9575_s3 + $0x50] sm:$0xff] (!%p391_p9)   ;;  %vm1379_vm3 = vcmask (!%p391_p9), 261120  }
  0x12   : > { %489 = vperm.xlu0 (!%p391_p9), %7020, %v483_v1   ;;  %499 = vperm.xlu1 (!%p391_p9), %7021, %v485_v2   ;;  %v7535_v23 = vsel (!%p391_p9), %vm698_vm1, %v699_v15, 0  ;;  %v7076_v53 = vld [vmem:[%s9575_s3 + $0xc0] sm:$0xff] (!%p391_p9)   ;;  %v7078_v56 = vld [vmem:[%s9575_s3 + $0x48] sm:$0xff] (!%p391_p9)   ;;  %v7084_v61 = vld [vmem:[%s9575_s3 + $0xd0] sm:$0xff] (!%p391_p9)   ;;  %vm7375_vm4 = vmmov (!%p391_p9), 0   ;;  %vm1737_vm5 = vcmask (!%p391_p9), 64512  }
  0x13   : > { %v7075_v54 = vld [vmem:[%s9575_s3] sm:$0xff] (!%p391_p9)   ;;  %v7079_v57 = vld [vmem:[%s9575_s3 + $0x8] sm:$0xff] (!%p391_p9)   ;;  %v7083_v62 = vld [vmem:[%s9575_s3 + $0x10] sm:$0xff] (!%p391_p9)   ;;  %vm1762_vm6 = vcmask (!%p391_p9), 57344   ;;  %vm3207_vm8 = vcmask (!%p391_p9), 1040384   ;;  %vm2447_vm9 = vcmask (!%p391_p9), 531456  }
  0x14   : > { %v7077_v55 = vld [vmem:[%s9575_s3 + $0x80] sm:$0xff] (!%p391_p9)   ;;  %v7080_v58 = vld [vmem:[%s9575_s3 + $0xc8] sm:$0xff] (!%p391_p9)   ;;  %v7085_v63 = vld [vmem:[%s9575_s3 + $0x90] sm:$0xff] (!%p391_p9)   ;;  %vm2472_vm10 = vcmask (!%p391_p9), 524288   ;;  %vm5252_vm11 = vcmask (!%p391_p9), 73728   ;;  %s431_s22 = sand.u32 (!%p391_p9), 1, %s7362_s26  }
  0x15   : > { %v7081_v59 = vld [vmem:[%s9575_s3 + $0x88] sm:$0xff] (!%p391_p9)   ;;  %v7088_v1 = vld [vmem:[%s9575_s3 + $0xd8] sm:$0xff] (!%p391_p9)   ;;  %v7100_v14 = vld [vmem:[%s9575_s3 + $0xf0] sm:$0xff] (!%p391_p9)   ;;  %s432_s24 = scalar_lea.vmem (!%p391_p9), [#allocation2], %s431_s22  ;;  %s5266_s27 = scalar_lea.sflag (!%p391_p9), [#allocation3], %s431_s22 }
  0x16   : > { %494 = vperm.xlu0 (!%p391_p9), %7020, %v484_v3   ;;  %504 = vperm.xlu1 (!%p391_p9), %7021, %v486_v4   ;;  %v7087_v2 = vld [vmem:[%s9575_s3 + $0x18] sm:$0xff] (!%p391_p9)   ;;  %v7090_v4 = vld [vmem:[%s9575_s3 + $0x60] sm:$0xff] (!%p391_p9)   ;;  %v7101_v15 = vld [vmem:[%s9575_s3 + $0xb0] sm:$0xff] (!%p391_p9)   ;;  %s5278_s30 = sshll.u32 (!%p391_p9), %s432_s24, 4  ;;  %s9531_s30 = int_to_ptr.vmem [resolvable:$true] %s5278_s30 }
  0x17   : > { %s434_s20 = scalar_select %p433_p10, %s7469_s29, 1  ;;  %v7089_v3 = vld [vmem:[%s9575_s3 + $0x98] sm:$0xff]   ;;  %vm8221_vm7 = vmpackc.low %vm1737_vm5, %vm1737_vm5 }
  0x18   : > { %s7308_s17 = scalar_lea.vmem %s9531_s30, 16 }
  0x19   : > { %s6975_s23 = smul.u32 280, %s434_s20  ;;  %p7309_p11 = scmp.ne.s32.totalorder %s9531_s30, %s7308_s17 }
  0x1b   : > { %s7514_s14 = scalar_lea.vmem %s9572_s0, %s6975_s23  ;;  %s5706_s23 = sshll.u32 %s7469_s29, 4 }
  0x1c   : > { %v7022_v5 = vld [vmem:[%s7514_s14 + $0x4] ss:$28 sps:$4 sm:$0xff]   ;;  %v7024_v6 = vld [vmem:[%s7514_s14 + $0xc] ss:$28 sps:$4 sm:$0xff]   ;;  %v7028_v9 = vld [vmem:[%s7514_s14 + $0x3c] ss:$28 sps:$4 sm:$0xff]   ;;  %s9529_s25 = scalar_lea.hbm %s9585_s13, %s5706_s23  ;;  %p7310_p12 = pnand %p7309_p11, %p7486_p5 }
  0x1d   : > { %722 = vmatprep.subr.bf16.mxu0 %v7022_v5  ;;  %v7026_v7 = vld [vmem:[%s7514_s14] ss:$28 sps:$4 sm:$0xff]   ;;  %v7027_v8 = vld [vmem:[%s7514_s14 + $0x8] ss:$28 sps:$4 sm:$0xff]   ;;  %775 = vmatprep.subr.bf16.mxu1 %v7024_v6  ;;  %v7032_v11 = vld [vmem:[%s7514_s14 + $0x38] ss:$28 sps:$4 sm:$0xff]  }
  0x1e   : > { %723 = vmatpush1.bf16.msra.mxu0 %v7026_v7  ;;  %776 = vmatpush1.bf16.msra.mxu1 %v7027_v8  ;;  %v7030_v10 = vld [vmem:[%s7514_s14 + $0x44] ss:$28 sps:$4 sm:$0xff]   ;;  %v7034_v13 = vld [vmem:[%s7514_s14 + $0x74] ss:$28 sps:$4 sm:$0xff]   ;;  %v7036_v16 = vld [vmem:[%s7514_s14 + $0x7c] ss:$28 sps:$4 sm:$0xff]   ;;  %p7311_p13 = pneg %p7310_p12 }
  0x1f   : > { %724 = vmatprep.subr.bf16.mxu0 %v7028_v9  ;;  %v7033_v12 = vld [vmem:[%s7514_s14 + $0x40] ss:$28 sps:$4 sm:$0xff]   ;;  %777 = vmatprep.subr.bf16.mxu1 %v7030_v10  ;;  %v7038_v17 = vld [vmem:[%s7514_s14 + $0x70] ss:$28 sps:$4 sm:$0xff]   ;;  %v7039_v18 = vld [vmem:[%s7514_s14 + $0x78] ss:$28 sps:$4 sm:$0xff]  }
  0x20   : > { %v7040_v19 = vld [vmem:[%s7514_s14 + $0xac] ss:$28 sps:$4 sm:$0xff]   ;;  %v7042_v20 = vld [vmem:[%s7514_s14 + $0xb4] ss:$28 sps:$4 sm:$0xff]   ;;  %v7063_v39 = vld [vmem:[%s7514_s14 + $0x84] ss:$28 sps:$4 sm:$0xff]  }
  0x21   : > { %v7044_v21 = vld [vmem:[%s7514_s14 + $0xa8] ss:$28 sps:$4 sm:$0xff]   ;;  %v7045_v22 = vld [vmem:[%s7514_s14 + $0xb0] ss:$28 sps:$4 sm:$0xff]   ;;  %v7056_v33 = vld [vmem:[%s7514_s14 + $0x18] ss:$28 sps:$4 sm:$0xff]  }
  0x22   : > { %725 = vmatpush1.bf16.msra.mxu0 %v7032_v11  ;;  %778 = vmatpush1.bf16.msra.mxu1 %v7033_v12  ;;  %v7046_v24 = vld [vmem:[%s7514_s14 + $0xe4] ss:$28 sps:$4 sm:$0x3f]   ;;  %v7048_v25 = vld [vmem:[%s7514_s14 + $0xec] ss:$28 sps:$4 sm:$0x3f]  }
  0x23   : > { %726 = vmatprep.subr.bf16.mxu0 %v7034_v13  ;;  %779 = vmatprep.subr.bf16.mxu1 %v7036_v16  ;;  %v705_v26 = vand.u32 %v7046_v24, %v7535_v23  ;;  %v7050_v27 = vld [vmem:[%s7514_s14 + $0xe0] ss:$28 sps:$4 sm:$0x3f]   ;;  %v7051_v28 = vld [vmem:[%s7514_s14 + $0xe8] ss:$28 sps:$4 sm:$0x3f]   ;;  %v711_v29 = vand.u32 %v7048_v25, %v7535_v23 }
  0x24   : > { %v702_v30 = vand.u32 %v7050_v27, %v7535_v23  ;;  %v708_v31 = vand.u32 %v7051_v28, %v7535_v23  ;;  %v7055_v32 = vld [vmem:[%s7514_s14 + $0x14] ss:$28 sps:$4 sm:$0xff]   ;;  %v7059_v36 = vld [vmem:[%s7514_s14 + $0x4c] ss:$28 sps:$4 sm:$0xff]   ;;  %v7061_v42 = vld [vmem:[%s7514_s14 + $0x80] ss:$28 sps:$4 sm:$0xff]  }
  0x25   : > { %v7053_v35 = vld [vmem:[%s7514_s14 + $0x10] ss:$28 sps:$4 sm:$0xff]   ;;  %v7057_v38 = vld [vmem:[%s7514_s14 + $0x48] ss:$28 sps:$4 sm:$0xff]   ;;  %v7068_v45 = vld [vmem:[%s7514_s14 + $0xbc] ss:$28 sps:$4 sm:$0xff]  }
  0x26   : > { %727 = vmatpush1.bf16.msra.mxu0 %v7038_v17  ;;  %780 = vmatpush1.bf16.msra.mxu1 %v7039_v18  ;;  %v7060_v37 = vld [vmem:[%s7514_s14 + $0x50] ss:$28 sps:$4 sm:$0xff]   ;;  %v7064_v40 = vld [vmem:[%s7514_s14 + $0x88] ss:$28 sps:$4 sm:$0xff]   ;;  %v7069_v46 = vld [vmem:[%s7514_s14 + $0xc0] ss:$28 sps:$4 sm:$0xff]  }
  0x27   : > { %728 = vmatprep.subr.bf16.mxu0 %v7040_v19  ;;  %781 = vmatprep.subr.bf16.mxu1 %v7042_v20  ;;  %v7072_v43 = vld [vmem:[%s7514_s14 + $0xf4] ss:$28 sps:$4 sm:$0x3f]   ;;  %v7092_v5 = vld [vmem:[%s9575_s3 + $0xe0] sm:$0xff]   ;;  %v7094_v8 = vld [vmem:[%s9575_s3 + $0x68] sm:$0xff]   ;;  %s7377_s29 = smov [#allocation2]  }
  0x28   : > { %v7073_v44 = vld [vmem:[%s7514_s14 + $0xf8] ss:$28 sps:$4 sm:$0x3f]   ;;  %v7070_v47 = vld [vmem:[%s7514_s14 + $0xf0] ss:$28 sps:$4 sm:$0x3f]   ;;  %v717_v49 = vand.u32 %v7072_v43, %v7535_v23 }
  0x29   : > { %v7066_v48 = vld [vmem:[%s7514_s14 + $0xb8] ss:$28 sps:$4 sm:$0xff]   ;;  %v720_v50 = vand.u32 %v7073_v44, %v7535_v23  ;;  %v714_v51 = vand.u32 %v7070_v47, %v7535_v23  ;;  %v7091_v6 = vld [vmem:[%s9575_s3 + $0x20] sm:$0xff]   ;;  %v7096_v9 = vld [vmem:[%s9575_s3 + $0xe8] sm:$0xff]   ;;  %s7312_s19 = sshll.u32 %s7377_s29, 4  ;;  %s7313_s19 = int_to_ptr.vmem [resolvable:$false] %s7312_s19 }
  0x2a   : > { %729 = vmatpush1.bf16.msra.mxu0 %v7044_v21  ;;  %782 = vmatpush1.bf16.msra.mxu1 %v7045_v22  ;;  %v7093_v7 = vld [vmem:[%s9575_s3 + $0xa0] sm:$0xff]   ;;  %v7095_v10 = vld [vmem:[%s9575_s3 + $0x28] sm:$0xff]   ;;  %v7098_v12 = vld [vmem:[%s9575_s3 + $0x70] sm:$0xff]   ;;  %s7314_s20 = scalar_lea.vmem %s7313_s19, 32  ;;  %p7315_p0 = scmp.lt.s32.totalorder %s9531_s30, %s7313_s19 }
  0x2b   : > { %730 = vmatprep.subr.bf16.mxu0 %v705_v26  ;;  %783 = vmatprep.subr.bf16.mxu1 %v711_v29  ;;  %v7097_v11 = vld [vmem:[%s9575_s3 + $0xa8] sm:$0xff]   ;;  %v7099_v13 = vld [vmem:[%s9575_s3 + $0x30] sm:$0xff]   ;;  %v7102_v16 = vld [vmem:[%s9575_s3 + $0x78] sm:$0xff]   ;;  %p7316_p1 = scmp.lt.s32.totalorder %s7314_s20, %s7308_s17 }
  0x2c   : > { %v7103_v17 = vld [vmem:[%s9575_s3 + $0x38] sm:$0xff]   ;;  %v7106_v20 = vld [vmem:[%s9575_s3 + $0x140] sm:$0xff]  }
  0x2d   : > { %v7104_v18 = vld [vmem:[%s9575_s3 + $0xf8] sm:$0xff]   ;;  %v7683_v21 = vld [vmem:[%s9575_s3 + $0x180] sm:$0xff]   ;;  %p7317_p2 = por %p7316_p1, %p7315_p0 }
  0x2e   : > { %731 = vmatpush1.bf16.msra.mxu0 %v702_v30  ;;  %784 = vmatpush1.bf16.msra.mxu1 %v708_v31  ;;  %v7105_v19 = vld [vmem:[%s9575_s3 + $0xb8] sm:$0xff]  }
  0x2f   : > { %828 = vmatprep.subr.bf16.mxu0 %v7055_v32  ;;  %6083 = vmatprep.subr.bf16.mxu1 %v7056_v33  ;;  %p7318_p3 = pnand %p7317_p2, %p7311_p13 }
  0x31   : > { %5375 = vmatmul.mubr.msk.bf16.vlgmr.msra.gmra.mrb[0].mxu0 %vm690_vm2, %v7052_v34  ;;  %5377 = vmatmul.mubr.msk.bf16.vlgmr.msra.gmra.mrb[0].mxu1 %vm690_vm2, %v7052_v34 }
  0x32   : > { %829 = vmatpush1.bf16.msra.mxu0 %v7053_v35  ;;  %6084 = vmatpush3.bf16.msra.mxu1 %v7056_v33 }
  0x33   : > { %830 = vmatprep.subr.bf16.mxu0 %v7059_v36  ;;  %6085 = vmatprep.subr.bf16.mxu1 %v7060_v37 }
  0x34   : > { %764 = vmatprep.mubr.bf16.mxu0 %v7372_v0  ;;  %817 = vmatprep.mubr.bf16.mxu1 %v7372_v0 }
  0x36   : > { %831 = vmatpush1.bf16.msra.mxu0 %v7057_v38  ;;  %6086 = vmatpush3.bf16.msra.mxu1 %v7060_v37 }
  0x37   : > { %832 = vmatprep.subr.bf16.mxu0 %v7063_v39  ;;  %6087 = vmatprep.subr.bf16.mxu1 %v7064_v40 }
  0x39   : > { %5376 = vmatmul.mubr.msk.bf16.gmra.mrb[4].mxu0 %vm690_vm2, %v7065_v41  ;;  %5378 = vmatmul.mubr.msk.bf16.gmra.mrb[4].mxu1 %vm690_vm2, %v7065_v41 }
  0x3a   : > { %833 = vmatpush1.bf16.msra.mxu0 %v7061_v42  ;;  %6088 = vmatpush3.bf16.msra.mxu1 %v7064_v40 }
  0x3b   : > { %834 = vmatprep.subr.bf16.mxu0 %v7068_v45  ;;  %6089 = vmatprep.subr.bf16.mxu1 %v7069_v46 }
  0x3c   : > { %860 = vmatprep.mubr.bf16.mxu0 %v7372_v0  ;;  %6093 = vmatprep.mubr.msk.bf16.mxu1 %vm690_vm2, %v7052_v34 }
  0x3e   : > { %835 = vmatpush1.bf16.msra.mxu0 %v7066_v48  ;;  %6090 = vmatpush3.bf16.msra.mxu1 %v7069_v46 }
  0x3f   : > { %836 = vmatprep.subr.bf16.mxu0 %v717_v49  ;;  %6091 = vmatprep.subr.bf16.mxu1 %v720_v50 }
  0x42   : > { %837 = vmatpush1.bf16.msra.mxu0 %v714_v51  ;;  %6092 = vmatpush3.bf16.msra.mxu1 %v720_v50 }
  0x43   : > { %5716 = vmatprep.subr.bf16.mxu0 %v7074_v52  ;;  %5744 = vmatprep.subr.bf16.mxu1 %v7076_v53 }
  0x45   : > { %5379 = vmatmul.mubr.msk.bf16.vlgmr.msra.gmra.mrb[8].mxu0 %vm690_vm2, %v7052_v34  ;;  %6094 = vmatmul.mubr.msk.bf16.vlgmr.msra.gmra.mrb[8].mxu1 %vm690_vm2, %v7065_v41 }
  0x46   : > { %870 = vmatprep.mubr.bf16.mxu0 %v7372_v0  ;;  %5717 = vmatpush3.bf16.msra.mxu0 %v7075_v54  ;;  %v7086_v0 = vld [vmem:[%s9575_s3 + $0x58] sm:$0xff]   ;;  %v7107_v54 = vld [vmem:[%s9575_s3 + $0x100] sm:$0xff]  }
  0x47   : > { %5745 = vmatpush3.bf16.msra.mxu1 %v7077_v55  ;;  %5718 = vmatprep.subr.bf16.mxu0 %v7078_v56 }
  0x48   : > { %5746 = vmatprep.subr.bf16.mxu1 %v7080_v58 }
  0x4a   : > { %5719 = vmatpush3.bf16.msra.mxu0 %v7079_v57 }
  0x4b   : > { %5747 = vmatpush3.bf16.msra.mxu1 %v7081_v59  ;;  %5720 = vmatprep.subr.bf16.mxu0 %v7082_v60 }
  0x4c   : > { %5748 = vmatprep.subr.bf16.mxu1 %v7084_v61  ;;  %v7108_v61 = vld [vmem:[%s9575_s3 + $0x148] sm:$0xff]  }
  0x4d   : > { %5380 = vmatmul.mubr.msk.bf16.gmra.mrb[12].mxu0 %vm690_vm2, %v7065_v41 }
  0x4e   : > { %5721 = vmatpush3.bf16.msra.mxu0 %v7083_v62  ;;  %v7117_v62 = vld [vmem:[%s9575_s3 + $0x188] sm:$0xff]  }
  0x4f   : > { %5749 = vmatpush3.bf16.msra.mxu1 %v7085_v63  ;;  %5722 = vmatprep.subr.bf16.mxu0 %v7086_v0 }
  0x50   : > { %5750 = vmatprep.subr.bf16.mxu1 %v7088_v1 }
  0x52   : > { %5723 = vmatpush3.bf16.msra.mxu0 %v7087_v2 }
  0x53   : > { %5751 = vmatpush3.bf16.msra.mxu1 %v7089_v3  ;;  %5724 = vmatprep.subr.bf16.mxu0 %v7090_v4 }
  0x54   : > { %5752 = vmatprep.subr.bf16.mxu1 %v7092_v5 }
  0x56   : > { %5725 = vmatpush3.bf16.msra.mxu0 %v7091_v6 }
  0x57   : > { %5753 = vmatpush3.bf16.msra.mxu1 %v7093_v7  ;;  %5726 = vmatprep.subr.bf16.mxu0 %v7094_v8 }
  0x58   : > { %5754 = vmatprep.subr.bf16.mxu1 %v7096_v9 }
  0x5a   : > { %5727 = vmatpush3.bf16.msra.mxu0 %v7095_v10 }
  0x5b   : > { %5755 = vmatpush3.bf16.msra.mxu1 %v7097_v11  ;;  %5728 = vmatprep.subr.bf16.mxu0 %v7098_v12  ;;  %v7109_v12 = vld [vmem:[%s9575_s3 + $0x108] sm:$0xff]  }
  0x5c   : > { %5756 = vmatprep.subr.bf16.mxu1 %v7100_v14 }
  0x5e   : > { %5729 = vmatpush3.bf16.msra.mxu0 %v7099_v13 }
  0x5f   : > { %5757 = vmatpush3.bf16.msra.mxu1 %v7101_v15  ;;  %5730 = vmatprep.subr.bf16.mxu0 %v7102_v16  ;;  %v7110_v15 = vld [vmem:[%s9575_s3 + $0x150] sm:$0xff]  }
  0x60   : > { %5758 = vmatprep.subr.bf16.mxu1 %v7104_v18 }
  0x62   : > { %5731 = vmatpush3.bf16.msra.mxu0 %v7103_v17 }
  0x63   : > { %5759 = vmatpush3.bf16.msra.mxu1 %v7105_v19  ;;  %5772 = vmatprep.subr.bf16.mxu0 %v7106_v20 }
  0x64   : > { %6097 = vmatprep.subr.bf16.mxu1 %v7683_v21 }
  0x91   : > { %v7686_v22 = vpop.permute.xlu0 %489  ;;  %v7690_v24 = vpop.permute.xlu1 %499 }
  0x95   : > { %v7688_v23 = vpop.permute.xlu0 %494  ;;  %v7700_v51 = vpop.permute.xlu1 %504 }
 0x104   : > { %v756_v25 = vpop.f32.mrb[0].mxu0  ;;  %v809_v26 = vpop.f32.mrb[0].mxu1 }
 0x105   : > { %v757_v27 = vadd.f32 %v756_v25, %v7686_v22  ;;  %v810_v28 = vadd.f32 %v809_v26, %v7686_v22  ;;  %v758_v29 = vpop.f32.mrb[1].mxu0  ;;  %v811_v30 = vpop.f32.mrb[1].mxu1 }
 0x106   : > { %v759_v31 = vadd.f32 %v758_v29, %v7686_v22  ;;  %v812_v32 = vadd.f32 %v811_v30, %v7686_v22  ;;  %v760_v33 = vpop.f32.mrb[2].mxu0  ;;  %v813_v34 = vpop.f32.mrb[2].mxu1  ;;  %v7113_v30 = vld [vmem:[%s9575_s3 + $0x118] sm:$0xff]  }
 0x107   : > { %v761_v35 = vadd.f32 %v760_v33, %v7688_v23  ;;  %v814_v36 = vadd.f32 %v813_v34, %v7688_v23  ;;  %v762_v37 = vpop.f32.mrb[3].mxu0  ;;  %v815_v38 = vpop.f32.mrb[3].mxu1  ;;  %v930_v41 = vmax.f32 %v757_v27, 0.0  ;;  %v932_v42 = vmax.f32 %v810_v28, 0.0  ;;  %v7111_v27 = vld [vmem:[%s9575_s3 + $0x110] sm:$0xff]  }
 0x108   : > { %v763_v39 = vadd.f32 %v762_v37, %v7688_v23  ;;  %v816_v40 = vadd.f32 %v815_v38, %v7688_v23  ;;  %v931_v45 = vmax.f32 %v759_v31, 0.0  ;;  %v933_v46 = vmax.f32 %v812_v32, 0.0 }
 0x109   : > { %v937_v43 = vmax.f32 %v761_v35, 0.0  ;;  %v939_v44 = vmax.f32 %v814_v36, 0.0  ;;  %v7115_v35 = vld [vmem:[%s9575_s3 + $0x160] sm:$0xff]  }
 0x10a   : > { %v938_v47 = vmax.f32 %v763_v39, 0.0  ;;  %v940_v48 = vmax.f32 %v816_v40, 0.0 }
 0x10b   : > { %v958_v49 = vpack.c.bf16 %v937_v43, %v930_v41  ;;  %v960_v50 = vpack.c.bf16 %v939_v44, %v932_v42 }
 0x10c   : > { %v959_v52 = vpack.c.bf16 %v938_v47, %v931_v45  ;;  %v961_v53 = vpack.c.bf16 %v940_v48, %v933_v46  ;;  %v819_v55 = vpop.f32.mrb[4].mxu1  ;;  %v766_v56 = vpop.f32.mrb[4].mxu0  ;;  %v7116_v47 = vld [vmem:[%s9575_s3 + $0x120] sm:$0xff]  }
 0x10d   : > { %v820_v57 = vadd.f32 %v819_v55, %v7690_v24  ;;  %v767_v58 = vadd.f32 %v766_v56, %v7690_v24  ;;  %v821_v59 = vpop.f32.mrb[5].mxu1  ;;  %v768_v60 = vpop.f32.mrb[5].mxu0 }
 0x10e   : > { %1418 = vmatprep.mubr.bf16.mxu0 %v959_v52  ;;  %1467 = vmatprep.mubr.bf16.mxu1 %v961_v53  ;;  %v822_v63 = vadd.f32 %v821_v59, %v7690_v24  ;;  %v769_v0 = vadd.f32 %v768_v60, %v7690_v24  ;;  %v823_v1 = vpop.f32.mrb[6].mxu1  ;;  %v770_v2 = vpop.f32.mrb[6].mxu0  ;;  %v7119_v60 = vld [vmem:[%s9575_s3 + $0x128] sm:$0xff]  }
 0x10f   : > { %1419 = vmatmul.mubr.bf16.vlgmr.msra.gmra.mrb[16].mxu0 %v958_v49  ;;  %1468 = vmatmul.mubr.bf16.vlgmr.msra.gmra.mrb[12].mxu1 %v960_v50  ;;  %v946_v3 = vmax.f32 %v820_v57, 0.0  ;;  %v944_v4 = vmax.f32 %v767_v58, 0.0  ;;  %v771_v5 = vadd.f32 %v770_v2, %v7700_v51  ;;  %v825_v6 = vpop.f32.mrb[7].mxu1  ;;  %v772_v7 = vpop.f32.mrb[7].mxu0  ;;  %v824_v8 = vadd.f32 %v823_v1, %v7700_v51  ;;  %v7118_v50 = vld [vmem:[%s9575_s3 + $0x168] sm:$0xff]  }
 0x110   : > { %5773 = vmatpush3.bf16.msra.mxu0 %v7107_v54  ;;  %v947_v9 = vmax.f32 %v822_v63, 0.0  ;;  %v945_v10 = vmax.f32 %v769_v0, 0.0  ;;  %v826_v11 = vadd.f32 %v825_v6, %v7700_v51  ;;  %v773_v13 = vadd.f32 %v772_v7, %v7700_v51  ;;  %6098 = vmatpush3.bf16.msra.mxu1 %v7683_v21  ;;  %v7112_v21 = vld [vmem:[%s9575_s3 + $0x158] sm:$0xff]   ;;  %v7120_v63 = vld [vmem:[%s9575_s3 + $0x170] sm:$0xff]  }
 0x111   : > { %5774 = vmatprep.subr.bf16.mxu0 %v7108_v61  ;;  %v951_v14 = vmax.f32 %v771_v5, 0.0  ;;  %v953_v16 = vmax.f32 %v824_v8, 0.0  ;;  %6099 = vmatprep.subr.bf16.mxu1 %v7117_v62  ;;  %v7121_v5 = vld [vmem:[%s9575_s3 + $0x130] sm:$0xff]  }
 0x112   : > { %v954_v17 = vmax.f32 %v826_v11, 0.0  ;;  %v952_v18 = vmax.f32 %v773_v13, 0.0  ;;  %v7376_v13 = vmov 0.0  }
 0x113   : > { %v965_v19 = vpack.c.bf16 %v951_v14, %v944_v4  ;;  %v967_v20 = vpack.c.bf16 %v953_v16, %v946_v3  ;;  %v5383_v16 = vld [vmem:[%s9576_s4] ss:$0 sm:$0xff] }
 0x114   : > { %v968_v25 = vpack.c.bf16 %v954_v17, %v947_v9  ;;  %5775 = vmatpush3.bf16.msra.mxu0 %v7109_v12  ;;  %v966_v26 = vpack.c.bf16 %v952_v18, %v945_v10  ;;  %6100 = vmatpush3.bf16.msra.mxu1 %v7117_v62  ;;  %v7374_v12 = vmov 0.0|0.0  }
 0x115   : > { %5776 = vmatprep.subr.bf16.mxu0 %v7110_v15  ;;  %6971 = vmatprep.subr.bf16.mxu1 %v7374_v12 }
 0x116   : > { %1475 = vmatprep.mubr.bf16.mxu1 %v968_v25  ;;  %1426 = vmatprep.mubr.bf16.mxu0 %v966_v26 }
 0x117   : > { %1476 = vmatmul.mubr.bf16.gmra.mrb[16].mxu1 %v967_v20  ;;  %1427 = vmatmul.mubr.bf16.gmra.mrb[20].mxu0 %v965_v19 }
 0x118   : > { %5777 = vmatpush3.bf16.msra.mxu0 %v7111_v27  ;;  %v862_v28 = vpop.f32.mrb[8].mxu0  ;;  %v6095_v29 = vpop.f32.mrb[8].mxu1 }
 0x119   : > { %v863_v31 = vadd.f32 %v862_v28, %v7686_v22  ;;  %v924_v32 = vadd.f32 %v6095_v29, %v7690_v24  ;;  %v864_v33 = vpop.f32.mrb[9].mxu0  ;;  %v915_v34 = vpop.f32.mrb[9].mxu1  ;;  %5778 = vmatprep.subr.bf16.mxu0 %v7112_v21 }
 0x11a   : > { %v865_v36 = vadd.f32 %v864_v33, %v7686_v22  ;;  %v916_v37 = vadd.f32 %v915_v34, %v7686_v22  ;;  %v866_v38 = vpop.f32.mrb[10].mxu0  ;;  %v6096_v39 = vpop.f32.mrb[10].mxu1 }
 0x11b   : > { %v950_v40 = vmax.f32 %v924_v32, 0.0  ;;  %v867_v41 = vadd.f32 %v866_v38, %v7688_v23  ;;  %v927_v42 = vadd.f32 %v6096_v39, %v7700_v51  ;;  %v868_v43 = vpop.f32.mrb[11].mxu0  ;;  %v918_v44 = vpop.f32.mrb[11].mxu1  ;;  %v934_v48 = vmax.f32 %v863_v31, 0.0 }
 0x11c   : > { %v869_v45 = vadd.f32 %v868_v43, %v7688_v23  ;;  %v919_v46 = vadd.f32 %v918_v44, %v7688_v23  ;;  %5779 = vmatpush3.bf16.msra.mxu0 %v7113_v30  ;;  %v935_v52 = vmax.f32 %v865_v36, 0.0  ;;  %v936_v53 = vmax.f32 %v916_v37, 0.0 }
 0x11d   : > { %v941_v22 = vmax.f32 %v867_v41, 0.0  ;;  %v957_v49 = vmax.f32 %v927_v42, 0.0  ;;  %5780 = vmatprep.subr.bf16.mxu0 %v7115_v35 }
 0x11e   : > { %v942_v54 = vmax.f32 %v869_v45, 0.0  ;;  %v943_v55 = vmax.f32 %v919_v46, 0.0 }
 0x11f   : > { %v962_v56 = vpack.c.bf16 %v941_v22, %v934_v48  ;;  %v971_v57 = vpack.c.bf16 %v957_v49, %v950_v40 }
 0x120   : > { %v963_v23 = vpack.c.bf16 %v942_v54, %v935_v52  ;;  %v964_v58 = vpack.c.bf16 %v943_v55, %v936_v53  ;;  %5781 = vmatpush3.bf16.msra.mxu0 %v7116_v47  ;;  %v872_v59 = vpop.f32.mrb[12].mxu0 }
 0x121   : > { %v873_v61 = vadd.f32 %v872_v59, %v7690_v24  ;;  %v874_v62 = vpop.f32.mrb[13].mxu0  ;;  %5782 = vmatprep.subr.bf16.mxu0 %v7118_v50 }
 0x122   : > { %v875_v0 = vadd.f32 %v874_v62, %v7690_v24  ;;  %v876_v1 = vpop.f32.mrb[14].mxu0  ;;  %1516 = vmatprep.mubr.bf16.mxu0 %v963_v23  ;;  %6101 = vmatprep.mubr.msk.bf16.mxu1 %vm1379_vm3, %v964_v58  ;;  %v7122_v24 = vld [vmem:[%s9575_s3 + $0x178] sm:$0xff]  }
 0x123   : > { %v877_v2 = vadd.f32 %v876_v1, %v7700_v51  ;;  %v878_v3 = vpop.f32.mrb[15].mxu0  ;;  %6102 = vmatmul.mubr.msk.bf16.vlgmr.msra.gmra.mrb[20].mxu1 %vm1379_vm3, %v971_v57  ;;  %v948_v6 = vmax.f32 %v873_v61, 0.0 }
 0x124   : > { %v879_v4 = vadd.f32 %v878_v3, %v7700_v51  ;;  %5783 = vmatpush3.bf16.msra.mxu0 %v7119_v60  ;;  %v949_v8 = vmax.f32 %v875_v0, 0.0  ;;  %v7123_v51 = vld [vmem:[%s9575_s3 + $0x138] sm:$0xff]   ;;  %6116 = vmatprep.mubr.msk.f32.mxu1 %vm7375_vm4, %v7376_v13 }
 0x125   : > { %v955_v7 = vmax.f32 %v877_v2, 0.0  ;;  %5784 = vmatprep.subr.bf16.mxu0 %v7120_v63 }
 0x126   : > { %v956_v9 = vmax.f32 %v879_v4, 0.0 }
 0x127   : > { %v969_v10 = vpack.c.bf16 %v955_v7, %v948_v6 }
 0x128   : > { %v970_v11 = vpack.c.bf16 %v956_v9, %v949_v8  ;;  %5785 = vmatpush3.bf16.msra.mxu0 %v7121_v5 }
 0x129   : > { %5786 = vmatprep.subr.bf16.mxu0 %v7122_v24 }
 0x12c   : > { %5787 = vmatpush3.bf16.msra.mxu0 %v7123_v51  ;;  %v1584_v51 = vld [vmem:[%s9577_s5 + $0x10] sm:$0xff] }
 0x12d   : > { %6853 = vmatprep.subr.bf16.mxu0 %v7374_v12 }
 0x12f   : > { %1517 = vmatmul.mubr.bf16.vlgmr.msra.gmra.mrb[24].mxu0 %v962_v56 }
 0x130   : > { %1524 = vmatprep.mubr.bf16.mxu0 %v970_v11  ;;  %v1583_v11 = vld [vmem:[%s9577_s5 + $0x8] sm:$0xff] }
 0x137   : > { %1525 = vmatmul.mubr.bf16.gmra.mrb[28].mxu0 %v969_v10  ;;  %v1582_v10 = vld [vmem:[%s9577_s5] sm:$0xff] }
 0x138   : > { %6113 = vmatprep.mubr.msk.f32.mxu0 %vm7375_vm4, %v7376_v13 }
 0x1e2   : > { %v5732_v14 = vpop.f32.mrb[16].mxu0  ;;  %v5760_v15 = vpop.f32.mrb[12].mxu1 }
 0x1e3   : > { %v5733_v17 = vpop.f32.mrb[17].mxu0  ;;  %v5761_v18 = vpop.f32.mrb[13].mxu1 }
 0x1e4   : > { %v5734_v19 = vadd.f32 %v5733_v17, %v5732_v14  ;;  %v5762_v20 = vadd.f32 %v5761_v18, %v5760_v15  ;;  %v5735_v25 = vpop.f32.mrb[18].mxu0  ;;  %v5763_v26 = vpop.f32.mrb[14].mxu1  ;;  %v1585_v14 = vld [vmem:[%s9577_s5 + $0x18] sm:$0xff]  ;;  %v1586_v15 = vld [vmem:[%s9577_s5 + $0x20] sm:$0xff]  ;;  %v1588_v17 = vld [vmem:[%s9577_s5 + $0x30] sm:$0xff] }
 0x1e5   : > { %v5736_v27 = vpop.f32.mrb[19].mxu0  ;;  %v5764_v21 = vpop.f32.mrb[15].mxu1  ;;  %v1589_v18 = vld [vmem:[%s9577_s5 + $0x38] sm:$0xff] }
 0x1e6   : > { %v1421_v28 = vadd.f32 %v5734_v19, %v5383_v16  ;;  %v5737_v29 = vadd.f32 %v5736_v27, %v5735_v25  ;;  %v5765_v30 = vadd.f32 %v5764_v21, %v5763_v26  ;;  %v1590_v19 = vld [vmem:[%s9577_s5 + $0x40] sm:$0x1]  ;;  %v1592_v25 = vld [vmem:[%s9578_s6 + $0x8] sm:$0xff] }
 0x1e8   : > { %v1470_v31 = vadd.f32 %v5762_v20, %v1421_v28  ;;  %v1424_v32 = vadd.f32 %v5737_v29, %v5383_v16  ;;  %v1591_v20 = vld [vmem:[%s9578_s6] sm:$0xff] }
 0x1ea   : > { %v1473_v33 = vadd.f32 %v5765_v30, %v1424_v32  ;;  %v5738_v34 = vpop.f32.mrb[20].mxu0  ;;  %v5766_v35 = vpop.f32.mrb[16].mxu1 }
 0x1eb   : > { %v5739_v36 = vpop.f32.mrb[21].mxu0  ;;  %v5767_v37 = vpop.f32.mrb[17].mxu1 }
 0x1ec   : > { %v5740_v38 = vadd.f32 %v5739_v36, %v5738_v34  ;;  %v5741_v39 = vpop.f32.mrb[22].mxu0  ;;  %v5768_v40 = vadd.f32 %v5767_v37, %v5766_v35  ;;  %v5769_v41 = vpop.f32.mrb[18].mxu1  ;;  %v1594_v37 = vld [vmem:[%s9578_s6 + $0x18] sm:$0xff] }
 0x1ed   : > { %v5742_v42 = vpop.f32.mrb[23].mxu0  ;;  %v5770_v43 = vpop.f32.mrb[19].mxu1 }
 0x1ee   : > { %v1429_v44 = vadd.f32 %v5740_v38, %v5383_v16  ;;  %v5743_v45 = vadd.f32 %v5742_v42, %v5741_v39  ;;  %v5771_v46 = vadd.f32 %v5770_v43, %v5769_v41  ;;  %v1595_v42 = vld [vmem:[%s9578_s6 + $0x20] sm:$0xff] }
 0x1f0   : > { %v1432_v47 = vadd.f32 %v5743_v45, %v5383_v16  ;;  %v1478_v48 = vadd.f32 %v5768_v40, %v1429_v44  ;;  %v1587_v16 = vld [vmem:[%s9577_s5 + $0x28] sm:$0xff] }
 0x1f2   : > { %v1481_v22 = vadd.f32 %v5771_v46, %v1432_v47  ;;  %v1596_v47 = vld [vmem:[%s9578_s6 + $0x28] sm:$0xff] }
 0x1f6   : > { %v6103_v49 = vpop.f32.mrb[20].mxu1 }
 0x1f7   : > { %v1567_v50 = vpop.f32.mrb[21].mxu1 }
 0x1f8   : > { %v6104_v52 = vpop.f32.mrb[22].mxu1 }
 0x1f9   : > { %v1570_v53 = vpop.f32.mrb[23].mxu1 }
 0x202   : > { %v5788_v54 = vpop.f32.mrb[24].mxu0 }
 0x203   : > { %v5789_v55 = vpop.f32.mrb[25].mxu0 }
 0x204   : > { %v5790_v56 = vadd.f32 %v5789_v55, %v5788_v54  ;;  %v5791_v57 = vpop.f32.mrb[26].mxu0 }
 0x205   : > { %v5792_v23 = vpop.f32.mrb[27].mxu0 }
 0x206   : > { %v1519_v58 = vadd.f32 %v5790_v56, %v1470_v31  ;;  %v5793_v59 = vadd.f32 %v5792_v23, %v5791_v57  ;;  %v1593_v31 = vld [vmem:[%s9578_s6 + $0x10] sm:$0xff]  ;;  %v1598_v57 = vld [vmem:[%s9578_s6 + $0x38] sm:$0xff] }
 0x208   : > { %v1568_v60 = vadd.f32 %v1567_v50, %v1519_v58  ;;  %v1522_v61 = vadd.f32 %v5793_v59, %v1473_v33 }
 0x20a   : > { %v1571_v62 = vadd.f32 %v1570_v53, %v1522_v61  ;;  %v5794_v63 = vpop.f32.mrb[28].mxu0  ;;  %v1599_v61 = vld [vmem:[%s9578_s6 + $0x40] sm:$0x1] }
 0x20b   : > { %v5795_v0 = vpop.f32.mrb[29].mxu0 }
 0x20c   : > { %v6854_v1 = vpack.c.bf16 %v1571_v62, %v1568_v60  ;;  %v5796_v2 = vadd.f32 %v5795_v0, %v5794_v63  ;;  %v5797_v3 = vpop.f32.mrb[30].mxu0 }
 0x20d   : > { %v5798_v4 = vpop.f32.mrb[31].mxu0 }
 0x20e   : > { %v1527_v5 = vadd.f32 %v5796_v2, %v1478_v48  ;;  %v5799_v6 = vadd.f32 %v5798_v4, %v5797_v3  ;;  %6855 = vmatpush3.bf16.msra.mxu0 %v6854_v1  ;;  %6973 = vmatpush3.bf16.msra.mxu1 %v6854_v1  ;;  %v5457_v3 = vld [vmem:[%s9581_s9 + $0x10] sm:$0xff] }
 0x20f   : > { %6856 = vmatprep.subr.bf16.mxu0 %v7374_v12  ;;  %6972 = vmatprep.subr.bf16.mxu1 %v7374_v12 }
 0x210   : > { %v1576_v7 = vadd.f32 %v6103_v49, %v1527_v5  ;;  %v1530_v24 = vadd.f32 %v5799_v6, %v1481_v22 }
 0x212   : > { %v1579_v8 = vadd.f32 %v6104_v52, %v1530_v24  ;;  %v1597_v52 = vld [vmem:[%s9578_s6 + $0x30] sm:$0xff] }
 0x214   : > { %v6857_v9 = vpack.c.bf16 %v1579_v8, %v1576_v7 }
 0x216   : > { %6858 = vmatpush3.bf16.msra.mxu0 %v6857_v9  ;;  %6974 = vmatpush3.bf16.msra.mxu1 %v6857_v9 }
 0x217   : > { %6169 = vmatprep.subr.mxu1 %v7376_v13  ;;  %6140 = vmatprep.subr.mxu0 %v7376_v13 }
 0x219   : > { %6114 = vmatmul.mubr.msk.f32.vlgmr.msra.gmra.mrb[32].mxu0 %vm1379_vm3, %v1582_v10  ;;  %6117 = vmatmul.mubr.msk.f32.vlgmr.msra.gmra.mrb[24].mxu1 %vm1379_vm3, %v1583_v11 }
 0x21a   : > { %6119 = vmatprep.mubr.msk.f32.mxu1 %vm7375_vm4, %v7376_v13  ;;  %6142 = vmatprep.mubr.msk.f32.mxu0 %vm7375_vm4, %v7376_v13 }
 0x21b   : > { %6170 = vmatpush3.msra.mxu1 %v5457_v3 }
 0x21c   : > { %6859 = vmatprep.subr.bf16.mxu1 %v7374_v12 }
 0x21d   : > { %6120 = vmatmul.mubr.msk.f32.gmra.mrb[26].mxu1 %vm1379_vm3, %v1584_v51 }
 0x21e   : > { %6122 = vmatprep.mubr.msk.f32.mxu1 %vm7375_vm4, %v7376_v13 }
 0x221   : > { %6123 = vmatmul.mubr.msk.f32.gmra.mrb[28].mxu1 %vm1379_vm3, %v1585_v14 }
 0x222   : > { %6125 = vmatprep.mubr.msk.f32.mxu1 %vm7375_vm4, %v7376_v13 }
 0x225   : > { %6126 = vmatmul.mubr.msk.f32.gmra.mrb[30].mxu1 %vm1379_vm3, %v1586_v15 }
 0x226   : > { %6128 = vmatprep.mubr.msk.f32.mxu1 %vm7375_vm4, %v7376_v13 }
 0x229   : > { %6129 = vmatmul.mubr.msk.f32.gmra.mrb[32].mxu1 %vm1379_vm3, %v1587_v16 }
 0x22a   : > { %6131 = vmatprep.mubr.msk.f32.mxu1 %vm7375_vm4, %v7376_v13 }
 0x22d   : > { %6132 = vmatmul.mubr.msk.f32.gmra.mrb[34].mxu1 %vm1379_vm3, %v1588_v17 }
 0x22e   : > { %6134 = vmatprep.mubr.msk.f32.mxu1 %vm7375_vm4, %v7376_v13 }
 0x231   : > { %6135 = vmatmul.mubr.msk.f32.gmra.mrb[36].mxu1 %vm1379_vm3, %v1589_v18 }
 0x232   : > { %6137 = vmatprep.mubr.msk.f32.mxu1 %vm7375_vm4, %v7376_v13 }
 0x235   : > { %6138 = vmatmul.mubr.msk.f32.gmra.mrb[38].mxu1 %vm1379_vm3, %v1590_v19 }
 0x236   : > { %6171 = vmatprep.mubr.msk.f32.mxu1 %vm7375_vm4, %v7376_v13 }
 0x2ec   : > { %v1693_v26 = vpop.f32.mrb[32].mxu0  ;;  %v1698_v27 = vpop.f32.mrb[24].mxu1 }
 0x2ed   : > { %v7846_v21 = vadd.f32 %v1693_v26, %v1591_v20  ;;  %v7848_v28 = vadd.f32 %v1698_v27, %v1592_v25  ;;  %v6115_v29 = vpop.f32.mrb[33].mxu0  ;;  %v6118_v30 = vpop.f32.mrb[25].mxu1 }
 0x2ef   : > { %v1741_v32 = vsel %vm1737_vm5, %v7848_v28, 0.0  ;;  %v1738_v33 = vsel %vm1737_vm5, %v7846_v21, 0.0 }
 0x2f0   : > { %1742 = vadd.xlane.f32.xlu1 %v1741_v32  ;;  %v1703_v34 = vpop.f32.mrb[26].mxu1  ;;  %1739 = vadd.xlane.f32.xlu0 %v1738_v33 }
 0x2f1   : > { %v7857_v35 = vadd.f32 %v1703_v34, %v1593_v31  ;;  %v6121_v36 = vpop.f32.mrb[27].mxu1 }
 0x2f3   : > { %v1744_v38 = vsel %vm1737_vm5, %v7857_v35, 0.0 }
 0x2f4   : > { %v1708_v39 = vpop.f32.mrb[28].mxu1  ;;  %1745 = vadd.xlane.f32.xlu0 %v1744_v38 }
 0x2f5   : > { %v7864_v40 = vadd.f32 %v1708_v39, %v1594_v37  ;;  %v6124_v41 = vpop.f32.mrb[29].mxu1 }
 0x2f7   : > { %v1747_v43 = vsel %vm1737_vm5, %v7864_v40, 0.0 }
 0x2f8   : > { %v1713_v44 = vpop.f32.mrb[30].mxu1  ;;  %1748 = vadd.xlane.f32.xlu0 %v1747_v43 }
 0x2f9   : > { %v7871_v45 = vadd.f32 %v1713_v44, %v1595_v42  ;;  %v6127_v46 = vpop.f32.mrb[31].mxu1 }
 0x2fb   : > { %v1750_v48 = vsel %vm1737_vm5, %v7871_v45, 0.0 }
 0x2fc   : > { %1751 = vadd.xlane.f32.xlu1 %v1750_v48  ;;  %v1718_v22 = vpop.f32.mrb[32].mxu1 }
 0x2fd   : > { %v7878_v49 = vadd.f32 %v1718_v22, %v1596_v47  ;;  %v6130_v50 = vpop.f32.mrb[33].mxu1 }
 0x2ff   : > { %v1753_v53 = vsel %vm1737_vm5, %v7878_v49, 0.0 }
 0x300   : > { %v1723_v54 = vpop.f32.mrb[34].mxu1  ;;  %1754 = vadd.xlane.f32.xlu0 %v1753_v53 }
 0x301   : > { %v7885_v55 = vadd.f32 %v1723_v54, %v1597_v52  ;;  %v6133_v56 = vpop.f32.mrb[35].mxu1 }
 0x303   : > { %v1756_v23 = vsel %vm1737_vm5, %v7885_v55, 0.0 }
 0x304   : > { %1757 = vadd.xlane.f32.xlu1 %v1756_v23  ;;  %v1728_v58 = vpop.f32.mrb[36].mxu1 }
 0x305   : > { %v7892_v59 = vadd.f32 %v1728_v58, %v1598_v57  ;;  %v6136_v60 = vpop.f32.mrb[37].mxu1  ;;  %v1889_v58 = vld [vmem:[%s9581_s9] sm:$0xff] }
 0x306   : > { %6141 = vmatpush3.msra.mxu0 %v1889_v58 }
 0x307   : > { %v1759_v62 = vsel %vm1737_vm5, %v7892_v59, 0.0  ;;  %6198 = vmatprep.subr.mxu0 %v7376_v13 }
 0x308   : > { %v1733_v63 = vpop.f32.mrb[38].mxu1  ;;  %1760 = vadd.xlane.f32.xlu0 %v1759_v62 }
 0x309   : > { %v7899_v0 = vadd.f32 %v1733_v63, %v1599_v61  ;;  %v6139_v1 = vpop.f32.mrb[39].mxu1 }
 0x30b   : > { %v1763_v2 = vsel %vm1762_vm6, %v7899_v0, 0.0 }
 0x30c   : > { %1764 = vadd.xlane.f32.xlu1 %v1763_v2 }
 0x37d   : > { %v1743_v4 = vpop.xlane.xlu1 %1742  ;;  %v1740_v5 = vpop.xlane.xlu0 %1739 }
 0x37e   : > { %v1768_v6 = vmul.f32 0.125, %v1743_v4  ;;  %v1767_v7 = vmul.f32 0.125, %v1740_v5 }
 0x380   : > { %v7908_v24 = vsub.f32 %v7848_v28, %v1768_v6  ;;  %v7911_v8 = vsub.f32 %v7846_v21, %v1767_v7 }
 0x381   : > { %v1746_v9 = vpop.xlane.xlu0 %1745 }
 0x382   : > { %v1769_v10 = vmul.f32 0.125, %v1746_v9  ;;  %v1786_v11 = vmul.f32 %v7908_v24, %v7908_v24  ;;  %v1785_v51 = vmul.f32 %v7911_v8, %v7911_v8 }
 0x384   : > { %v7918_v14 = vsub.f32 %v7857_v35, %v1769_v10  ;;  %v1797_v15 = vsel %vm1737_vm5, %v1786_v11, 0.0  ;;  %v1794_v16 = vsel %vm1737_vm5, %v1785_v51, 0.0 }
 0x385   : > { %1798 = vadd.xlane.f32.xlu1 %v1797_v15  ;;  %1795 = vadd.xlane.f32.xlu0 %v1794_v16  ;;  %v1749_v17 = vpop.xlane.xlu0 %1748 }
 0x386   : > { %v1770_v18 = vmul.f32 0.125, %v1749_v17  ;;  %v1787_v19 = vmul.f32 %v7918_v14, %v7918_v14  ;;  %v7968_v17 = vld [vmem:[%s9579_s7] ss:$0 sm:$0xff] }
 0x388   : > { %v7925_v20 = vsub.f32 %v7864_v40, %v1770_v18  ;;  %v1800_v25 = vsel %vm1737_vm5, %v1787_v19, 0.0 }
 0x389   : > { %v1752_v26 = vpop.xlane.xlu1 %1751  ;;  %1801 = vadd.xlane.f32.xlu0 %v1800_v25 }
 0x38a   : > { %v1771_v27 = vmul.f32 0.125, %v1752_v26  ;;  %v1788_v29 = vmul.f32 %v7925_v20, %v7925_v20 }
 0x38c   : > { %v7931_v30 = vsub.f32 %v7871_v45, %v1771_v27  ;;  %v1803_v31 = vsel %vm1737_vm5, %v1788_v29, 0.0  ;;  %v7975_v27 = vld [vmem:[%s9580_s8] ss:$0 sm:$0xff] }
 0x38d   : > { %1804 = vadd.xlane.f32.xlu1 %v1803_v31  ;;  %v1755_v32 = vpop.xlane.xlu0 %1754 }
 0x38e   : > { %v1772_v33 = vmul.f32 0.125, %v1755_v32  ;;  %v1789_v34 = vmul.f32 %v7931_v30, %v7931_v30 }
 0x390   : > { %v7937_v36 = vsub.f32 %v7878_v49, %v1772_v33  ;;  %v1806_v37 = vsel %vm1737_vm5, %v1789_v34, 0.0 }
 0x391   : > { %v1758_v38 = vpop.xlane.xlu1 %1757  ;;  %1807 = vadd.xlane.f32.xlu0 %v1806_v37 }
 0x392   : > { %v1773_v39 = vmul.f32 0.125, %v1758_v38  ;;  %v1790_v41 = vmul.f32 %v7937_v36, %v7937_v36  ;;  %v5469_v38 = vld [vmem:[%s9581_s9 + $0x20] sm:$0xff] }
 0x394   : > { %v7943_v42 = vsub.f32 %v7885_v55, %v1773_v39  ;;  %v1809_v43 = vsel %vm1737_vm5, %v1790_v41, 0.0 }
 0x395   : > { %1810 = vadd.xlane.f32.xlu1 %v1809_v43  ;;  %v1761_v44 = vpop.xlane.xlu0 %1760 }
 0x396   : > { %v1774_v46 = vmul.f32 0.125, %v1761_v44  ;;  %v1791_v47 = vmul.f32 %v7943_v42, %v7943_v42 }
 0x398   : > { %v7949_v48 = vsub.f32 %v7892_v59, %v1774_v46  ;;  %v1812_v22 = vsel %vm1737_vm5, %v1791_v47, 0.0 }
 0x399   : > { %v1765_v50 = vpop.xlane.xlu1 %1764  ;;  %1813 = vadd.xlane.f32.xlu0 %v1812_v22 }
 0x39a   : > { %v1775_v52 = vmul.f32 0.125, %v1765_v50  ;;  %v1792_v53 = vmul.f32 %v7949_v48, %v7949_v48 }
 0x39c   : > { %v7955_v54 = vsub.f32 %v7899_v0, %v1775_v52  ;;  %v1815_v56 = vsel %vm1737_vm5, %v1792_v53, 0.0 }
 0x39d   : > { %1816 = vadd.xlane.f32.xlu1 %v1815_v56 }
 0x39e   : > { %v1793_v57 = vmul.f32 %v7955_v54, %v7955_v54 }
 0x3a0   : > { %v1818_v23 = vsel %vm1762_vm6, %v1793_v57, 0.0 }
 0x3a1   : > { %1819 = vadd.xlane.f32.xlu0 %v1818_v23 }
 0x412   : > { %v1799_v60 = vpop.xlane.xlu1 %1798  ;;  %v1796_v61 = vpop.xlane.xlu0 %1795 }
 0x413   : > { %v1822_v62 = vmul.f32 0.125, %v1799_v60  ;;  %v1821_v63 = vmul.f32 0.125, %v1796_v61 }
 0x415   : > { %v1831_v1 = vadd.f32 1e-05, %v1822_v62  ;;  %v1830_v2 = vadd.f32 1e-05, %v1821_v63 }
 0x416   : > { %v1802_v3 = vpop.xlane.xlu0 %1801 }
 0x417   : > { %7124 = vrsqrt.f32 %v1831_v1  ;;  %v1823_v4 = vmul.f32 0.125, %v1802_v3 }
 0x418   : > { %7126 = vrsqrt.f32 %v1830_v2 }
 0x419   : > { %v1832_v5 = vadd.f32 1e-05, %v1823_v4 }
 0x41a   : > { %v1805_v6 = vpop.xlane.xlu1 %1804 }
 0x41b   : > { %7128 = vrsqrt.f32 %v1832_v5  ;;  %v1824_v7 = vmul.f32 0.125, %v1805_v6 }
 0x41d   : > { %v1833_v9 = vadd.f32 1e-05, %v1824_v7 }
 0x41e   : > { %v1808_v10 = vpop.xlane.xlu0 %1807 }
 0x41f   : > { %7130 = vrsqrt.f32 %v1833_v9  ;;  %v1825_v11 = vmul.f32 0.125, %v1808_v10 }
 0x421   : > { %v7125_v51 = vpop.eup %7124  ;;  %v1834_v15 = vadd.f32 1e-05, %v1825_v11  ;;  %v5499_v11 = vld [vmem:[%s9581_s9 + $0x8] sm:$0xff] }
 0x422   : > { %v7127_v16 = vpop.eup %7126  ;;  %v1811_v18 = vpop.xlane.xlu1 %1810  ;;  %v1849_v19 = vmul.f32 %v7125_v51, %v7908_v24  ;;  %v5523_v51 = vld [vmem:[%s9581_s9 + $0x28] sm:$0xff] }
 0x423   : > { %v1848_v25 = vmul.f32 %v7127_v16, %v7911_v8  ;;  %7132 = vrsqrt.f32 %v1834_v15  ;;  %v1826_v26 = vmul.f32 0.125, %v1811_v18 }
 0x424   : > { %v1865_v37 = vmul.f32 %v7968_v17, %v1849_v19  ;;  %v5459_v19 = vld [vmem:[%s9582_s10 + $0x2] ss:$0 sm:$0xff] }
 0x425   : > { %v7129_v29 = vpop.eup %7128  ;;  %v1864_v31 = vmul.f32 %v7968_v17, %v1848_v25  ;;  %v1835_v32 = vadd.f32 1e-05, %v1826_v26 }
 0x426   : > { %v1850_v33 = vmul.f32 %v7129_v29, %v7918_v14  ;;  %v1814_v34 = vpop.xlane.xlu0 %1813  ;;  %v7997_v47 = vadd.f32 %v7975_v27, %v1865_v37 }
 0x427   : > { %7134 = vrsqrt.f32 %v1835_v32  ;;  %v1827_v24 = vmul.f32 0.125, %v1814_v34  ;;  %v7981_v8 = vadd.f32 %v7975_v27, %v1864_v31 }
 0x428   : > { %v1866_v14 = vmul.f32 %v7968_v17, %v1850_v33 }
 0x429   : > { %v7131_v39 = vpop.eup %7130  ;;  %v1836_v41 = vadd.f32 1e-05, %v1827_v24  ;;  %6143 = vmatmul.mubr.msk.f32.vlgmr.msra.gmra.mrb[34].mxu0 %vm1737_vm5, %v7981_v8  ;;  %6172 = vmatmul.mubr.msk.f32.vlgmr.msra.gmra.mrb[40].mxu1 %vm1737_vm5, %v7981_v8 }
 0x42a   : > { %v1817_v43 = vpop.xlane.xlu1 %1816  ;;  %6145 = vmatprep.mubr.msk.f32.mxu0 %vm7375_vm4, %v7376_v13  ;;  %6174 = vmatprep.mubr.msk.f32.mxu1 %vm7375_vm4, %v7376_v13  ;;  %v1851_v44 = vmul.f32 %v7131_v39, %v7925_v20  ;;  %v8009_v20 = vadd.f32 %v7975_v27, %v1866_v14 }
 0x42b   : > { %7136 = vrsqrt.f32 %v1836_v41  ;;  %v1828_v46 = vmul.f32 0.125, %v1817_v43  ;;  %6199 = vmatpush3.msra.mxu0 %v5469_v38 }
 0x42c   : > { %6272 = vmatprep.subr.mxu0 %v7376_v13  ;;  %v1867_v53 = vmul.f32 %v7968_v17, %v1851_v44 }
 0x42d   : > { %v7133_v22 = vpop.eup %7132  ;;  %v1837_v50 = vadd.f32 1e-05, %v1828_v46  ;;  %6146 = vmatmul.mubr.msk.f32.gmra.mrb[36].mxu0 %vm1737_vm5, %v7997_v47  ;;  %6175 = vmatmul.mubr.msk.f32.gmra.mrb[42].mxu1 %vm1737_vm5, %v7997_v47 }
 0x42e   : > { %v1820_v52 = vpop.xlane.xlu0 %1819  ;;  %6148 = vmatprep.mubr.msk.f32.mxu0 %vm7375_vm4, %v7376_v13  ;;  %6177 = vmatprep.mubr.msk.f32.mxu1 %vm7375_vm4, %v7376_v13  ;;  %v1852_v56 = vmul.f32 %v7133_v22, %v7931_v30  ;;  %v8022_v60 = vadd.f32 %v7975_v27, %v1867_v53 }
 0x42f   : > { %7138 = vrsqrt.f32 %v1837_v50  ;;  %v1829_v57 = vmul.f32 0.125, %v1820_v52 }
 0x430   : > { %v1868_v30 = vmul.f32 %v7968_v17, %v1852_v56 }
 0x431   : > { %v7135_v23 = vpop.eup %7134  ;;  %v1838_v58 = vadd.f32 1e-05, %v1829_v57  ;;  %6149 = vmatmul.mubr.msk.f32.gmra.mrb[38].mxu0 %vm1737_vm5, %v8009_v20  ;;  %6178 = vmatmul.mubr.msk.f32.gmra.mrb[44].mxu1 %vm1737_vm5, %v8009_v20 }
 0x432   : > { %6151 = vmatprep.mubr.msk.f32.mxu0 %vm7375_vm4, %v7376_v13  ;;  %6180 = vmatprep.mubr.msk.f32.mxu1 %vm7375_vm4, %v7376_v13  ;;  %v1853_v61 = vmul.f32 %v7135_v23, %v7937_v36  ;;  %v8035_v63 = vadd.f32 %v7975_v27, %v1868_v30 }
 0x433   : > { %7140 = vrsqrt.f32 %v1838_v58 }
 0x434   : > { %v1869_v1 = vmul.f32 %v7968_v17, %v1853_v61 }
 0x435   : > { %v7137_v62 = vpop.eup %7136  ;;  %6152 = vmatmul.mubr.msk.f32.gmra.mrb[40].mxu0 %vm1737_vm5, %v8022_v60  ;;  %6181 = vmatmul.mubr.msk.f32.gmra.mrb[46].mxu1 %vm1737_vm5, %v8022_v60 }
 0x436   : > { %6154 = vmatprep.mubr.msk.f32.mxu0 %vm7375_vm4, %v7376_v13  ;;  %6183 = vmatprep.mubr.msk.f32.mxu1 %vm7375_vm4, %v7376_v13  ;;  %v1854_v36 = vmul.f32 %v7137_v62, %v7943_v42  ;;  %v8048_v3 = vadd.f32 %v7975_v27, %v1869_v1 }
 0x438   : > { %v1870_v4 = vmul.f32 %v7968_v17, %v1854_v36 }
 0x439   : > { %v7139_v2 = vpop.eup %7138  ;;  %6155 = vmatmul.mubr.msk.f32.gmra.mrb[42].mxu0 %vm1737_vm5, %v8035_v63  ;;  %6184 = vmatmul.mubr.msk.f32.gmra.mrb[48].mxu1 %vm1737_vm5, %v8035_v63 }
 0x43a   : > { %6157 = vmatprep.mubr.msk.f32.mxu0 %vm7375_vm4, %v7376_v13  ;;  %6186 = vmatprep.mubr.msk.f32.mxu1 %vm7375_vm4, %v7376_v13  ;;  %v1855_v42 = vmul.f32 %v7139_v2, %v7949_v48  ;;  %v8061_v6 = vadd.f32 %v7975_v27, %v1870_v4 }
 0x43c   : > { %v1871_v7 = vmul.f32 %v7968_v17, %v1855_v42 }
 0x43d   : > { %v7141_v5 = vpop.eup %7140  ;;  %6158 = vmatmul.mubr.msk.f32.gmra.mrb[44].mxu0 %vm1737_vm5, %v8048_v3  ;;  %6187 = vmatmul.mubr.msk.f32.gmra.mrb[50].mxu1 %vm1737_vm5, %v8048_v3 }
 0x43e   : > { %6160 = vmatprep.mubr.msk.f32.mxu0 %vm7375_vm4, %v7376_v13  ;;  %6189 = vmatprep.mubr.msk.f32.mxu1 %vm7375_vm4, %v7376_v13  ;;  %v1856_v48 = vmul.f32 %v7141_v5, %v7955_v54  ;;  %v8074_v9 = vadd.f32 %v7975_v27, %v1871_v7 }
 0x440   : > { %v1872_v10 = vmul.f32 %v7968_v17, %v1856_v48 }
 0x441   : > { %6161 = vmatmul.mubr.msk.f32.gmra.mrb[46].mxu0 %vm1737_vm5, %v8061_v6  ;;  %6190 = vmatmul.mubr.msk.f32.gmra.mrb[52].mxu1 %vm1737_vm5, %v8061_v6 }
 0x442   : > { %6163 = vmatprep.mubr.msk.f32.mxu0 %vm7375_vm4, %v7376_v13  ;;  %6192 = vmatprep.mubr.msk.f32.mxu1 %vm7375_vm4, %v7376_v13  ;;  %v8086_v54 = vadd.f32 %v7975_v27, %v1872_v10 }
 0x445   : > { %6164 = vmatmul.mubr.msk.f32.gmra.mrb[48].mxu0 %vm1737_vm5, %v8074_v9  ;;  %6193 = vmatmul.mubr.msk.f32.gmra.mrb[54].mxu1 %vm1737_vm5, %v8074_v9 }
 0x446   : > { %6166 = vmatprep.mubr.msk.f32.mxu0 %vm7375_vm4, %v7376_v13  ;;  %6195 = vmatprep.mubr.msk.f32.mxu1 %vm7375_vm4, %v7376_v13 }
 0x449   : > { %6167 = vmatmul.mubr.msk.f32.gmra.mrb[50].mxu0 %vm1737_vm5, %v8086_v54  ;;  %6196 = vmatmul.mubr.msk.f32.gmra.mrb[56].mxu1 %vm1737_vm5, %v8086_v54 }
 0x44a   : > { %6200 = vmatprep.mubr.msk.f32.mxu0 %vm7375_vm4, %v7376_v13  ;;  %6245 = vmatprep.mubr.msk.f32.mxu1 %vm7375_vm4, %v7376_v13 }
 0x44d   : > { %6201 = vmatmul.mubr.msk.f32.vlgmr.msra.gmra.mrb[52].mxu0 %vm1737_vm5, %v7981_v8 }
 0x44e   : > { %6203 = vmatprep.mubr.msk.f32.mxu0 %vm7375_vm4, %v7376_v13  ;;  %6273 = vmatpush3.msra.mxu0 %v5499_v11 }
 0x44f   : > { %6330 = vmatprep.subr.mxu0 %v7376_v13 }
 0x451   : > { %6204 = vmatmul.mubr.msk.f32.gmra.mrb[54].mxu0 %vm1737_vm5, %v7997_v47 }
 0x452   : > { %6206 = vmatprep.mubr.msk.f32.mxu0 %vm7375_vm4, %v7376_v13 }
 0x455   : > { %6207 = vmatmul.mubr.msk.f32.gmra.mrb[56].mxu0 %vm1737_vm5, %v8009_v20 }
 0x456   : > { %6209 = vmatprep.mubr.msk.f32.mxu0 %vm7375_vm4, %v7376_v13 }
 0x459   : > { %6210 = vmatmul.mubr.msk.f32.gmra.mrb[58].mxu0 %vm1737_vm5, %v8022_v60 }
 0x45a   : > { %6212 = vmatprep.mubr.msk.f32.mxu0 %vm7375_vm4, %v7376_v13 }
 0x45d   : > { %6213 = vmatmul.mubr.msk.f32.gmra.mrb[60].mxu0 %vm1737_vm5, %v8035_v63 }
 0x45e   : > { %6215 = vmatprep.mubr.msk.f32.mxu0 %vm7375_vm4, %v7376_v13 }
 0x461   : > { %6216 = vmatmul.mubr.msk.f32.gmra.mrb[62].mxu0 %vm1737_vm5, %v8048_v3 }
 0x462   : > { %6218 = vmatprep.mubr.msk.f32.mxu0 %vm7375_vm4, %v7376_v13 }
 0x465   : > { %6219 = vmatmul.mubr.msk.f32.gmra.mrb[64].mxu0 %vm1737_vm5, %v8061_v6 }
 0x466   : > { %6221 = vmatprep.mubr.msk.f32.mxu0 %vm7375_vm4, %v7376_v13 }
 0x469   : > { %6222 = vmatmul.mubr.msk.f32.gmra.mrb[66].mxu0 %vm1737_vm5, %v8074_v9 }
 0x46a   : > { %6224 = vmatprep.mubr.msk.f32.mxu0 %vm7375_vm4, %v7376_v13 }
 0x46d   : > { %6225 = vmatmul.mubr.msk.f32.gmra.mrb[68].mxu0 %vm1737_vm5, %v8086_v54 }
 0x46e   : > { %6274 = vmatprep.mubr.msk.f32.mxu0 %vm7375_vm4, %v7376_v13 }
 0x471   : > { %6275 = vmatmul.mubr.msk.f32.vlgmr.msra.gmra.mrb[70].mxu0 %vm1737_vm5, %v7981_v8 }
 0x472   : > { %6277 = vmatprep.mubr.msk.f32.mxu0 %vm7375_vm4, %v7376_v13  ;;  %6331 = vmatpush3.msra.mxu0 %v5523_v51 }
 0x473   : > { %6891 = vmatprep.subr.bf16.mxu0 %v7374_v12 }
 0x475   : > { %6278 = vmatmul.mubr.msk.f32.gmra.mrb[72].mxu0 %vm1737_vm5, %v7997_v47 }
 0x476   : > { %6280 = vmatprep.mubr.msk.f32.mxu0 %vm7375_vm4, %v7376_v13 }
 0x479   : > { %6281 = vmatmul.mubr.msk.f32.gmra.mrb[74].mxu0 %vm1737_vm5, %v8009_v20 }
 0x47a   : > { %6283 = vmatprep.mubr.msk.f32.mxu0 %vm7375_vm4, %v7376_v13 }
 0x47d   : > { %6284 = vmatmul.mubr.msk.f32.gmra.mrb[76].mxu0 %vm1737_vm5, %v8022_v60 }
 0x47e   : > { %6286 = vmatprep.mubr.msk.f32.mxu0 %vm7375_vm4, %v7376_v13 }
 0x481   : > { %6287 = vmatmul.mubr.msk.f32.gmra.mrb[78].mxu0 %vm1737_vm5, %v8035_v63 }
 0x482   : > { %6289 = vmatprep.mubr.msk.f32.mxu0 %vm7375_vm4, %v7376_v13 }
 0x485   : > { %6290 = vmatmul.mubr.msk.f32.gmra.mrb[80].mxu0 %vm1737_vm5, %v8048_v3 }
 0x486   : > { %6292 = vmatprep.mubr.msk.f32.mxu0 %vm7375_vm4, %v7376_v13 }
 0x489   : > { %6293 = vmatmul.mubr.msk.f32.gmra.mrb[82].mxu0 %vm1737_vm5, %v8061_v6 }
 0x48a   : > { %6295 = vmatprep.mubr.msk.f32.mxu0 %vm7375_vm4, %v7376_v13 }
 0x48d   : > { %6296 = vmatmul.mubr.msk.f32.gmra.mrb[84].mxu0 %vm1737_vm5, %v8074_v9 }
 0x48e   : > { %6298 = vmatprep.mubr.msk.f32.mxu0 %vm7375_vm4, %v7376_v13 }
 0x491   : > { %6299 = vmatmul.mubr.msk.f32.gmra.mrb[86].mxu0 %vm1737_vm5, %v8086_v54 }
 0x492   : > { %6332 = vmatprep.mubr.msk.f32.mxu0 %vm7375_vm4, %v7376_v13 }
 0x495   : > { %6333 = vmatmul.mubr.msk.f32.vlgmr.msra.gmra.mrb[88].mxu0 %vm1737_vm5, %v7981_v8 }
 0x496   : > { %6335 = vmatprep.mubr.msk.f32.mxu0 %vm7375_vm4, %v7376_v13 }
 0x499   : > { %6336 = vmatmul.mubr.msk.f32.gmra.mrb[90].mxu0 %vm1737_vm5, %v7997_v47 }
 0x49a   : > { %6338 = vmatprep.mubr.msk.f32.mxu0 %vm7375_vm4, %v7376_v13 }
 0x49d   : > { %6339 = vmatmul.mubr.msk.f32.gmra.mrb[92].mxu0 %vm1737_vm5, %v8009_v20 }
 0x49e   : > { %6341 = vmatprep.mubr.msk.f32.mxu0 %vm7375_vm4, %v7376_v13 }
 0x4a1   : > { %6342 = vmatmul.mubr.msk.f32.gmra.mrb[94].mxu0 %vm1737_vm5, %v8022_v60 }
 0x4a2   : > { %6344 = vmatprep.mubr.msk.f32.mxu0 %vm7375_vm4, %v7376_v13 }
 0x4a5   : > { %6345 = vmatmul.mubr.msk.f32.gmra.mrb[96].mxu0 %vm1737_vm5, %v8035_v63 }
 0x4a6   : > { %6347 = vmatprep.mubr.msk.f32.mxu0 %vm7375_vm4, %v7376_v13 }
 0x4a9   : > { %6348 = vmatmul.mubr.msk.f32.gmra.mrb[98].mxu0 %vm1737_vm5, %v8048_v3 }
 0x4aa   : > { %6350 = vmatprep.mubr.msk.f32.mxu0 %vm7375_vm4, %v7376_v13 }
 0x4ad   : > { %6351 = vmatmul.mubr.msk.f32.gmra.mrb[100].mxu0 %vm1737_vm5, %v8061_v6 }
 0x4ae   : > { %6353 = vmatprep.mubr.msk.f32.mxu0 %vm7375_vm4, %v7376_v13 }
 0x4b1   : > { %6354 = vmatmul.mubr.msk.f32.gmra.mrb[102].mxu0 %vm1737_vm5, %v8074_v9 }
 0x4b2   : > { %6356 = vmatprep.mubr.msk.f32.mxu0 %vm7375_vm4, %v7376_v13 }
 0x4b5   : > { %6357 = vmatmul.mubr.msk.f32.gmra.mrb[104].mxu0 %vm1737_vm5, %v8086_v54 }
 0x4b6   : > { %6422 = vmatprep.mubr.msk.f32.mxu0 %vm7375_vm4, %v7376_v13 }
 0x4fc   : > { %v8212_v15 = vpop.f32.mrb[34].mxu0  ;;  %v2110_v16 = vpop.f32.mrb[40].mxu1 }
 0x4fd   : > { %v6144_v17 = vpop.f32.mrb[35].mxu0  ;;  %v6173_v18 = vpop.f32.mrb[41].mxu1  ;;  %v2111_v27 = vadd.f32 %v5459_v19, %v2110_v16 }
 0x500   : > { %v8217_v25 = vpop.f32.mrb[36].mxu0  ;;  %v2115_v26 = vpop.f32.mrb[42].mxu1 }
 0x501   : > { %v2116_v29 = vadd.f32 %v5459_v19, %v2115_v26  ;;  %v6147_v31 = vpop.f32.mrb[37].mxu0  ;;  %v6176_v32 = vpop.f32.mrb[43].mxu1 }
 0x503   : > { %v6860_v34 = vpack.c.bf16 %v2116_v29, %v2111_v27 }
 0x504   : > { %v8225_v37 = vpop.f32.mrb[38].mxu0  ;;  %v2120_v24 = vpop.f32.mrb[44].mxu1 }
 0x505   : > { %v6150_v38 = vpop.f32.mrb[39].mxu0  ;;  %v6179_v39 = vpop.f32.mrb[45].mxu1  ;;  %6862 = vmatpush3.bf16.xpose.msk.msra.mxu1 %vm8221_vm7, %v6860_v34  ;;  %v2121_v43 = vadd.f32 %v5459_v19, %v2120_v24  ;;  %v8254_v34 = vld [vmem:[%s9582_s10 + $0x4] ss:$0 sm:$0xff]  ;;  %v5447_v24 = vld [vmem:[%s9582_s10] ss:$0 sm:$0xff] }
 0x506   : > { %6863 = vmatprep.subr.bf16.mxu1 %v7374_v12 }
 0x508   : > { %v8230_v41 = vpop.f32.mrb[40].mxu0  ;;  %v2125_v14 = vpop.f32.mrb[46].mxu1 }
 0x509   : > { %v2126_v44 = vadd.f32 %v5459_v19, %v2125_v14  ;;  %v6153_v46 = vpop.f32.mrb[41].mxu0  ;;  %v6182_v22 = vpop.f32.mrb[47].mxu1 }
 0x50a   : > { %v1991_v46 = vadd.f32 %v5447_v24, %v8212_v15  ;;  %v5511_v22 = vld [vmem:[%s9581_s9 + $0x18] sm:$0xff] }
 0x50b   : > { %v6864_v50 = vpack.c.bf16 %v2126_v44, %v2121_v43 }
 0x50c   : > { %v8232_v52 = vpop.f32.mrb[42].mxu0  ;;  %v2130_v53 = vpop.f32.mrb[48].mxu1 }
 0x50d   : > { %v6156_v56 = vpop.f32.mrb[43].mxu0  ;;  %v6185_v57 = vpop.f32.mrb[49].mxu1  ;;  %6866 = vmatpush3.bf16.xpose.msk.msra.mxu1 %vm8221_vm7, %v6864_v50  ;;  %v2131_v30 = vadd.f32 %v5459_v19, %v2130_v53 }
 0x50e   : > { %6867 = vmatprep.subr.bf16.mxu1 %v7374_v12  ;;  %v1996_v56 = vadd.f32 %v5447_v24, %v8217_v25 }
 0x510   : > { %v8237_v23 = vpop.f32.mrb[44].mxu0  ;;  %v2135_v58 = vpop.f32.mrb[50].mxu1 }
 0x511   : > { %v2136_v61 = vadd.f32 %v5459_v19, %v2135_v58  ;;  %v6159_v62 = vpop.f32.mrb[45].mxu0  ;;  %v6188_v1 = vpop.f32.mrb[51].mxu1 }
 0x513   : > { %v6868_v36 = vpack.c.bf16 %v2136_v61, %v2131_v30  ;;  %v2001_v61 = vadd.f32 %v5447_v24, %v8225_v37 }
 0x514   : > { %v8239_v2 = vpop.f32.mrb[46].mxu0  ;;  %v2140_v4 = vpop.f32.mrb[52].mxu1 }
 0x515   : > { %v6162_v42 = vpop.f32.mrb[47].mxu0  ;;  %v6191_v5 = vpop.f32.mrb[53].mxu1  ;;  %6870 = vmatpush3.bf16.xpose.msk.msra.mxu1 %vm8221_vm7, %v6868_v36  ;;  %v2141_v10 = vadd.f32 %v5459_v19, %v2140_v4  ;;  %v2006_v36 = vadd.f32 %v5447_v24, %v8230_v41 }
 0x516   : > { %6871 = vmatprep.subr.bf16.mxu1 %v7374_v12 }
 0x518   : > { %v8244_v7 = vpop.f32.mrb[48].mxu0  ;;  %v2145_v48 = vpop.f32.mrb[54].mxu1 }
 0x519   : > { %v2146_v11 = vadd.f32 %v5459_v19, %v2145_v48  ;;  %v6165_v51 = vpop.f32.mrb[49].mxu0  ;;  %v6194_v16 = vpop.f32.mrb[55].mxu1  ;;  %v2011_v48 = vadd.f32 %v5447_v24, %v8232_v52 }
 0x51a   : > { %v2016_v51 = vadd.f32 %v5447_v24, %v8237_v23 }
 0x51b   : > { %v6872_v17 = vpack.c.bf16 %v2146_v11, %v2141_v10 }
 0x51c   : > { %v8246_v18 = vpop.f32.mrb[50].mxu0  ;;  %v2150_v26 = vpop.f32.mrb[56].mxu1 }
 0x51d   : > { %v6168_v27 = vpop.f32.mrb[51].mxu0  ;;  %v6197_v29 = vpop.f32.mrb[57].mxu1  ;;  %6874 = vmatpush3.bf16.xpose.msk.msra.mxu1 %vm8221_vm7, %v6872_v17  ;;  %v2151_v38 = vadd.f32 %v5459_v19, %v2150_v26 }
 0x51e   : > { %6243 = vmatprep.subr.mxu1 %v7376_v13  ;;  %v2021_v27 = vadd.f32 %v5447_v24, %v8239_v2  ;;  %v2031_v2 = vadd.f32 %v5447_v24, %v8246_v18 }
 0x520   : > { %v2230_v31 = vpop.f32.mrb[52].mxu0 }
 0x521   : > { %v6202_v32 = vpop.f32.mrb[53].mxu0  ;;  %v8260_v14 = vadd.f32 %v8254_v34, %v2230_v31 }
 0x522   : > { %v2026_v32 = vadd.f32 %v5447_v24, %v8244_v7 }
 0x524   : > { %v2235_v39 = vpop.f32.mrb[54].mxu0 }
 0x525   : > { %v8263_v43 = vadd.f32 %v8254_v34, %v2235_v39  ;;  %v6205_v44 = vpop.f32.mrb[55].mxu0  ;;  %6244 = vmatpush3.xpose.msk.msra.mxu1 %vm1737_vm5, %v2151_v38 }
 0x526   : > { %6301 = vmatprep.subr.mxu1 %v7376_v13 }
 0x527   : > { %v6904_v19 = vpack.c.bf16 %v8263_v43, %v8260_v14 }
 0x528   : > { %v2240_v50 = vpop.f32.mrb[56].mxu0  ;;  %6246 = vmatmul.mubr.msk.f32.vlgmr.msra.gmra.mrb[58].mxu1 %vm1737_vm5, %v1991_v46 }
 0x529   : > { %v6208_v53 = vpop.f32.mrb[57].mxu0  ;;  %6248 = vmatprep.mubr.msk.f32.mxu1 %vm7375_vm4, %v7376_v13  ;;  %6302 = vmatpush3.msra.mxu1 %v5511_v22  ;;  %v8280_v57 = vadd.f32 %v8254_v34, %v2240_v50 }
 0x52a   : > { %6875 = vmatprep.subr.bf16.mxu1 %v7374_v12 }
 0x52c   : > { %v2245_v15 = vpop.f32.mrb[58].mxu0  ;;  %6249 = vmatmul.mubr.msk.f32.gmra.mrb[60].mxu1 %vm1737_vm5, %v1996_v56 }
 0x52d   : > { %v8283_v58 = vadd.f32 %v8254_v34, %v2245_v15  ;;  %v6211_v30 = vpop.f32.mrb[59].mxu0  ;;  %6251 = vmatprep.mubr.msk.f32.mxu1 %vm7375_vm4, %v7376_v13 }
 0x52f   : > { %v6907_v25 = vpack.c.bf16 %v8283_v58, %v8280_v57 }
 0x530   : > { %v2250_v62 = vpop.f32.mrb[60].mxu0  ;;  %6252 = vmatmul.mubr.msk.f32.gmra.mrb[62].mxu1 %vm1737_vm5, %v2001_v61 }
 0x531   : > { %v6214_v1 = vpop.f32.mrb[61].mxu0  ;;  %6254 = vmatprep.mubr.msk.f32.mxu1 %vm7375_vm4, %v7376_v13  ;;  %v8296_v42 = vadd.f32 %v8254_v34, %v2250_v62 }
 0x534   : > { %v2255_v4 = vpop.f32.mrb[62].mxu0  ;;  %6255 = vmatmul.mubr.msk.f32.gmra.mrb[64].mxu1 %vm1737_vm5, %v2006_v36 }
 0x535   : > { %v8299_v37 = vadd.f32 %v8254_v34, %v2255_v4  ;;  %v6217_v5 = vpop.f32.mrb[63].mxu0  ;;  %6257 = vmatprep.mubr.msk.f32.mxu1 %vm7375_vm4, %v7376_v13 }
 0x537   : > { %v6910_v10 = vpack.c.bf16 %v8299_v37, %v8296_v42 }
 0x538   : > { %v2260_v11 = vpop.f32.mrb[64].mxu0  ;;  %6258 = vmatmul.mubr.msk.f32.gmra.mrb[66].mxu1 %vm1737_vm5, %v2011_v48 }
 0x539   : > { %v6220_v41 = vpop.f32.mrb[65].mxu0  ;;  %6260 = vmatprep.mubr.msk.f32.mxu1 %vm7375_vm4, %v7376_v13  ;;  %v8312_v17 = vadd.f32 %v8254_v34, %v2260_v11 }
 0x53c   : > { %v2265_v16 = vpop.f32.mrb[66].mxu0  ;;  %6261 = vmatmul.mubr.msk.f32.gmra.mrb[68].mxu1 %vm1737_vm5, %v2016_v51 }
 0x53d   : > { %v8315_v52 = vadd.f32 %v8254_v34, %v2265_v16  ;;  %v6223_v26 = vpop.f32.mrb[67].mxu0  ;;  %6263 = vmatprep.mubr.msk.f32.mxu1 %vm7375_vm4, %v7376_v13 }
 0x53f   : > { %v6913_v29 = vpack.c.bf16 %v8315_v52, %v8312_v17 }
 0x540   : > { %v8322_v31 = vpop.f32.mrb[68].mxu0  ;;  %6264 = vmatmul.mubr.msk.f32.gmra.mrb[70].mxu1 %vm1737_vm5, %v2021_v27 }
 0x541   : > { %v6226_v23 = vpop.f32.mrb[69].mxu0  ;;  %6266 = vmatprep.mubr.msk.f32.mxu1 %vm7375_vm4, %v7376_v13 }
 0x544   : > { %6267 = vmatmul.mubr.msk.f32.gmra.mrb[72].mxu1 %vm1737_vm5, %v2026_v32  ;;  %v8329_v38 = vpop.f32.mrb[70].mxu0 }
 0x545   : > { %v6276_v39 = vpop.f32.mrb[71].mxu0  ;;  %6269 = vmatprep.mubr.msk.f32.mxu1 %vm7375_vm4, %v7376_v13 }
 0x548   : > { %6270 = vmatmul.mubr.msk.f32.gmra.mrb[74].mxu1 %vm1737_vm5, %v2031_v2  ;;  %v8335_v44 = vpop.f32.mrb[72].mxu0 }
 0x549   : > { %v6279_v46 = vpop.f32.mrb[73].mxu0  ;;  %6303 = vmatprep.mubr.msk.f32.mxu1 %vm7375_vm4, %v7376_v13 }
 0x54c   : > { %v8339_v22 = vpop.f32.mrb[74].mxu0  ;;  %6304 = vmatmul.mubr.msk.f32.vlgmr.msra.gmra.mrb[76].mxu1 %vm1737_vm5, %v7981_v8 }
 0x54d   : > { %v6282_v7 = vpop.f32.mrb[75].mxu0  ;;  %6306 = vmatprep.mubr.msk.f32.mxu1 %vm7375_vm4, %v7376_v13 }
 0x550   : > { %v8345_v50 = vpop.f32.mrb[76].mxu0  ;;  %6307 = vmatmul.mubr.msk.f32.gmra.mrb[78].mxu1 %vm1737_vm5, %v7997_v47 }
 0x551   : > { %v6285_v18 = vpop.f32.mrb[77].mxu0  ;;  %6309 = vmatprep.mubr.msk.f32.mxu1 %vm7375_vm4, %v7376_v13 }
 0x554   : > { %v8351_v24 = vpop.f32.mrb[78].mxu0  ;;  %6310 = vmatmul.mubr.msk.f32.gmra.mrb[80].mxu1 %vm1737_vm5, %v8009_v20 }
 0x555   : > { %v6288_v53 = vpop.f32.mrb[79].mxu0  ;;  %6312 = vmatprep.mubr.msk.f32.mxu1 %vm7375_vm4, %v7376_v13 }
 0x558   : > { %v8357_v8 = vpop.f32.mrb[80].mxu0  ;;  %6313 = vmatmul.mubr.msk.f32.gmra.mrb[82].mxu1 %vm1737_vm5, %v8022_v60 }
 0x559   : > { %v6291_v56 = vpop.f32.mrb[81].mxu0  ;;  %6315 = vmatprep.mubr.msk.f32.mxu1 %vm7375_vm4, %v7376_v13 }
 0x55c   : > { %v8363_v47 = vpop.f32.mrb[82].mxu0  ;;  %6316 = vmatmul.mubr.msk.f32.gmra.mrb[84].mxu1 %vm1737_vm5, %v8035_v63 }
 0x55d   : > { %v6294_v15 = vpop.f32.mrb[83].mxu0  ;;  %6318 = vmatprep.mubr.msk.f32.mxu1 %vm7375_vm4, %v7376_v13 }
 0x560   : > { %v8369_v20 = vpop.f32.mrb[84].mxu0  ;;  %6319 = vmatmul.mubr.msk.f32.gmra.mrb[86].mxu1 %vm1737_vm5, %v8048_v3  ;;  %v5525_v3 = vld [vmem:[%s9582_s10 + $0x5] ss:$0 sm:$0xff] }
 0x561   : > { %v6297_v30 = vpop.f32.mrb[85].mxu0  ;;  %6321 = vmatprep.mubr.msk.f32.mxu1 %vm7375_vm4, %v7376_v13 }
 0x564   : > { %v8375_v60 = vpop.f32.mrb[86].mxu0  ;;  %6322 = vmatmul.mubr.msk.f32.gmra.mrb[88].mxu1 %vm1737_vm5, %v8061_v6 }
 0x565   : > { %v6300_v61 = vpop.f32.mrb[87].mxu0  ;;  %6324 = vmatprep.mubr.msk.f32.mxu1 %vm7375_vm4, %v7376_v13 }
 0x568   : > { %6325 = vmatmul.mubr.msk.f32.gmra.mrb[90].mxu1 %vm1737_vm5, %v8074_v9  ;;  %v2864_v63 = vpop.f32.mrb[88].mxu0 }
 0x569   : > { %v6334_v62 = vpop.f32.mrb[89].mxu0  ;;  %6327 = vmatprep.mubr.msk.f32.mxu1 %vm7375_vm4, %v7376_v13  ;;  %v2865_v1 = vadd.f32 %v5525_v3, %v2864_v63 }
 0x56c   : > { %6328 = vmatmul.mubr.msk.f32.gmra.mrb[92].mxu1 %vm1737_vm5, %v8086_v54  ;;  %v2869_v6 = vpop.f32.mrb[90].mxu0 }
 0x56d   : > { %v2870_v36 = vadd.f32 %v5525_v3, %v2869_v6  ;;  %v6337_v4 = vpop.f32.mrb[91].mxu0  ;;  %6377 = vmatprep.mubr.msk.f32.mxu1 %vm7375_vm4, %v7376_v13 }
 0x56f   : > { %v6892_v9 = vpack.c.bf16 %v2870_v36, %v2865_v1 }
 0x570   : > { %v2874_v5 = vpop.f32.mrb[92].mxu0 }
 0x571   : > { %v6340_v48 = vpop.f32.mrb[93].mxu0  ;;  %6893 = vmatpush3.bf16.msra.mxu0 %v6892_v9  ;;  %v2875_v41 = vadd.f32 %v5525_v3, %v2874_v5 }
 0x572   : > { %6894 = vmatprep.subr.bf16.mxu0 %v7374_v12 }
 0x574   : > { %v2879_v11 = vpop.f32.mrb[94].mxu0 }
 0x575   : > { %v2880_v51 = vadd.f32 %v5525_v3, %v2879_v11  ;;  %v6343_v16 = vpop.f32.mrb[95].mxu0 }
 0x577   : > { %v6895_v26 = vpack.c.bf16 %v2880_v51, %v2875_v41 }
 0x578   : > { %v2884_v27 = vpop.f32.mrb[96].mxu0 }
 0x579   : > { %v6346_v54 = vpop.f32.mrb[97].mxu0  ;;  %6896 = vmatpush3.bf16.msra.mxu0 %v6895_v26  ;;  %v2885_v32 = vadd.f32 %v5525_v3, %v2884_v27 }
 0x57a   : > { %6897 = vmatprep.subr.bf16.mxu0 %v7374_v12 }
 0x57c   : > { %v2889_v23 = vpop.f32.mrb[98].mxu0 }
 0x57d   : > { %v2890_v39 = vadd.f32 %v5525_v3, %v2889_v23  ;;  %v6349_v2 = vpop.f32.mrb[99].mxu0 }
 0x57f   : > { %v6898_v46 = vpack.c.bf16 %v2890_v39, %v2885_v32 }
 0x580   : > { %v2894_v7 = vpop.f32.mrb[100].mxu0 }
 0x581   : > { %v6352_v18 = vpop.f32.mrb[101].mxu0  ;;  %6899 = vmatpush3.bf16.msra.mxu0 %v6898_v46  ;;  %v2895_v56 = vadd.f32 %v5525_v3, %v2894_v7 }
 0x582   : > { %6900 = vmatprep.subr.bf16.mxu0 %v7374_v12 }
 0x584   : > { %v2899_v53 = vpop.f32.mrb[102].mxu0 }
 0x585   : > { %v2900_v15 = vadd.f32 %v5525_v3, %v2899_v53  ;;  %v6355_v30 = vpop.f32.mrb[103].mxu0 }
 0x587   : > { %v6901_v61 = vpack.c.bf16 %v2900_v15, %v2895_v56 }
 0x588   : > { %v2904_v63 = vpop.f32.mrb[104].mxu0 }
 0x589   : > { %v6358_v62 = vpop.f32.mrb[105].mxu0  ;;  %6902 = vmatpush3.bf16.msra.mxu0 %v6901_v61  ;;  %v2905_v6 = vadd.f32 %v5525_v3, %v2904_v63 }
 0x58a   : > { %6420 = vmatprep.subr.mxu0 %v7376_v13 }
 0x58d   : > { %6421 = vmatpush3.msk.msra.mxu0 %vm3207_vm8, %v2905_v6 }
 0x58e   : > { %6494 = vmatprep.subr.mxu0 %v7376_v13 }
 0x5fb   : > { %v2394_v1 = vpop.f32.mrb[58].mxu1 }
 0x5fc   : > { %v8398_v36 = vmul.f32 0.5, %v2394_v1  ;;  %v6247_v4 = vpop.f32.mrb[59].mxu1 }
 0x5fe   : > { %v2448_v9 = vsel %vm2447_vm9, %v8398_v36, -inf }
 0x5ff   : > { %2449 = vmax.xlane.f32.xlu1 %v2448_v9  ;;  %v2399_v5 = vpop.f32.mrb[60].mxu1 }
 0x600   : > { %v8402_v48 = vmul.f32 0.5, %v2399_v5  ;;  %v6250_v11 = vpop.f32.mrb[61].mxu1 }
 0x602   : > { %v2451_v3 = vsel %vm2447_vm9, %v8402_v48, -inf }
 0x603   : > { %2452 = vmax.xlane.f32.xlu1 %v2451_v3  ;;  %v2404_v41 = vpop.f32.mrb[62].mxu1 }
 0x604   : > { %v8406_v51 = vmul.f32 0.5, %v2404_v41  ;;  %v6253_v16 = vpop.f32.mrb[63].mxu1 }
 0x606   : > { %v2454_v26 = vsel %vm2447_vm9, %v8406_v51, -inf }
 0x607   : > { %2455 = vmax.xlane.f32.xlu1 %v2454_v26  ;;  %v2409_v27 = vpop.f32.mrb[64].mxu1 }
 0x608   : > { %v8410_v54 = vmul.f32 0.5, %v2409_v27  ;;  %v6256_v23 = vpop.f32.mrb[65].mxu1  ;;  %v5513_v27 = vld [vmem:[%s9582_s10 + $0x3] ss:$0 sm:$0xff] }
 0x60a   : > { %v2457_v32 = vsel %vm2447_vm9, %v8410_v54, -inf }
 0x60b   : > { %2458 = vmax.xlane.f32.xlu1 %v2457_v32  ;;  %v2414_v39 = vpop.f32.mrb[66].mxu1 }
 0x60c   : > { %v8414_v2 = vmul.f32 0.5, %v2414_v39  ;;  %v6259_v46 = vpop.f32.mrb[67].mxu1 }
 0x60e   : > { %v2460_v7 = vsel %vm2447_vm9, %v8414_v2, -inf }
 0x60f   : > { %2461 = vmax.xlane.f32.xlu1 %v2460_v7  ;;  %v2419_v18 = vpop.f32.mrb[68].mxu1 }
 0x610   : > { %v8418_v53 = vmul.f32 0.5, %v2419_v18  ;;  %v6262_v56 = vpop.f32.mrb[69].mxu1 }
 0x612   : > { %v2463_v15 = vsel %vm2447_vm9, %v8418_v53, -inf }
 0x613   : > { %2464 = vmax.xlane.f32.xlu1 %v2463_v15  ;;  %v2424_v30 = vpop.f32.mrb[70].mxu1 }
 0x614   : > { %v8422_v61 = vmul.f32 0.5, %v2424_v30  ;;  %v6265_v63 = vpop.f32.mrb[71].mxu1 }
 0x616   : > { %v2466_v62 = vsel %vm2447_vm9, %v8422_v61, -inf }
 0x617   : > { %2467 = vmax.xlane.f32.xlu1 %v2466_v62  ;;  %v2429_v6 = vpop.f32.mrb[72].mxu1 }
 0x618   : > { %v8426_v1 = vmul.f32 0.5, %v2429_v6  ;;  %v6268_v4 = vpop.f32.mrb[73].mxu1 }
 0x61a   : > { %v2469_v9 = vsel %vm2447_vm9, %v8426_v1, -inf }
 0x61b   : > { %2470 = vmax.xlane.f32.xlu1 %v2469_v9  ;;  %v2434_v5 = vpop.f32.mrb[74].mxu1 }
 0x61c   : > { %v8430_v11 = vmul.f32 0.5, %v2434_v5  ;;  %v6271_v3 = vpop.f32.mrb[75].mxu1 }
 0x61e   : > { %v2473_v41 = vsel %vm2472_vm10, %v8430_v11, -inf }
 0x61f   : > { %2474 = vmax.xlane.f32.xlu1 %v2473_v41  ;;  %v2744_v16 = vpop.f32.mrb[76].mxu1 }
 0x620   : > { %v6305_v26 = vpop.f32.mrb[77].mxu1  ;;  %v2745_v32 = vadd.f32 %v5513_v27, %v2744_v16 }
 0x623   : > { %v2749_v23 = vpop.f32.mrb[78].mxu1 }
 0x624   : > { %v2750_v39 = vadd.f32 %v5513_v27, %v2749_v23  ;;  %v6308_v46 = vpop.f32.mrb[79].mxu1 }
 0x626   : > { %v6876_v7 = vpack.c.bf16 %v2750_v39, %v2745_v32 }
 0x627   : > { %v2754_v18 = vpop.f32.mrb[80].mxu1 }
 0x628   : > { %v6311_v56 = vpop.f32.mrb[81].mxu1  ;;  %6878 = vmatpush3.bf16.xpose.msk.msra.mxu1 %vm8221_vm7, %v6876_v7  ;;  %v2755_v30 = vadd.f32 %v5513_v27, %v2754_v18 }
 0x629   : > { %6879 = vmatprep.subr.bf16.mxu1 %v7374_v12 }
 0x62b   : > { %v2759_v15 = vpop.f32.mrb[82].mxu1 }
 0x62c   : > { %v2760_v63 = vadd.f32 %v5513_v27, %v2759_v15  ;;  %v6314_v62 = vpop.f32.mrb[83].mxu1 }
 0x62e   : > { %v6880_v6 = vpack.c.bf16 %v2760_v63, %v2755_v30  ;;  %v5501_v63 = vld [vmem:[%s9582_s10 + $0x1] ss:$0 sm:$0xff] }
 0x62f   : > { %v2764_v4 = vpop.f32.mrb[84].mxu1  ;;  %v2640_v14 = vadd.f32 %v5501_v63, %v8345_v50  ;;  %v2645_v43 = vadd.f32 %v5501_v63, %v8351_v24  ;;  %v2650_v57 = vadd.f32 %v5501_v63, %v8357_v8  ;;  %v2655_v58 = vadd.f32 %v5501_v63, %v8363_v47 }
 0x630   : > { %v6317_v9 = vpop.f32.mrb[85].mxu1  ;;  %6882 = vmatpush3.bf16.xpose.msk.msra.mxu1 %vm8221_vm7, %v6880_v6  ;;  %v2765_v3 = vadd.f32 %v5513_v27, %v2764_v4  ;;  %v2625_v6 = vadd.f32 %v5501_v63, %v8329_v38  ;;  %v2630_v4 = vadd.f32 %v5501_v63, %v8335_v44  ;;  %v2635_v38 = vadd.f32 %v5501_v63, %v8339_v22 }
 0x631   : > { %6883 = vmatprep.subr.bf16.mxu1 %v7374_v12 }
 0x633   : > { %v2769_v5 = vpop.f32.mrb[86].mxu1 }
 0x634   : > { %v2770_v41 = vadd.f32 %v5513_v27, %v2769_v5  ;;  %v6320_v16 = vpop.f32.mrb[87].mxu1 }
 0x636   : > { %v6884_v26 = vpack.c.bf16 %v2770_v41, %v2765_v3 }
 0x637   : > { %v2774_v23 = vpop.f32.mrb[88].mxu1 }
 0x638   : > { %v6323_v32 = vpop.f32.mrb[89].mxu1  ;;  %6886 = vmatpush3.bf16.xpose.msk.msra.mxu1 %vm8221_vm7, %v6884_v26  ;;  %v2775_v46 = vadd.f32 %v5513_v27, %v2774_v23 }
 0x639   : > { %6887 = vmatprep.subr.bf16.mxu1 %v7374_v12 }
 0x63b   : > { %v2779_v39 = vpop.f32.mrb[90].mxu1 }
 0x63c   : > { %v2780_v7 = vadd.f32 %v5513_v27, %v2779_v39  ;;  %v6326_v18 = vpop.f32.mrb[91].mxu1 }
 0x63e   : > { %v6888_v56 = vpack.c.bf16 %v2780_v7, %v2775_v46 }
 0x63f   : > { %v2784_v15 = vpop.f32.mrb[92].mxu1 }
 0x640   : > { %v6329_v30 = vpop.f32.mrb[93].mxu1  ;;  %6890 = vmatpush3.bf16.xpose.msk.msra.mxu1 %vm8221_vm7, %v6888_v56  ;;  %v2785_v62 = vadd.f32 %v5513_v27, %v2784_v15 }
 0x641   : > { %6375 = vmatprep.subr.mxu1 %v7376_v13 }
 0x648   : > { %6376 = vmatpush3.xpose.msk.msra.mxu1 %vm1737_vm5, %v2785_v62 }
 0x649   : > { %6903 = vmatprep.subr.bf16.mxu1 %v7374_v12 }
 0x64b   : > { %6378 = vmatmul.mubr.msk.f32.vlgmr.msra.gmra.mrb[94].mxu1 %vm1737_vm5, %v2625_v6 }
 0x64c   : > { %6905 = vmatpush3.bf16.msra.mxu1 %v6904_v19  ;;  %6380 = vmatprep.mubr.msk.f32.mxu1 %vm7375_vm4, %v7376_v13  ;;  %v2271_v19 = vadd.f32 %v8254_v34, %v8322_v31  ;;  %v2660_v34 = vadd.f32 %v5501_v63, %v8369_v20 }
 0x64d   : > { %6906 = vmatprep.subr.bf16.mxu1 %v7374_v12 }
 0x64f   : > { %6381 = vmatmul.mubr.msk.f32.gmra.mrb[96].mxu1 %vm1737_vm5, %v2630_v4 }
 0x650   : > { %6908 = vmatpush3.bf16.msra.mxu1 %v6907_v25  ;;  %6383 = vmatprep.mubr.msk.f32.mxu1 %vm7375_vm4, %v7376_v13  ;;  %v2665_v25 = vadd.f32 %v5501_v63, %v8375_v60 }
 0x651   : > { %6909 = vmatprep.subr.bf16.mxu1 %v7374_v12 }
 0x653   : > { %6384 = vmatmul.mubr.msk.f32.gmra.mrb[98].mxu1 %vm1737_vm5, %v2635_v38 }
 0x654   : > { %6911 = vmatpush3.bf16.msra.mxu1 %v6910_v10  ;;  %6386 = vmatprep.mubr.msk.f32.mxu1 %vm7375_vm4, %v7376_v13 }
 0x655   : > { %6912 = vmatprep.subr.bf16.mxu1 %v7374_v12 }
 0x657   : > { %6387 = vmatmul.mubr.msk.f32.gmra.mrb[100].mxu1 %vm1737_vm5, %v2640_v14 }
 0x658   : > { %6914 = vmatpush3.bf16.msra.mxu1 %v6913_v29  ;;  %6389 = vmatprep.mubr.msk.f32.mxu1 %vm7375_vm4, %v7376_v13 }
 0x659   : > { %6465 = vmatprep.subr.mxu1 %v7376_v13 }
 0x65b   : > { %6390 = vmatmul.mubr.msk.f32.gmra.mrb[102].mxu1 %vm1737_vm5, %v2645_v43 }
 0x65c   : > { %6466 = vmatpush3.msk.msra.mxu1 %vm3207_vm8, %v2271_v19  ;;  %6392 = vmatprep.mubr.msk.f32.mxu1 %vm7375_vm4, %v7376_v13 }
 0x65d   : > { %6523 = vmatprep.subr.mxu1 %v7376_v13 }
 0x65f   : > { %6393 = vmatmul.mubr.msk.f32.gmra.mrb[104].mxu1 %vm1737_vm5, %v2650_v57 }
 0x660   : > { %6395 = vmatprep.mubr.msk.f32.mxu1 %vm7375_vm4, %v7376_v13 }
 0x663   : > { %6396 = vmatmul.mubr.msk.f32.gmra.mrb[106].mxu1 %vm1737_vm5, %v2655_v58 }
 0x664   : > { %6398 = vmatprep.mubr.msk.f32.mxu1 %vm7375_vm4, %v7376_v13 }
 0x667   : > { %6399 = vmatmul.mubr.msk.f32.gmra.mrb[108].mxu1 %vm1737_vm5, %v2660_v34 }
 0x668   : > { %6401 = vmatprep.mubr.msk.f32.mxu1 %vm7375_vm4, %v7376_v13 }
 0x66b   : > { %6402 = vmatmul.mubr.msk.f32.gmra.mrb[110].mxu1 %vm1737_vm5, %v2665_v25 }
 0x66c   : > { %6467 = vmatprep.mubr.msk.f32.mxu1 %vm7375_vm4, %v7376_v13 }
 0x68c   : > { %v2450_v42 = vpop.xlane.xlu1 %2449 }
 0x68d   : > { %v2476_v37 = vsub.f32 %v8398_v36, %v2450_v42 }
 0x68f   : > { %v2485_v10 = vmul.f32 1.442695, %v2476_v37 }
 0x690   : > { %v2453_v17 = vpop.xlane.xlu1 %2452 }
 0x691   : > { %7142 = vpow2.f32 %v2485_v10  ;;  %v2477_v52 = vsub.f32 %v8402_v48, %v2453_v17 }
 0x693   : > { %v2487_v29 = vmul.f32 1.442695, %v2477_v52 }
 0x694   : > { %v2456_v31 = vpop.xlane.xlu1 %2455 }
 0x695   : > { %7144 = vpow2.f32 %v2487_v29  ;;  %v2478_v44 = vsub.f32 %v8406_v51, %v2456_v31 }
 0x697   : > { %v2489_v22 = vmul.f32 1.442695, %v2478_v44 }
 0x698   : > { %v2459_v50 = vpop.xlane.xlu1 %2458 }
 0x699   : > { %7146 = vpow2.f32 %v2489_v22  ;;  %v2479_v24 = vsub.f32 %v8410_v54, %v2459_v50 }
 0x69b   : > { %v8514_v8 = vpop.eup %7142  ;;  %v2491_v47 = vmul.f32 1.442695, %v2479_v24 }
 0x69c   : > { %v2462_v20 = vpop.xlane.xlu1 %2461  ;;  %v2503_v60 = vsel %vm2447_vm9, %v8514_v8, 0.0 }
 0x69d   : > { %7148 = vpow2.f32 %v2491_v47  ;;  %v2480_v36 = vsub.f32 %v8414_v2, %v2462_v20  ;;  %2504 = vadd.xlane.f32.xlu1 %v2503_v60 }
 0x69f   : > { %v8519_v48 = vpop.eup %7144  ;;  %v2493_v27 = vmul.f32 1.442695, %v2480_v36 }
 0x6a0   : > { %v2465_v51 = vpop.xlane.xlu1 %2464  ;;  %v2506_v9 = vsel %vm2447_vm9, %v8519_v48, 0.0 }
 0x6a1   : > { %7150 = vpow2.f32 %v2493_v27  ;;  %v2481_v54 = vsub.f32 %v8418_v53, %v2465_v51  ;;  %2507 = vadd.xlane.f32.xlu1 %v2506_v9 }
 0x6a3   : > { %v8524_v5 = vpop.eup %7146  ;;  %v2495_v3 = vmul.f32 1.442695, %v2481_v54 }
 0x6a4   : > { %v2468_v41 = vpop.xlane.xlu1 %2467  ;;  %v2509_v16 = vsel %vm2447_vm9, %v8524_v5, 0.0 }
 0x6a5   : > { %7152 = vpow2.f32 %v2495_v3  ;;  %v2482_v2 = vsub.f32 %v8422_v61, %v2468_v41  ;;  %2510 = vadd.xlane.f32.xlu1 %v2509_v16 }
 0x6a7   : > { %v8529_v26 = vpop.eup %7148  ;;  %v2497_v23 = vmul.f32 1.442695, %v2482_v2 }
 0x6a8   : > { %v2471_v32 = vpop.xlane.xlu1 %2470  ;;  %v2512_v39 = vsel %vm2447_vm9, %v8529_v26, 0.0 }
 0x6a9   : > { %7154 = vpow2.f32 %v2497_v23  ;;  %v2483_v53 = vsub.f32 %v8426_v1, %v2471_v32  ;;  %2513 = vadd.xlane.f32.xlu1 %v2512_v39 }
 0x6ab   : > { %v8534_v46 = vpop.eup %7150  ;;  %v2499_v7 = vmul.f32 1.442695, %v2483_v53 }
 0x6ac   : > { %v2475_v18 = vpop.xlane.xlu1 %2474  ;;  %v2515_v56 = vsel %vm2447_vm9, %v8534_v46, 0.0 }
 0x6ad   : > { %7156 = vpow2.f32 %v2499_v7  ;;  %v2484_v61 = vsub.f32 %v8430_v11, %v2475_v18  ;;  %2516 = vadd.xlane.f32.xlu1 %v2515_v56 }
 0x6af   : > { %v8539_v15 = vpop.eup %7152  ;;  %v2501_v30 = vmul.f32 1.442695, %v2484_v61 }
 0x6b0   : > { %v2518_v63 = vsel %vm2447_vm9, %v8539_v15, 0.0 }
 0x6b1   : > { %7158 = vpow2.f32 %v2501_v30  ;;  %2519 = vadd.xlane.f32.xlu1 %v2518_v63 }
 0x6b3   : > { %v8543_v1 = vpop.eup %7154 }
 0x6b4   : > { %v2521_v62 = vsel %vm2447_vm9, %v8543_v1, 0.0 }
 0x6b5   : > { %2522 = vadd.xlane.f32.xlu1 %v2521_v62 }
 0x6b7   : > { %v8547_v6 = vpop.eup %7156 }
 0x6b8   : > { %v2524_v11 = vsel %vm2447_vm9, %v8547_v6, 0.0 }
 0x6b9   : > { %2525 = vadd.xlane.f32.xlu1 %v2524_v11 }
 0x6bb   : > { %v8551_v4 = vpop.eup %7158 }
 0x6bc   : > { %v2527_v38 = vsel %vm2472_vm10, %v8551_v4, 0.0 }
 0x6bd   : > { %2528 = vadd.xlane.f32.xlu1 %v2527_v38 }
 0x71e   : > { %v3028_v14 = vpop.f32.mrb[94].mxu1 }
 0x71f   : > { %v8555_v43 = vmul.f32 0.5, %v3028_v14  ;;  %v6379_v19 = vpop.f32.mrb[95].mxu1 }
 0x721   : > { %v3081_v57 = vsel %vm2447_vm9, %v8555_v43, -inf }
 0x722   : > { %3082 = vmax.xlane.f32.xlu0 %v3081_v57  ;;  %v3033_v58 = vpop.f32.mrb[96].mxu1 }
 0x723   : > { %v8559_v34 = vmul.f32 0.5, %v3033_v58  ;;  %v6382_v25 = vpop.f32.mrb[97].mxu1 }
 0x725   : > { %v3084_v42 = vsel %vm2447_vm9, %v8559_v34, -inf }
 0x726   : > { %3085 = vmax.xlane.f32.xlu0 %v3084_v42  ;;  %v3038_v37 = vpop.f32.mrb[98].mxu1 }
 0x727   : > { %v8563_v10 = vmul.f32 0.5, %v3038_v37  ;;  %v6385_v17 = vpop.f32.mrb[99].mxu1 }
 0x729   : > { %v3087_v52 = vsel %vm2447_vm9, %v8563_v10, -inf }
 0x72a   : > { %v2505_v29 = vpop.xlane.xlu1 %2504  ;;  %3088 = vmax.xlane.f32.xlu0 %v3087_v52  ;;  %v3043_v31 = vpop.f32.mrb[100].mxu1 }
 0x72b   : > { %7160 = vrcp.f32 %v2505_v29  ;;  %v8567_v44 = vmul.f32 0.5, %v3043_v31  ;;  %v6388_v22 = vpop.f32.mrb[101].mxu1 }
 0x72d   : > { %v3090_v50 = vsel %vm2447_vm9, %v8567_v44, -inf }
 0x72e   : > { %v2508_v24 = vpop.xlane.xlu1 %2507  ;;  %3091 = vmax.xlane.f32.xlu0 %v3090_v50  ;;  %v3048_v47 = vpop.f32.mrb[102].mxu1 }
 0x72f   : > { %7162 = vrcp.f32 %v2508_v24  ;;  %v8571_v20 = vmul.f32 0.5, %v3048_v47  ;;  %v6391_v60 = vpop.f32.mrb[103].mxu1 }
 0x731   : > { %v3093_v36 = vsel %vm2447_vm9, %v8571_v20, -inf }
 0x732   : > { %v2511_v27 = vpop.xlane.xlu1 %2510  ;;  %3094 = vmax.xlane.f32.xlu0 %v3093_v36  ;;  %v3053_v51 = vpop.f32.mrb[104].mxu1 }
 0x733   : > { %7164 = vrcp.f32 %v2511_v27  ;;  %v8575_v9 = vmul.f32 0.5, %v3053_v51  ;;  %v6394_v54 = vpop.f32.mrb[105].mxu1 }
 0x735   : > { %v7161_v3 = vpop.eup %7160  ;;  %v3096_v41 = vsel %vm2447_vm9, %v8575_v9, -inf }
 0x736   : > { %v2531_v16 = vmul.f32 %v7161_v3, %v8514_v8  ;;  %v2514_v2 = vpop.xlane.xlu1 %2513  ;;  %3097 = vmax.xlane.f32.xlu0 %v3096_v41  ;;  %v3058_v23 = vpop.f32.mrb[106].mxu1 }
 0x737   : > { %7166 = vrcp.f32 %v2514_v2  ;;  %v8580_v32 = vmul.f32 0.5, %v3058_v23  ;;  %v6397_v39 = vpop.f32.mrb[107].mxu1 }
 0x738   : > { %6468 = vmatmul.mubr.msk.f32.vlgmr.msra.gmra.mrb[112].mxu1 %vm2447_vm9, %v2531_v16 }
 0x739   : > { %v7163_v53 = vpop.eup %7162  ;;  %v3099_v7 = vsel %vm2447_vm9, %v8580_v32, -inf  ;;  %6470 = vmatprep.mubr.msk.f32.mxu1 %vm7375_vm4, %v7376_v13 }
 0x73a   : > { %v2517_v18 = vpop.xlane.xlu1 %2516  ;;  %3100 = vmax.xlane.f32.xlu0 %v3099_v7  ;;  %v3063_v56 = vpop.f32.mrb[108].mxu1  ;;  %v2533_v8 = vmul.f32 %v7163_v53, %v8519_v48 }
 0x73b   : > { %7168 = vrcp.f32 %v2517_v18  ;;  %v8588_v61 = vmul.f32 0.5, %v3063_v56  ;;  %v6400_v30 = vpop.f32.mrb[109].mxu1 }
 0x73c   : > { %6471 = vmatmul.mubr.msk.f32.gmra.mrb[114].mxu1 %vm2447_vm9, %v2533_v8 }
 0x73d   : > { %v7165_v63 = vpop.eup %7164  ;;  %v3102_v62 = vsel %vm2447_vm9, %v8588_v61, -inf  ;;  %6473 = vmatprep.mubr.msk.f32.mxu1 %vm7375_vm4, %v7376_v13 }
 0x73e   : > { %v2520_v11 = vpop.xlane.xlu1 %2519  ;;  %3103 = vmax.xlane.f32.xlu0 %v3102_v62  ;;  %v3068_v38 = vpop.f32.mrb[110].mxu1  ;;  %v2535_v14 = vmul.f32 %v7165_v63, %v8524_v5 }
 0x73f   : > { %7170 = vrcp.f32 %v2520_v11  ;;  %v8596_v48 = vmul.f32 0.5, %v3068_v38  ;;  %v6403_v19 = vpop.f32.mrb[111].mxu1 }
 0x740   : > { %6474 = vmatmul.mubr.msk.f32.gmra.mrb[116].mxu1 %vm2447_vm9, %v2535_v14 }
 0x741   : > { %v7167_v57 = vpop.eup %7166  ;;  %v3105_v58 = vsel %vm2472_vm10, %v8596_v48, -inf  ;;  %6476 = vmatprep.mubr.msk.f32.mxu1 %vm7375_vm4, %v7376_v13 }
 0x742   : > { %v2523_v25 = vpop.xlane.xlu1 %2522  ;;  %3106 = vmax.xlane.f32.xlu0 %v3105_v58  ;;  %v2537_v42 = vmul.f32 %v7167_v57, %v8529_v26 }
 0x743   : > { %7172 = vrcp.f32 %v2523_v25 }
 0x744   : > { %6477 = vmatmul.mubr.msk.f32.gmra.mrb[118].mxu1 %vm2447_vm9, %v2537_v42 }
 0x745   : > { %v7169_v5 = vpop.eup %7168  ;;  %6479 = vmatprep.mubr.msk.f32.mxu1 %vm7375_vm4, %v7376_v13 }
 0x746   : > { %v2526_v37 = vpop.xlane.xlu1 %2525  ;;  %v2539_v17 = vmul.f32 %v7169_v5, %v8534_v46 }
 0x747   : > { %7174 = vrcp.f32 %v2526_v37 }
 0x748   : > { %6480 = vmatmul.mubr.msk.f32.gmra.mrb[120].mxu1 %vm2447_vm9, %v2539_v17 }
 0x749   : > { %v7171_v52 = vpop.eup %7170  ;;  %6482 = vmatprep.mubr.msk.f32.mxu1 %vm7375_vm4, %v7376_v13 }
 0x74a   : > { %v2529_v29 = vpop.xlane.xlu1 %2528  ;;  %v2541_v26 = vmul.f32 %v7171_v52, %v8539_v15 }
 0x74b   : > { %7176 = vrcp.f32 %v2529_v29 }
 0x74c   : > { %6483 = vmatmul.mubr.msk.f32.gmra.mrb[122].mxu1 %vm2447_vm9, %v2541_v26 }
 0x74d   : > { %v7173_v31 = vpop.eup %7172  ;;  %6485 = vmatprep.mubr.msk.f32.mxu1 %vm7375_vm4, %v7376_v13 }
 0x74e   : > { %v2543_v22 = vmul.f32 %v7173_v31, %v8543_v1 }
 0x750   : > { %6486 = vmatmul.mubr.msk.f32.gmra.mrb[124].mxu1 %vm2447_vm9, %v2543_v22 }
 0x751   : > { %v7175_v46 = vpop.eup %7174  ;;  %6488 = vmatprep.mubr.msk.f32.mxu1 %vm7375_vm4, %v7376_v13 }
 0x752   : > { %v2545_v50 = vmul.f32 %v7175_v46, %v8547_v6 }
 0x754   : > { %6489 = vmatmul.mubr.msk.f32.gmra.mrb[126].mxu1 %vm2447_vm9, %v2545_v50 }
 0x755   : > { %v7177_v15 = vpop.eup %7176  ;;  %6491 = vmatprep.mubr.msk.f32.mxu1 %vm7375_vm4, %v7376_v13 }
 0x756   : > { %v2547_v24 = vmul.f32 %v7177_v15, %v8551_v4 }
 0x758   : > { %6492 = vmatmul.mubr.msk.f32.gmra.mrb[128].mxu1 %vm2447_vm9, %v2547_v24 }
 0x759   : > { %6525 = vmatprep.mubr.msk.f32.mxu1 %vm7375_vm4, %v7376_v13 }
 0x7af   : > { %v3083_v1 = vpop.xlane.xlu0 %3082 }
 0x7b0   : > { %v3108_v47 = vsub.f32 %v8555_v43, %v3083_v1 }
 0x7b2   : > { %v3117_v60 = vmul.f32 1.442695, %v3108_v47 }
 0x7b3   : > { %v3086_v36 = vpop.xlane.xlu0 %3085 }
 0x7b4   : > { %7178 = vpow2.f32 %v3117_v60  ;;  %v3109_v6 = vsub.f32 %v8559_v34, %v3086_v36 }
 0x7b6   : > { %v3119_v27 = vmul.f32 1.442695, %v3109_v6 }
 0x7b7   : > { %v3089_v51 = vpop.xlane.xlu0 %3088 }
 0x7b8   : > { %7180 = vpow2.f32 %v3119_v27  ;;  %v3110_v54 = vsub.f32 %v8563_v10, %v3089_v51 }
 0x7ba   : > { %v3121_v3 = vmul.f32 1.442695, %v3110_v54 }
 0x7bb   : > { %v3092_v4 = vpop.xlane.xlu0 %3091 }
 0x7bc   : > { %7182 = vpow2.f32 %v3121_v3  ;;  %v3111_v41 = vsub.f32 %v8567_v44, %v3092_v4 }
 0x7be   : > { %v8631_v16 = vpop.eup %7178  ;;  %v3123_v2 = vmul.f32 1.442695, %v3111_v41 }
 0x7bf   : > { %v3095_v23 = vpop.xlane.xlu0 %3094  ;;  %v3135_v43 = vsel %vm2447_vm9, %v8631_v16, 0.0 }
 0x7c0   : > { %7184 = vpow2.f32 %v3123_v2  ;;  %v3112_v34 = vsub.f32 %v8571_v20, %v3095_v23  ;;  %3136 = vadd.xlane.f32.xlu0 %v3135_v43 }
 0x7c2   : > { %v8636_v39 = vpop.eup %7180  ;;  %v3125_v53 = vmul.f32 1.442695, %v3112_v34 }
 0x7c3   : > { %v3098_v10 = vpop.xlane.xlu0 %3097  ;;  %v3138_v7 = vsel %vm2447_vm9, %v8636_v39, 0.0 }
 0x7c4   : > { %7186 = vpow2.f32 %v3125_v53  ;;  %v3113_v44 = vsub.f32 %v8575_v9, %v3098_v10  ;;  %3139 = vadd.xlane.f32.xlu0 %v3138_v7 }
 0x7c6   : > { %v8641_v18 = vpop.eup %7182  ;;  %v3127_v56 = vmul.f32 1.442695, %v3113_v44 }
 0x7c7   : > { %v3101_v8 = vpop.xlane.xlu0 %3100  ;;  %v3141_v30 = vsel %vm2447_vm9, %v8641_v18, 0.0 }
 0x7c8   : > { %7188 = vpow2.f32 %v3127_v56  ;;  %v3114_v20 = vsub.f32 %v8580_v32, %v3101_v8  ;;  %3142 = vadd.xlane.f32.xlu0 %v3141_v30 }
 0x7ca   : > { %v8646_v63 = vpop.eup %7184  ;;  %v3129_v62 = vmul.f32 1.442695, %v3114_v20 }
 0x7cb   : > { %v3104_v11 = vpop.xlane.xlu0 %3103  ;;  %v3144_v38 = vsel %vm2447_vm9, %v8646_v63, 0.0 }
 0x7cc   : > { %7190 = vpow2.f32 %v3129_v62  ;;  %v3115_v9 = vsub.f32 %v8588_v61, %v3104_v11  ;;  %3145 = vadd.xlane.f32.xlu0 %v3144_v38 }
 0x7ce   : > { %v8651_v14 = vpop.eup %7186  ;;  %v3131_v19 = vmul.f32 1.442695, %v3115_v9 }
 0x7cf   : > { %v3107_v57 = vpop.xlane.xlu0 %3106  ;;  %v3147_v58 = vsel %vm2447_vm9, %v8651_v14, 0.0 }
 0x7d0   : > { %7192 = vpow2.f32 %v3131_v19  ;;  %v3116_v32 = vsub.f32 %v8596_v48, %v3107_v57  ;;  %3148 = vadd.xlane.f32.xlu0 %v3147_v58 }
 0x7d2   : > { %v8656_v25 = vpop.eup %7188  ;;  %v3133_v42 = vmul.f32 1.442695, %v3116_v32 }
 0x7d3   : > { %v3150_v5 = vsel %vm2447_vm9, %v8656_v25, 0.0 }
 0x7d4   : > { %7194 = vpow2.f32 %v3133_v42  ;;  %3151 = vadd.xlane.f32.xlu0 %v3150_v5 }
 0x7d6   : > { %v8660_v61 = vpop.eup %7190 }
 0x7d7   : > { %v3153_v37 = vsel %vm2447_vm9, %v8660_v61, 0.0 }
 0x7d8   : > { %3154 = vadd.xlane.f32.xlu0 %v3153_v37 }
 0x7da   : > { %v8664_v17 = vpop.eup %7192 }
 0x7db   : > { %v3156_v48 = vsel %vm2447_vm9, %v8664_v17, 0.0 }
 0x7dc   : > { %3157 = vadd.xlane.f32.xlu0 %v3156_v48 }
 0x7de   : > { %v8668_v52 = vpop.eup %7194 }
 0x7df   : > { %v3159_v29 = vsel %vm2472_vm10, %v8668_v52, 0.0 }
 0x7e0   : > { %3160 = vadd.xlane.f32.xlu0 %v3159_v29 }
 0x80b   : > { %v8672_v26 = vpop.f32.mrb[112].mxu1 }
 0x80c   : > { %v6469_v31 = vpop.f32.mrb[113].mxu1 }
 0x80f   : > { %v8674_v22 = vpop.f32.mrb[114].mxu1 }
 0x810   : > { %v6472_v46 = vpop.f32.mrb[115].mxu1 }
 0x813   : > { %v8676_v50 = vpop.f32.mrb[116].mxu1 }
 0x814   : > { %v6475_v15 = vpop.f32.mrb[117].mxu1 }
 0x817   : > { %v8678_v24 = vpop.f32.mrb[118].mxu1 }
 0x818   : > { %v6478_v1 = vpop.f32.mrb[119].mxu1 }
 0x81b   : > { %v8680_v47 = vpop.f32.mrb[120].mxu1 }
 0x81c   : > { %v6481_v60 = vpop.f32.mrb[121].mxu1 }
 0x81f   : > { %v8682_v36 = vpop.f32.mrb[122].mxu1 }
 0x820   : > { %v6484_v6 = vpop.f32.mrb[123].mxu1 }
 0x823   : > { %v8684_v27 = vpop.f32.mrb[124].mxu1 }
 0x824   : > { %v6487_v51 = vpop.f32.mrb[125].mxu1 }
 0x827   : > { %v8686_v54 = vpop.f32.mrb[126].mxu1 }
 0x828   : > { %v6490_v3 = vpop.f32.mrb[127].mxu1 }
 0x82b   : > { %v8688_v4 = vpop.f32.mrb[128].mxu1 }
 0x82c   : > { %v6493_v41 = vpop.f32.mrb[129].mxu1 }
 0x84d   : > { %v3137_v2 = vpop.xlane.xlu0 %3136 }
 0x84e   : > { %7196 = vrcp.f32 %v3137_v2 }
 0x851   : > { %v3140_v23 = vpop.xlane.xlu0 %3139 }
 0x852   : > { %7198 = vrcp.f32 %v3140_v23 }
 0x855   : > { %v3143_v43 = vpop.xlane.xlu0 %3142 }
 0x856   : > { %7200 = vrcp.f32 %v3143_v43 }
 0x858   : > { %v7197_v34 = vpop.eup %7196 }
 0x859   : > { %v3163_v53 = vmul.f32 %v7197_v34, %v8631_v16  ;;  %v3146_v10 = vpop.xlane.xlu0 %3145 }
 0x85a   : > { %7202 = vrcp.f32 %v3146_v10 }
 0x85b   : > { %6423 = vmatmul.mubr.msk.f32.vlgmr.msra.gmra.mrb[106].mxu0 %vm2447_vm9, %v3163_v53 }
 0x85c   : > { %v7199_v7 = vpop.eup %7198  ;;  %6425 = vmatprep.mubr.msk.f32.mxu0 %vm7375_vm4, %v7376_v13 }
 0x85d   : > { %v3149_v44 = vpop.xlane.xlu0 %3148  ;;  %v3165_v56 = vmul.f32 %v7199_v7, %v8636_v39 }
 0x85e   : > { %7204 = vrcp.f32 %v3149_v44 }
 0x85f   : > { %6426 = vmatmul.mubr.msk.f32.gmra.mrb[108].mxu0 %vm2447_vm9, %v3165_v56 }
 0x860   : > { %v7201_v8 = vpop.eup %7200  ;;  %6428 = vmatprep.mubr.msk.f32.mxu0 %vm7375_vm4, %v7376_v13 }
 0x861   : > { %v3152_v30 = vpop.xlane.xlu0 %3151  ;;  %v3167_v16 = vmul.f32 %v7201_v8, %v8641_v18 }
 0x862   : > { %7206 = vrcp.f32 %v3152_v30 }
 0x863   : > { %6429 = vmatmul.mubr.msk.f32.gmra.mrb[110].mxu0 %vm2447_vm9, %v3167_v16 }
 0x864   : > { %v7203_v20 = vpop.eup %7202  ;;  %6431 = vmatprep.mubr.msk.f32.mxu0 %vm7375_vm4, %v7376_v13 }
 0x865   : > { %v3155_v62 = vpop.xlane.xlu0 %3154  ;;  %v3169_v39 = vmul.f32 %v7203_v20, %v8646_v63 }
 0x866   : > { %7208 = vrcp.f32 %v3155_v62 }
 0x867   : > { %6432 = vmatmul.mubr.msk.f32.gmra.mrb[112].mxu0 %vm2447_vm9, %v3169_v39 }
 0x868   : > { %v7205_v11 = vpop.eup %7204  ;;  %6434 = vmatprep.mubr.msk.f32.mxu0 %vm7375_vm4, %v7376_v13 }
 0x869   : > { %v3158_v38 = vpop.xlane.xlu0 %3157  ;;  %v3171_v18 = vmul.f32 %v7205_v11, %v8651_v14 }
 0x86a   : > { %7210 = vrcp.f32 %v3158_v38 }
 0x86b   : > { %6435 = vmatmul.mubr.msk.f32.gmra.mrb[114].mxu0 %vm2447_vm9, %v3171_v18 }
 0x86c   : > { %v7207_v9 = vpop.eup %7206  ;;  %6437 = vmatprep.mubr.msk.f32.mxu0 %vm7375_vm4, %v7376_v13 }
 0x86d   : > { %v3161_v19 = vpop.xlane.xlu0 %3160  ;;  %v3173_v63 = vmul.f32 %v7207_v9, %v8656_v25 }
 0x86e   : > { %7212 = vrcp.f32 %v3161_v19 }
 0x86f   : > { %6438 = vmatmul.mubr.msk.f32.gmra.mrb[116].mxu0 %vm2447_vm9, %v3173_v63 }
 0x870   : > { %v7209_v57 = vpop.eup %7208  ;;  %6440 = vmatprep.mubr.msk.f32.mxu0 %vm7375_vm4, %v7376_v13 }
 0x871   : > { %v3175_v58 = vmul.f32 %v7209_v57, %v8660_v61 }
 0x873   : > { %6441 = vmatmul.mubr.msk.f32.gmra.mrb[118].mxu0 %vm2447_vm9, %v3175_v58 }
 0x874   : > { %v7211_v14 = vpop.eup %7210  ;;  %6443 = vmatprep.mubr.msk.f32.mxu0 %vm7375_vm4, %v7376_v13 }
 0x875   : > { %v3177_v32 = vmul.f32 %v7211_v14, %v8664_v17 }
 0x877   : > { %6444 = vmatmul.mubr.msk.f32.gmra.mrb[120].mxu0 %vm2447_vm9, %v3177_v32 }
 0x878   : > { %v7213_v25 = vpop.eup %7212  ;;  %6446 = vmatprep.mubr.msk.f32.mxu0 %vm7375_vm4, %v7376_v13 }
 0x879   : > { %v3179_v42 = vmul.f32 %v7213_v25, %v8668_v52 }
 0x87b   : > { %6447 = vmatmul.mubr.msk.f32.gmra.mrb[122].mxu0 %vm2447_vm9, %v3179_v42 }
 0x87c   : > { %6496 = vmatprep.mubr.msk.f32.mxu0 %vm7375_vm4, %v7376_v13 }
 0x92e   : > { %v3277_v5 = vpop.f32.mrb[106].mxu0 }
 0x92f   : > { %v3418_v61 = vadd.f32 %v8672_v26, %v3277_v5  ;;  %v6424_v37 = vpop.f32.mrb[107].mxu0 }
 0x931   : > { %v8728_v48 = vadd.f32 %v3418_v61, %v7846_v21 }
 0x932   : > { %v3282_v17 = vpop.f32.mrb[108].mxu0 }
 0x933   : > { %v3423_v29 = vadd.f32 %v8674_v22, %v3282_v17  ;;  %v6427_v31 = vpop.f32.mrb[109].mxu0  ;;  %v3470_v46 = vsel %vm1737_vm5, %v8728_v48, 0.0 }
 0x934   : > { %3471 = vadd.xlane.f32.xlu1 %v3470_v46 }
 0x935   : > { %v3462_v52 = vadd.f32 %v3423_v29, %v7848_v28 }
 0x936   : > { %v3287_v15 = vpop.f32.mrb[110].mxu0 }
 0x937   : > { %v3428_v1 = vadd.f32 %v8676_v50, %v3287_v15  ;;  %v6430_v60 = vpop.f32.mrb[111].mxu0  ;;  %v3473_v26 = vsel %vm1737_vm5, %v3462_v52, 0.0 }
 0x938   : > { %3474 = vadd.xlane.f32.xlu0 %v3473_v26 }
 0x939   : > { %v3463_v21 = vadd.f32 %v3428_v1, %v7857_v35 }
 0x93a   : > { %v3292_v6 = vpop.f32.mrb[112].mxu0 }
 0x93b   : > { %v3433_v51 = vadd.f32 %v8678_v24, %v3292_v6  ;;  %v6433_v22 = vpop.f32.mrb[113].mxu0  ;;  %v3476_v3 = vsel %vm1737_vm5, %v3463_v21, 0.0 }
 0x93c   : > { %3477 = vadd.xlane.f32.xlu1 %v3476_v3 }
 0x93d   : > { %v3464_v41 = vadd.f32 %v3433_v51, %v7864_v40 }
 0x93e   : > { %v3297_v2 = vpop.f32.mrb[114].mxu0 }
 0x93f   : > { %v3438_v28 = vadd.f32 %v8680_v47, %v3297_v2  ;;  %v6436_v23 = vpop.f32.mrb[115].mxu0  ;;  %v3479_v50 = vsel %vm1737_vm5, %v3464_v41, 0.0 }
 0x940   : > { %3480 = vadd.xlane.f32.xlu0 %v3479_v50 }
 0x941   : > { %v3465_v43 = vadd.f32 %v3438_v28, %v7871_v45 }
 0x942   : > { %v3302_v34 = vpop.f32.mrb[116].mxu0 }
 0x943   : > { %v3443_v35 = vadd.f32 %v8682_v36, %v3302_v34  ;;  %v6439_v53 = vpop.f32.mrb[117].mxu0  ;;  %v3482_v24 = vsel %vm1737_vm5, %v3465_v43, 0.0 }
 0x944   : > { %3483 = vadd.xlane.f32.xlu1 %v3482_v24 }
 0x945   : > { %v3466_v10 = vadd.f32 %v3443_v35, %v7878_v49 }
 0x946   : > { %v3307_v7 = vpop.f32.mrb[118].mxu0 }
 0x947   : > { %v3448_v40 = vadd.f32 %v8684_v27, %v3307_v7  ;;  %v6442_v44 = vpop.f32.mrb[119].mxu0  ;;  %v3485_v47 = vsel %vm1737_vm5, %v3466_v10, 0.0 }
 0x948   : > { %3486 = vadd.xlane.f32.xlu0 %v3485_v47  ;;  %v5577_v44 = vld [vmem:[%s9581_s9 + $0x30] sm:$0xff] }
 0x949   : > { %v3467_v56 = vadd.f32 %v3448_v40, %v7885_v55  ;;  %6495 = vmatpush3.msra.mxu0 %v5577_v44 }
 0x94a   : > { %v3312_v8 = vpop.f32.mrb[120].mxu0  ;;  %6552 = vmatprep.subr.mxu0 %v7376_v13 }
 0x94b   : > { %v3453_v45 = vadd.f32 %v8686_v54, %v3312_v8  ;;  %v6445_v30 = vpop.f32.mrb[121].mxu0  ;;  %v3488_v36 = vsel %vm1737_vm5, %v3467_v56, 0.0  ;;  %v5589_v54 = vld [vmem:[%s9581_s9 + $0x40] sm:$0xff] }
 0x94c   : > { %3489 = vadd.xlane.f32.xlu1 %v3488_v36  ;;  %6524 = vmatpush3.msra.mxu1 %v5589_v54 }
 0x94d   : > { %v3468_v16 = vadd.f32 %v3453_v45, %v7892_v59  ;;  %6915 = vmatprep.subr.bf16.mxu1 %v7374_v12 }
 0x94e   : > { %v3317_v20 = vpop.f32.mrb[122].mxu0 }
 0x94f   : > { %v3458_v49 = vadd.f32 %v8688_v4, %v3317_v20  ;;  %v6448_v62 = vpop.f32.mrb[123].mxu0  ;;  %v3491_v27 = vsel %vm1737_vm5, %v3468_v16, 0.0 }
 0x950   : > { %3492 = vadd.xlane.f32.xlu0 %v3491_v27 }
 0x951   : > { %v3469_v39 = vadd.f32 %v3458_v49, %v7899_v0 }
 0x953   : > { %v3494_v55 = vsel %vm1762_vm6, %v3469_v39, 0.0 }
 0x954   : > { %3495 = vadd.xlane.f32.xlu1 %v3494_v55  ;;  %v8813_v55 = vld [vmem:[%s9579_s7 + $0x1] ss:$0 sm:$0xff] }
 0x9c1   : > { %v3472_v59 = vpop.xlane.xlu1 %3471 }
 0x9c2   : > { %v3497_v11 = vmul.f32 0.125, %v3472_v59 }
 0x9c4   : > { %v8761_v4 = vsub.f32 %v8728_v48, %v3497_v11 }
 0x9c5   : > { %v3475_v38 = vpop.xlane.xlu0 %3474 }
 0x9c6   : > { %v3498_v18 = vmul.f32 0.125, %v3475_v38  ;;  %v3515_v0 = vmul.f32 %v8761_v4, %v8761_v4  ;;  %v8819_v38 = vld [vmem:[%s9580_s8 + $0x1] ss:$0 sm:$0xff] }
 0x9c8   : > { %v8765_v9 = vsub.f32 %v3462_v52, %v3498_v18  ;;  %v3524_v19 = vsel %vm1737_vm5, %v3515_v0, 0.0 }
 0x9c9   : > { %v3478_v63 = vpop.xlane.xlu1 %3477  ;;  %3525 = vadd.xlane.f32.xlu0 %v3524_v19 }
 0x9ca   : > { %v3499_v57 = vmul.f32 0.125, %v3478_v63  ;;  %v3516_v58 = vmul.f32 %v8765_v9, %v8765_v9 }
 0x9cc   : > { %v8770_v14 = vsub.f32 %v3463_v21, %v3499_v57  ;;  %v3527_v32 = vsel %vm1737_vm5, %v3516_v58, 0.0 }
 0x9cd   : > { %v3481_v25 = vpop.xlane.xlu0 %3480  ;;  %3528 = vadd.xlane.f32.xlu1 %v3527_v32 }
 0x9ce   : > { %v3500_v42 = vmul.f32 0.125, %v3481_v25  ;;  %v3517_v5 = vmul.f32 %v8770_v14, %v8770_v14  ;;  %v5601_v25 = vld [vmem:[%s9581_s9 + $0x50] sm:$0xff] }
 0x9d0   : > { %v8775_v61 = vsub.f32 %v3464_v41, %v3500_v42  ;;  %v3530_v37 = vsel %vm1737_vm5, %v3517_v5, 0.0 }
 0x9d1   : > { %v3484_v17 = vpop.xlane.xlu1 %3483  ;;  %3531 = vadd.xlane.f32.xlu0 %v3530_v37 }
 0x9d2   : > { %v3501_v29 = vmul.f32 0.125, %v3484_v17  ;;  %v3518_v31 = vmul.f32 %v8775_v61, %v8775_v61 }
 0x9d4   : > { %v8780_v46 = vsub.f32 %v3465_v43, %v3501_v29  ;;  %v3533_v52 = vsel %vm1737_vm5, %v3518_v31, 0.0 }
 0x9d5   : > { %v3487_v15 = vpop.xlane.xlu0 %3486  ;;  %3534 = vadd.xlane.f32.xlu1 %v3533_v52 }
 0x9d6   : > { %v3502_v1 = vmul.f32 0.125, %v3487_v15  ;;  %v3519_v60 = vmul.f32 %v8780_v46, %v8780_v46 }
 0x9d8   : > { %v8785_v26 = vsub.f32 %v3466_v10, %v3502_v1  ;;  %v3536_v21 = vsel %vm1737_vm5, %v3519_v60, 0.0 }
 0x9d9   : > { %v3490_v6 = vpop.xlane.xlu1 %3489  ;;  %3537 = vadd.xlane.f32.xlu0 %v3536_v21 }
 0x9da   : > { %v3503_v51 = vmul.f32 0.125, %v3490_v6  ;;  %v3520_v22 = vmul.f32 %v8785_v26, %v8785_v26 }
 0x9dc   : > { %v8790_v3 = vsub.f32 %v3467_v56, %v3503_v51  ;;  %v3539_v41 = vsel %vm1737_vm5, %v3520_v22, 0.0 }
 0x9dd   : > { %v3493_v2 = vpop.xlane.xlu0 %3492  ;;  %3540 = vadd.xlane.f32.xlu1 %v3539_v41 }
 0x9de   : > { %v3504_v28 = vmul.f32 0.125, %v3493_v2  ;;  %v3521_v23 = vmul.f32 %v8790_v3, %v8790_v3 }
 0x9e0   : > { %v8795_v50 = vsub.f32 %v3468_v16, %v3504_v28  ;;  %v3542_v43 = vsel %vm1737_vm5, %v3521_v23, 0.0 }
 0x9e1   : > { %3543 = vadd.xlane.f32.xlu0 %v3542_v43  ;;  %v3496_v34 = vpop.xlane.xlu1 %3495 }
 0x9e2   : > { %v3505_v35 = vmul.f32 0.125, %v3496_v34  ;;  %v3522_v53 = vmul.f32 %v8795_v50, %v8795_v50 }
 0x9e4   : > { %v8800_v24 = vsub.f32 %v3469_v39, %v3505_v35  ;;  %v3545_v10 = vsel %vm1737_vm5, %v3522_v53, 0.0 }
 0x9e5   : > { %3546 = vadd.xlane.f32.xlu1 %v3545_v10 }
 0x9e6   : > { %v3523_v7 = vmul.f32 %v8800_v24, %v8800_v24 }
 0x9e8   : > { %v3548_v40 = vsel %vm1762_vm6, %v3523_v7, 0.0 }
 0x9e9   : > { %3549 = vadd.xlane.f32.xlu0 %v3548_v40 }
 0xa56   : > { %v3526_v47 = vpop.xlane.xlu0 %3525 }
 0xa57   : > { %v3551_v56 = vmul.f32 0.125, %v3526_v47 }
 0xa59   : > { %v3560_v8 = vadd.f32 1e-05, %v3551_v56 }
 0xa5a   : > { %v3529_v45 = vpop.xlane.xlu1 %3528 }
 0xa5b   : > { %7214 = vrsqrt.f32 %v3560_v8  ;;  %v3552_v30 = vmul.f32 0.125, %v3529_v45 }
 0xa5d   : > { %v3561_v36 = vadd.f32 1e-05, %v3552_v30 }
 0xa5e   : > { %v3532_v16 = vpop.xlane.xlu0 %3531 }
 0xa5f   : > { %7216 = vrsqrt.f32 %v3561_v36  ;;  %v3553_v20 = vmul.f32 0.125, %v3532_v16 }
 0xa61   : > { %v3562_v49 = vadd.f32 1e-05, %v3553_v20  ;;  %v5655_v20 = vld [vmem:[%s9581_s9 + $0x58] sm:$0xff] }
 0xa62   : > { %v3535_v62 = vpop.xlane.xlu1 %3534 }
 0xa63   : > { %7218 = vrsqrt.f32 %v3562_v49  ;;  %v3554_v27 = vmul.f32 0.125, %v3535_v62 }
 0xa65   : > { %v7215_v39 = vpop.eup %7214  ;;  %v3563_v54 = vadd.f32 1e-05, %v3554_v27 }
 0xa66   : > { %v3578_v59 = vmul.f32 %v7215_v39, %v8761_v4  ;;  %v3538_v11 = vpop.xlane.xlu0 %3537 }
 0xa67   : > { %7220 = vrsqrt.f32 %v3563_v54  ;;  %v3555_v18 = vmul.f32 0.125, %v3538_v11 }
 0xa68   : > { %v3595_v0 = vmul.f32 %v8813_v55, %v3578_v59 }
 0xa69   : > { %v7217_v19 = vpop.eup %7216  ;;  %v3564_v63 = vadd.f32 1e-05, %v3555_v18 }
 0xa6a   : > { %v8823_v57 = vadd.f32 %v8819_v38, %v3595_v0  ;;  %v3579_v58 = vmul.f32 %v7217_v19, %v8765_v9  ;;  %v3541_v32 = vpop.xlane.xlu1 %3540 }
 0xa6b   : > { %7222 = vrsqrt.f32 %v3564_v63  ;;  %v3556_v4 = vmul.f32 0.125, %v3541_v32 }
 0xa6c   : > { %v3596_v42 = vmul.f32 %v8813_v55, %v3579_v58  ;;  %6497 = vmatmul.mubr.msk.f32.vlgmr.msra.gmra.mrb[124].mxu0 %vm1737_vm5, %v8823_v57  ;;  %6526 = vmatmul.mubr.msk.f32.vlgmr.msra.gmra.mrb[130].mxu1 %vm1737_vm5, %v8823_v57 }
 0xa6d   : > { %v7219_v5 = vpop.eup %7218  ;;  %v3565_v37 = vadd.f32 1e-05, %v3556_v4  ;;  %6499 = vmatprep.mubr.msk.f32.mxu0 %vm7375_vm4, %v7376_v13  ;;  %6528 = vmatprep.mubr.msk.f32.mxu1 %vm7375_vm4, %v7376_v13 }
 0xa6e   : > { %v8839_v9 = vadd.f32 %v8819_v38, %v3596_v42  ;;  %v3580_v17 = vmul.f32 %v7219_v5, %v8770_v14  ;;  %v3544_v29 = vpop.xlane.xlu0 %3543  ;;  %6553 = vmatpush3.msra.mxu0 %v5601_v25 }
 0xa6f   : > { %7224 = vrsqrt.f32 %v3565_v37  ;;  %v3557_v31 = vmul.f32 0.125, %v3544_v29  ;;  %6626 = vmatprep.subr.mxu0 %v7376_v13 }
 0xa70   : > { %v3597_v52 = vmul.f32 %v8813_v55, %v3580_v17  ;;  %6500 = vmatmul.mubr.msk.f32.gmra.mrb[126].mxu0 %vm1737_vm5, %v8839_v9  ;;  %6529 = vmatmul.mubr.msk.f32.gmra.mrb[132].mxu1 %vm1737_vm5, %v8839_v9 }
 0xa71   : > { %v7221_v15 = vpop.eup %7220  ;;  %v3566_v1 = vadd.f32 1e-05, %v3557_v31  ;;  %6502 = vmatprep.mubr.msk.f32.mxu0 %vm7375_vm4, %v7376_v13  ;;  %6531 = vmatprep.mubr.msk.f32.mxu1 %vm7375_vm4, %v7376_v13 }
 0xa72   : > { %v8853_v14 = vadd.f32 %v8819_v38, %v3597_v52  ;;  %v3581_v60 = vmul.f32 %v7221_v15, %v8775_v61  ;;  %v3547_v21 = vpop.xlane.xlu1 %3546 }
 0xa73   : > { %7226 = vrsqrt.f32 %v3566_v1  ;;  %v3558_v6 = vmul.f32 0.125, %v3547_v21 }
 0xa74   : > { %v3598_v51 = vmul.f32 %v8813_v55, %v3581_v60  ;;  %6503 = vmatmul.mubr.msk.f32.gmra.mrb[128].mxu0 %vm1737_vm5, %v8853_v14  ;;  %6532 = vmatmul.mubr.msk.f32.gmra.mrb[134].mxu1 %vm1737_vm5, %v8853_v14 }
 0xa75   : > { %v7223_v22 = vpop.eup %7222  ;;  %v3567_v41 = vadd.f32 1e-05, %v3558_v6  ;;  %6505 = vmatprep.mubr.msk.f32.mxu0 %vm7375_vm4, %v7376_v13  ;;  %6534 = vmatprep.mubr.msk.f32.mxu1 %vm7375_vm4, %v7376_v13 }
 0xa76   : > { %v8866_v61 = vadd.f32 %v8819_v38, %v3598_v51  ;;  %v3582_v2 = vmul.f32 %v7223_v22, %v8780_v46  ;;  %v3550_v28 = vpop.xlane.xlu0 %3549 }
 0xa77   : > { %7228 = vrsqrt.f32 %v3567_v41  ;;  %v3559_v23 = vmul.f32 0.125, %v3550_v28 }
 0xa78   : > { %v3599_v43 = vmul.f32 %v8813_v55, %v3582_v2  ;;  %6506 = vmatmul.mubr.msk.f32.gmra.mrb[130].mxu0 %vm1737_vm5, %v8866_v61  ;;  %6535 = vmatmul.mubr.msk.f32.gmra.mrb[136].mxu1 %vm1737_vm5, %v8866_v61 }
 0xa79   : > { %v7225_v34 = vpop.eup %7224  ;;  %v3568_v35 = vadd.f32 1e-05, %v3559_v23  ;;  %6508 = vmatprep.mubr.msk.f32.mxu0 %vm7375_vm4, %v7376_v13  ;;  %6537 = vmatprep.mubr.msk.f32.mxu1 %vm7375_vm4, %v7376_v13 }
 0xa7a   : > { %v8879_v46 = vadd.f32 %v8819_v38, %v3599_v43  ;;  %v3583_v53 = vmul.f32 %v7225_v34, %v8785_v26 }
 0xa7b   : > { %7230 = vrsqrt.f32 %v3568_v35 }
 0xa7c   : > { %v3600_v10 = vmul.f32 %v8813_v55, %v3583_v53  ;;  %6509 = vmatmul.mubr.msk.f32.gmra.mrb[132].mxu0 %vm1737_vm5, %v8879_v46  ;;  %6538 = vmatmul.mubr.msk.f32.gmra.mrb[138].mxu1 %vm1737_vm5, %v8879_v46 }
 0xa7d   : > { %v7227_v7 = vpop.eup %7226  ;;  %6511 = vmatprep.mubr.msk.f32.mxu0 %vm7375_vm4, %v7376_v13  ;;  %6540 = vmatprep.mubr.msk.f32.mxu1 %vm7375_vm4, %v7376_v13 }
 0xa7e   : > { %v8892_v40 = vadd.f32 %v8819_v38, %v3600_v10  ;;  %v3584_v26 = vmul.f32 %v7227_v7, %v8790_v3 }
 0xa80   : > { %v3601_v44 = vmul.f32 %v8813_v55, %v3584_v26  ;;  %6512 = vmatmul.mubr.msk.f32.gmra.mrb[134].mxu0 %vm1737_vm5, %v8892_v40  ;;  %6541 = vmatmul.mubr.msk.f32.gmra.mrb[140].mxu1 %vm1737_vm5, %v8892_v40 }
 0xa81   : > { %v7229_v47 = vpop.eup %7228  ;;  %6514 = vmatprep.mubr.msk.f32.mxu0 %vm7375_vm4, %v7376_v13  ;;  %6543 = vmatprep.mubr.msk.f32.mxu1 %vm7375_vm4, %v7376_v13 }
 0xa82   : > { %v8905_v56 = vadd.f32 %v8819_v38, %v3601_v44  ;;  %v3585_v3 = vmul.f32 %v7229_v47, %v8795_v50 }
 0xa84   : > { %v3602_v8 = vmul.f32 %v8813_v55, %v3585_v3  ;;  %6515 = vmatmul.mubr.msk.f32.gmra.mrb[136].mxu0 %vm1737_vm5, %v8905_v56  ;;  %6544 = vmatmul.mubr.msk.f32.gmra.mrb[142].mxu1 %vm1737_vm5, %v8905_v56 }
 0xa85   : > { %v7231_v45 = vpop.eup %7230  ;;  %6517 = vmatprep.mubr.msk.f32.mxu0 %vm7375_vm4, %v7376_v13  ;;  %6546 = vmatprep.mubr.msk.f32.mxu1 %vm7375_vm4, %v7376_v13 }
 0xa86   : > { %v8918_v30 = vadd.f32 %v8819_v38, %v3602_v8  ;;  %v3586_v50 = vmul.f32 %v7231_v45, %v8800_v24  ;;  %v5631_v24 = vld [vmem:[%s9581_s9 + $0x38] sm:$0xff] }
 0xa88   : > { %v3603_v36 = vmul.f32 %v8813_v55, %v3586_v50  ;;  %6518 = vmatmul.mubr.msk.f32.gmra.mrb[138].mxu0 %vm1737_vm5, %v8918_v30  ;;  %6547 = vmatmul.mubr.msk.f32.gmra.mrb[144].mxu1 %vm1737_vm5, %v8918_v30  ;;  %v5591_v55 = vld [vmem:[%s9582_s10 + $0x8] ss:$0 sm:$0xff] }
 0xa89   : > { %6520 = vmatprep.mubr.msk.f32.mxu0 %vm7375_vm4, %v7376_v13  ;;  %6549 = vmatprep.mubr.msk.f32.mxu1 %vm7375_vm4, %v7376_v13 }
 0xa8a   : > { %v8931_v16 = vadd.f32 %v8819_v38, %v3603_v36 }
 0xa8c   : > { %6521 = vmatmul.mubr.msk.f32.gmra.mrb[140].mxu0 %vm1737_vm5, %v8931_v16  ;;  %6550 = vmatmul.mubr.msk.f32.gmra.mrb[146].mxu1 %vm1737_vm5, %v8931_v16 }
 0xa8d   : > { %6554 = vmatprep.mubr.msk.f32.mxu0 %vm7375_vm4, %v7376_v13  ;;  %6599 = vmatprep.mubr.msk.f32.mxu1 %vm7375_vm4, %v7376_v13 }
 0xa90   : > { %6555 = vmatmul.mubr.msk.f32.vlgmr.msra.gmra.mrb[142].mxu0 %vm1737_vm5, %v8823_v57 }
 0xa91   : > { %6557 = vmatprep.mubr.msk.f32.mxu0 %vm7375_vm4, %v7376_v13  ;;  %6627 = vmatpush3.msra.mxu0 %v5631_v24 }
 0xa92   : > { %6684 = vmatprep.subr.mxu0 %v7376_v13 }
 0xa94   : > { %6558 = vmatmul.mubr.msk.f32.gmra.mrb[144].mxu0 %vm1737_vm5, %v8839_v9 }
 0xa95   : > { %6560 = vmatprep.mubr.msk.f32.mxu0 %vm7375_vm4, %v7376_v13 }
 0xa98   : > { %6561 = vmatmul.mubr.msk.f32.gmra.mrb[146].mxu0 %vm1737_vm5, %v8853_v14 }
 0xa99   : > { %6563 = vmatprep.mubr.msk.f32.mxu0 %vm7375_vm4, %v7376_v13 }
 0xa9c   : > { %6564 = vmatmul.mubr.msk.f32.gmra.mrb[148].mxu0 %vm1737_vm5, %v8866_v61 }
 0xa9d   : > { %6566 = vmatprep.mubr.msk.f32.mxu0 %vm7375_vm4, %v7376_v13 }
 0xaa0   : > { %6567 = vmatmul.mubr.msk.f32.gmra.mrb[150].mxu0 %vm1737_vm5, %v8879_v46 }
 0xaa1   : > { %6569 = vmatprep.mubr.msk.f32.mxu0 %vm7375_vm4, %v7376_v13 }
 0xaa4   : > { %6570 = vmatmul.mubr.msk.f32.gmra.mrb[152].mxu0 %vm1737_vm5, %v8892_v40 }
 0xaa5   : > { %6572 = vmatprep.mubr.msk.f32.mxu0 %vm7375_vm4, %v7376_v13 }
 0xaa8   : > { %6573 = vmatmul.mubr.msk.f32.gmra.mrb[154].mxu0 %vm1737_vm5, %v8905_v56 }
 0xaa9   : > { %6575 = vmatprep.mubr.msk.f32.mxu0 %vm7375_vm4, %v7376_v13 }
 0xaac   : > { %6576 = vmatmul.mubr.msk.f32.gmra.mrb[156].mxu0 %vm1737_vm5, %v8918_v30 }
 0xaad   : > { %6578 = vmatprep.mubr.msk.f32.mxu0 %vm7375_vm4, %v7376_v13 }
 0xab0   : > { %6579 = vmatmul.mubr.msk.f32.gmra.mrb[158].mxu0 %vm1737_vm5, %v8931_v16 }
 0xab1   : > { %6628 = vmatprep.mubr.msk.f32.mxu0 %vm7375_vm4, %v7376_v13 }
 0xab4   : > { %6629 = vmatmul.mubr.msk.f32.vlgmr.msra.gmra.mrb[160].mxu0 %vm1737_vm5, %v8823_v57 }
 0xab5   : > { %6631 = vmatprep.mubr.msk.f32.mxu0 %vm7375_vm4, %v7376_v13  ;;  %6685 = vmatpush3.msra.mxu0 %v5655_v20 }
 0xab6   : > { %6947 = vmatprep.subr.bf16.mxu0 %v7374_v12 }
 0xab8   : > { %6632 = vmatmul.mubr.msk.f32.gmra.mrb[162].mxu0 %vm1737_vm5, %v8839_v9 }
 0xab9   : > { %6634 = vmatprep.mubr.msk.f32.mxu0 %vm7375_vm4, %v7376_v13 }
 0xabc   : > { %6635 = vmatmul.mubr.msk.f32.gmra.mrb[164].mxu0 %vm1737_vm5, %v8853_v14 }
 0xabd   : > { %6637 = vmatprep.mubr.msk.f32.mxu0 %vm7375_vm4, %v7376_v13 }
 0xac0   : > { %6638 = vmatmul.mubr.msk.f32.gmra.mrb[166].mxu0 %vm1737_vm5, %v8866_v61 }
 0xac1   : > { %6640 = vmatprep.mubr.msk.f32.mxu0 %vm7375_vm4, %v7376_v13 }
 0xac4   : > { %6641 = vmatmul.mubr.msk.f32.gmra.mrb[168].mxu0 %vm1737_vm5, %v8879_v46 }
 0xac5   : > { %6643 = vmatprep.mubr.msk.f32.mxu0 %vm7375_vm4, %v7376_v13 }
 0xac8   : > { %6644 = vmatmul.mubr.msk.f32.gmra.mrb[170].mxu0 %vm1737_vm5, %v8892_v40 }
 0xac9   : > { %6646 = vmatprep.mubr.msk.f32.mxu0 %vm7375_vm4, %v7376_v13 }
 0xacc   : > { %6647 = vmatmul.mubr.msk.f32.gmra.mrb[172].mxu0 %vm1737_vm5, %v8905_v56 }
 0xacd   : > { %6649 = vmatprep.mubr.msk.f32.mxu0 %vm7375_vm4, %v7376_v13 }
 0xad0   : > { %6650 = vmatmul.mubr.msk.f32.gmra.mrb[174].mxu0 %vm1737_vm5, %v8918_v30 }
 0xad1   : > { %6652 = vmatprep.mubr.msk.f32.mxu0 %vm7375_vm4, %v7376_v13 }
 0xad4   : > { %6653 = vmatmul.mubr.msk.f32.gmra.mrb[176].mxu0 %vm1737_vm5, %v8931_v16 }
 0xad5   : > { %6686 = vmatprep.mubr.msk.f32.mxu0 %vm7375_vm4, %v7376_v13 }
 0xad8   : > { %6687 = vmatmul.mubr.msk.f32.vlgmr.msra.gmra.mrb[178].mxu0 %vm1737_vm5, %v8823_v57 }
 0xad9   : > { %6689 = vmatprep.mubr.msk.f32.mxu0 %vm7375_vm4, %v7376_v13 }
 0xadc   : > { %6690 = vmatmul.mubr.msk.f32.gmra.mrb[180].mxu0 %vm1737_vm5, %v8839_v9 }
 0xadd   : > { %6692 = vmatprep.mubr.msk.f32.mxu0 %vm7375_vm4, %v7376_v13 }
 0xae0   : > { %6693 = vmatmul.mubr.msk.f32.gmra.mrb[182].mxu0 %vm1737_vm5, %v8853_v14 }
 0xae1   : > { %6695 = vmatprep.mubr.msk.f32.mxu0 %vm7375_vm4, %v7376_v13 }
 0xae4   : > { %6696 = vmatmul.mubr.msk.f32.gmra.mrb[184].mxu0 %vm1737_vm5, %v8866_v61 }
 0xae5   : > { %6698 = vmatprep.mubr.msk.f32.mxu0 %vm7375_vm4, %v7376_v13 }
 0xae8   : > { %6699 = vmatmul.mubr.msk.f32.gmra.mrb[186].mxu0 %vm1737_vm5, %v8879_v46 }
 0xae9   : > { %6701 = vmatprep.mubr.msk.f32.mxu0 %vm7375_vm4, %v7376_v13 }
 0xaec   : > { %6702 = vmatmul.mubr.msk.f32.gmra.mrb[188].mxu0 %vm1737_vm5, %v8892_v40 }
 0xaed   : > { %6704 = vmatprep.mubr.msk.f32.mxu0 %vm7375_vm4, %v7376_v13 }
 0xaf0   : > { %6705 = vmatmul.mubr.msk.f32.gmra.mrb[190].mxu0 %vm1737_vm5, %v8905_v56 }
 0xaf1   : > { %6707 = vmatprep.mubr.msk.f32.mxu0 %vm7375_vm4, %v7376_v13 }
 0xaf4   : > { %6708 = vmatmul.mubr.msk.f32.gmra.mrb[192].mxu0 %vm1737_vm5, %v8918_v30 }
 0xaf5   : > { %6710 = vmatprep.mubr.msk.f32.mxu0 %vm7375_vm4, %v7376_v13 }
 0xaf8   : > { %6711 = vmatmul.mubr.msk.f32.gmra.mrb[194].mxu0 %vm1737_vm5, %v8931_v16 }
 0xaf9   : > { %6776 = vmatprep.mubr.msk.f32.mxu0 %vm7375_vm4, %v7376_v13 }
 0xb3f   : > { %v9057_v49 = vpop.f32.mrb[124].mxu0  ;;  %v3844_v62 = vpop.f32.mrb[130].mxu1 }
 0xb40   : > { %v6498_v27 = vpop.f32.mrb[125].mxu0  ;;  %v6527_v39 = vpop.f32.mrb[131].mxu1  ;;  %v3845_v11 = vadd.f32 %v5591_v55, %v3844_v62  ;;  %v9093_v62 = vld [vmem:[%s9582_s10 + $0xa] ss:$0 sm:$0xff] }
 0xb41   : > { %v5579_v27 = vld [vmem:[%s9582_s10 + $0x6] ss:$0 sm:$0xff] }
 0xb43   : > { %v9062_v54 = vpop.f32.mrb[126].mxu0  ;;  %v3849_v59 = vpop.f32.mrb[132].mxu1 }
 0xb44   : > { %v3850_v38 = vadd.f32 %v5591_v55, %v3849_v59  ;;  %v6501_v18 = vpop.f32.mrb[127].mxu0  ;;  %v6530_v0 = vpop.f32.mrb[133].mxu1 }
 0xb45   : > { %v3725_v0 = vadd.f32 %v5579_v27, %v9057_v49 }
 0xb46   : > { %v6916_v19 = vpack.c.bf16 %v3850_v38, %v3845_v11 }
 0xb47   : > { %v9064_v63 = vpop.f32.mrb[128].mxu0  ;;  %v3854_v58 = vpop.f32.mrb[134].mxu1 }
 0xb48   : > { %v6504_v32 = vpop.f32.mrb[129].mxu0  ;;  %v6533_v4 = vpop.f32.mrb[135].mxu1  ;;  %6918 = vmatpush3.bf16.xpose.msk.msra.mxu1 %vm8221_vm7, %v6916_v19  ;;  %v3855_v5 = vadd.f32 %v5591_v55, %v3854_v58  ;;  %v5643_v19 = vld [vmem:[%s9581_s9 + $0x48] sm:$0xff] }
 0xb49   : > { %6919 = vmatprep.subr.bf16.mxu1 %v7374_v12  ;;  %v3730_v4 = vadd.f32 %v5579_v27, %v9062_v54 }
 0xb4b   : > { %v9069_v25 = vpop.f32.mrb[130].mxu0  ;;  %v3859_v42 = vpop.f32.mrb[136].mxu1 }
 0xb4c   : > { %v3860_v37 = vadd.f32 %v5591_v55, %v3859_v42  ;;  %v6507_v17 = vpop.f32.mrb[131].mxu0  ;;  %v6536_v29 = vpop.f32.mrb[137].mxu1 }
 0xb4d   : > { %v3735_v17 = vadd.f32 %v5579_v27, %v9064_v63 }
 0xb4e   : > { %v6920_v31 = vpack.c.bf16 %v3860_v37, %v3855_v5 }
 0xb4f   : > { %v9071_v52 = vpop.f32.mrb[132].mxu0  ;;  %v3864_v15 = vpop.f32.mrb[138].mxu1 }
 0xb50   : > { %v6510_v1 = vpop.f32.mrb[133].mxu0  ;;  %v6539_v60 = vpop.f32.mrb[139].mxu1  ;;  %6922 = vmatpush3.bf16.xpose.msk.msra.mxu1 %vm8221_vm7, %v6920_v31  ;;  %v3865_v51 = vadd.f32 %v5591_v55, %v3864_v15  ;;  %v3740_v15 = vadd.f32 %v5579_v27, %v9069_v25 }
 0xb51   : > { %6923 = vmatprep.subr.bf16.mxu1 %v7374_v12 }
 0xb53   : > { %v9076_v21 = vpop.f32.mrb[134].mxu0  ;;  %v3869_v6 = vpop.f32.mrb[140].mxu1 }
 0xb54   : > { %v3870_v22 = vadd.f32 %v5591_v55, %v3869_v6  ;;  %v6513_v41 = vpop.f32.mrb[135].mxu0  ;;  %v6542_v2 = vpop.f32.mrb[141].mxu1 }
 0xb55   : > { %v3750_v2 = vadd.f32 %v5579_v27, %v9076_v21 }
 0xb56   : > { %v6924_v28 = vpack.c.bf16 %v3870_v22, %v3865_v51  ;;  %v3745_v51 = vadd.f32 %v5579_v27, %v9071_v52 }
 0xb57   : > { %v9078_v23 = vpop.f32.mrb[136].mxu0  ;;  %v3874_v43 = vpop.f32.mrb[142].mxu1 }
 0xb58   : > { %v6516_v34 = vpop.f32.mrb[137].mxu0  ;;  %v6545_v35 = vpop.f32.mrb[143].mxu1  ;;  %6926 = vmatpush3.bf16.xpose.msk.msra.mxu1 %vm8221_vm7, %v6924_v28  ;;  %v3875_v7 = vadd.f32 %v5591_v55, %v3874_v43 }
 0xb59   : > { %6927 = vmatprep.subr.bf16.mxu1 %v7374_v12  ;;  %v3755_v35 = vadd.f32 %v5579_v27, %v9078_v23 }
 0xb5b   : > { %v9083_v53 = vpop.f32.mrb[138].mxu0  ;;  %v3879_v10 = vpop.f32.mrb[144].mxu1 }
 0xb5c   : > { %v3880_v26 = vadd.f32 %v5591_v55, %v3879_v10  ;;  %v6519_v44 = vpop.f32.mrb[139].mxu0  ;;  %v6548_v47 = vpop.f32.mrb[145].mxu1 }
 0xb5e   : > { %v6928_v3 = vpack.c.bf16 %v3880_v26, %v3875_v7  ;;  %v3760_v26 = vadd.f32 %v5579_v27, %v9083_v53 }
 0xb5f   : > { %v9085_v8 = vpop.f32.mrb[140].mxu0  ;;  %v3884_v45 = vpop.f32.mrb[146].mxu1 }
 0xb60   : > { %v6522_v50 = vpop.f32.mrb[141].mxu0  ;;  %v6551_v36 = vpop.f32.mrb[147].mxu1  ;;  %6930 = vmatpush3.bf16.xpose.msk.msra.mxu1 %vm8221_vm7, %v6928_v3  ;;  %v3885_v39 = vadd.f32 %v5591_v55, %v3884_v45  ;;  %v3765_v23 = vadd.f32 %v5579_v27, %v9085_v8 }
 0xb61   : > { %6597 = vmatprep.subr.mxu1 %v7376_v13 }
 0xb63   : > { %v3964_v24 = vpop.f32.mrb[142].mxu0 }
 0xb64   : > { %v6556_v20 = vpop.f32.mrb[143].mxu0  ;;  %v9099_v11 = vadd.f32 %v9093_v62, %v3964_v24 }
 0xb67   : > { %v3969_v59 = vpop.f32.mrb[144].mxu0 }
 0xb68   : > { %v9102_v38 = vadd.f32 %v9093_v62, %v3969_v59  ;;  %v6559_v18 = vpop.f32.mrb[145].mxu0  ;;  %6598 = vmatpush3.xpose.msk.msra.mxu1 %vm1737_vm5, %v3885_v39 }
 0xb69   : > { %6655 = vmatprep.subr.mxu1 %v7376_v13 }
 0xb6a   : > { %v6960_v55 = vpack.c.bf16 %v9102_v38, %v9099_v11 }
 0xb6b   : > { %v3974_v58 = vpop.f32.mrb[146].mxu0  ;;  %6600 = vmatmul.mubr.msk.f32.vlgmr.msra.gmra.mrb[148].mxu1 %vm1737_vm5, %v3725_v0 }
 0xb6c   : > { %v6562_v32 = vpop.f32.mrb[147].mxu0  ;;  %6602 = vmatprep.mubr.msk.f32.mxu1 %vm7375_vm4, %v7376_v13  ;;  %6656 = vmatpush3.msra.mxu1 %v5643_v19  ;;  %v9119_v42 = vadd.f32 %v9093_v62, %v3974_v58 }
 0xb6d   : > { %6931 = vmatprep.subr.bf16.mxu1 %v7374_v12 }
 0xb6f   : > { %v3979_v49 = vpop.f32.mrb[148].mxu0  ;;  %6603 = vmatmul.mubr.msk.f32.gmra.mrb[150].mxu1 %vm1737_vm5, %v3730_v4 }
 0xb70   : > { %v9122_v5 = vadd.f32 %v9093_v62, %v3979_v49  ;;  %v6565_v37 = vpop.f32.mrb[149].mxu0  ;;  %6605 = vmatprep.mubr.msk.f32.mxu1 %vm7375_vm4, %v7376_v13 }
 0xb72   : > { %v6963_v54 = vpack.c.bf16 %v9122_v5, %v9119_v42 }
 0xb73   : > { %v3984_v29 = vpop.f32.mrb[150].mxu0  ;;  %6606 = vmatmul.mubr.msk.f32.gmra.mrb[152].mxu1 %vm1737_vm5, %v3735_v17 }
 0xb74   : > { %v6568_v31 = vpop.f32.mrb[151].mxu0  ;;  %6608 = vmatprep.mubr.msk.f32.mxu1 %vm7375_vm4, %v7376_v13  ;;  %v9135_v60 = vadd.f32 %v9093_v62, %v3984_v29 }
 0xb77   : > { %v3989_v1 = vpop.f32.mrb[152].mxu0  ;;  %6609 = vmatmul.mubr.msk.f32.gmra.mrb[154].mxu1 %vm1737_vm5, %v3740_v15 }
 0xb78   : > { %v9138_v63 = vadd.f32 %v9093_v62, %v3989_v1  ;;  %v6571_v6 = vpop.f32.mrb[153].mxu0  ;;  %6611 = vmatprep.mubr.msk.f32.mxu1 %vm7375_vm4, %v7376_v13 }
 0xb7a   : > { %v6966_v22 = vpack.c.bf16 %v9138_v63, %v9135_v60 }
 0xb7b   : > { %v3994_v41 = vpop.f32.mrb[154].mxu0  ;;  %6612 = vmatmul.mubr.msk.f32.gmra.mrb[156].mxu1 %vm1737_vm5, %v3745_v51 }
 0xb7c   : > { %v6574_v25 = vpop.f32.mrb[155].mxu0  ;;  %6614 = vmatprep.mubr.msk.f32.mxu1 %vm7375_vm4, %v7376_v13  ;;  %v9151_v43 = vadd.f32 %v9093_v62, %v3994_v41 }
 0xb7f   : > { %v3999_v28 = vpop.f32.mrb[156].mxu0  ;;  %6615 = vmatmul.mubr.msk.f32.gmra.mrb[158].mxu1 %vm1737_vm5, %v3750_v2 }
 0xb80   : > { %v9154_v52 = vadd.f32 %v9093_v62, %v3999_v28  ;;  %v6577_v34 = vpop.f32.mrb[157].mxu0  ;;  %6617 = vmatprep.mubr.msk.f32.mxu1 %vm7375_vm4, %v7376_v13 }
 0xb82   : > { %v6969_v10 = vpack.c.bf16 %v9154_v52, %v9151_v43 }
 0xb83   : > { %v9161_v7 = vpop.f32.mrb[158].mxu0  ;;  %6618 = vmatmul.mubr.msk.f32.gmra.mrb[160].mxu1 %vm1737_vm5, %v3755_v35 }
 0xb84   : > { %v6580_v21 = vpop.f32.mrb[159].mxu0  ;;  %6620 = vmatprep.mubr.msk.f32.mxu1 %vm7375_vm4, %v7376_v13 }
 0xb87   : > { %6621 = vmatmul.mubr.msk.f32.gmra.mrb[162].mxu1 %vm1737_vm5, %v3760_v26  ;;  %v9168_v44 = vpop.f32.mrb[160].mxu0 }
 0xb88   : > { %v6630_v47 = vpop.f32.mrb[161].mxu0  ;;  %6623 = vmatprep.mubr.msk.f32.mxu1 %vm7375_vm4, %v7376_v13 }
 0xb8b   : > { %6624 = vmatmul.mubr.msk.f32.gmra.mrb[164].mxu1 %vm1737_vm5, %v3765_v23  ;;  %v9174_v3 = vpop.f32.mrb[162].mxu0 }
 0xb8c   : > { %v6633_v45 = vpop.f32.mrb[163].mxu0  ;;  %6657 = vmatprep.mubr.msk.f32.mxu1 %vm7375_vm4, %v7376_v13 }
 0xb8f   : > { %v9178_v50 = vpop.f32.mrb[164].mxu0  ;;  %6658 = vmatmul.mubr.msk.f32.vlgmr.msra.gmra.mrb[166].mxu1 %vm1737_vm5, %v8823_v57 }
 0xb90   : > { %v6636_v53 = vpop.f32.mrb[165].mxu0  ;;  %6660 = vmatprep.mubr.msk.f32.mxu1 %vm7375_vm4, %v7376_v13 }
 0xb93   : > { %v9184_v36 = vpop.f32.mrb[166].mxu0  ;;  %6661 = vmatmul.mubr.msk.f32.gmra.mrb[168].mxu1 %vm1737_vm5, %v8839_v9 }
 0xb94   : > { %v6639_v8 = vpop.f32.mrb[167].mxu0  ;;  %6663 = vmatprep.mubr.msk.f32.mxu1 %vm7375_vm4, %v7376_v13 }
 0xb97   : > { %v9190_v24 = vpop.f32.mrb[168].mxu0  ;;  %6664 = vmatmul.mubr.msk.f32.gmra.mrb[170].mxu1 %vm1737_vm5, %v8853_v14 }
 0xb98   : > { %v6642_v20 = vpop.f32.mrb[169].mxu0  ;;  %6666 = vmatprep.mubr.msk.f32.mxu1 %vm7375_vm4, %v7376_v13 }
 0xb9b   : > { %v9196_v57 = vpop.f32.mrb[170].mxu0  ;;  %6667 = vmatmul.mubr.msk.f32.gmra.mrb[172].mxu1 %vm1737_vm5, %v8866_v61 }
 0xb9c   : > { %v6645_v27 = vpop.f32.mrb[171].mxu0  ;;  %6669 = vmatprep.mubr.msk.f32.mxu1 %vm7375_vm4, %v7376_v13 }
 0xb9f   : > { %v9202_v9 = vpop.f32.mrb[172].mxu0  ;;  %6670 = vmatmul.mubr.msk.f32.gmra.mrb[174].mxu1 %vm1737_vm5, %v8879_v46 }
 0xba0   : > { %v6648_v39 = vpop.f32.mrb[173].mxu0  ;;  %6672 = vmatprep.mubr.msk.f32.mxu1 %vm7375_vm4, %v7376_v13 }
 0xba3   : > { %v9208_v14 = vpop.f32.mrb[174].mxu0  ;;  %6673 = vmatmul.mubr.msk.f32.gmra.mrb[176].mxu1 %vm1737_vm5, %v8892_v40  ;;  %v5657_v40 = vld [vmem:[%s9582_s10 + $0xb] ss:$0 sm:$0xff] }
 0xba4   : > { %v6651_v59 = vpop.f32.mrb[175].mxu0  ;;  %6675 = vmatprep.mubr.msk.f32.mxu1 %vm7375_vm4, %v7376_v13 }
 0xba7   : > { %v9214_v61 = vpop.f32.mrb[176].mxu0  ;;  %6676 = vmatmul.mubr.msk.f32.gmra.mrb[178].mxu1 %vm1737_vm5, %v8905_v56 }
 0xba8   : > { %v6654_v18 = vpop.f32.mrb[177].mxu0  ;;  %6678 = vmatprep.mubr.msk.f32.mxu1 %vm7375_vm4, %v7376_v13 }
 0xbab   : > { %6679 = vmatmul.mubr.msk.f32.gmra.mrb[180].mxu1 %vm1737_vm5, %v8918_v30  ;;  %v4596_v46 = vpop.f32.mrb[178].mxu0 }
 0xbac   : > { %v6688_v0 = vpop.f32.mrb[179].mxu0  ;;  %6681 = vmatprep.mubr.msk.f32.mxu1 %vm7375_vm4, %v7376_v13  ;;  %v4597_v19 = vadd.f32 %v5657_v40, %v4596_v46 }
 0xbaf   : > { %6682 = vmatmul.mubr.msk.f32.gmra.mrb[182].mxu1 %vm1737_vm5, %v8931_v16  ;;  %v4601_v56 = vpop.f32.mrb[180].mxu0 }
 0xbb0   : > { %v4602_v58 = vadd.f32 %v5657_v40, %v4601_v56  ;;  %v6691_v32 = vpop.f32.mrb[181].mxu0  ;;  %6731 = vmatprep.mubr.msk.f32.mxu1 %vm7375_vm4, %v7376_v13 }
 0xbb2   : > { %v6948_v30 = vpack.c.bf16 %v4602_v58, %v4597_v19 }
 0xbb3   : > { %v4606_v4 = vpop.f32.mrb[182].mxu0 }
 0xbb4   : > { %v6694_v49 = vpop.f32.mrb[183].mxu0  ;;  %6949 = vmatpush3.bf16.msra.mxu0 %v6948_v30  ;;  %v4607_v17 = vadd.f32 %v5657_v40, %v4606_v4 }
 0xbb5   : > { %6950 = vmatprep.subr.bf16.mxu0 %v7374_v12 }
 0xbb7   : > { %v4611_v37 = vpop.f32.mrb[184].mxu0 }
 0xbb8   : > { %v4612_v29 = vadd.f32 %v5657_v40, %v4611_v37  ;;  %v6697_v31 = vpop.f32.mrb[185].mxu0 }
 0xbba   : > { %v6951_v15 = vpack.c.bf16 %v4612_v29, %v4607_v17 }
 0xbbb   : > { %v4616_v1 = vpop.f32.mrb[186].mxu0 }
 0xbbc   : > { %v6700_v16 = vpop.f32.mrb[187].mxu0  ;;  %6952 = vmatpush3.bf16.msra.mxu0 %v6951_v15  ;;  %v4617_v51 = vadd.f32 %v5657_v40, %v4616_v1 }
 0xbbd   : > { %6953 = vmatprep.subr.bf16.mxu0 %v7374_v12 }
 0xbbf   : > { %v4621_v6 = vpop.f32.mrb[188].mxu0 }
 0xbc0   : > { %v4622_v41 = vadd.f32 %v5657_v40, %v4621_v6  ;;  %v6703_v25 = vpop.f32.mrb[189].mxu0  ;;  %v5645_v6 = vld [vmem:[%s9582_s10 + $0x9] ss:$0 sm:$0xff] }
 0xbc2   : > { %v6954_v2 = vpack.c.bf16 %v4622_v41, %v4617_v51 }
 0xbc3   : > { %v4626_v28 = vpop.f32.mrb[190].mxu0 }
 0xbc4   : > { %v6706_v34 = vpop.f32.mrb[191].mxu0  ;;  %6955 = vmatpush3.bf16.msra.mxu0 %v6954_v2  ;;  %v4627_v21 = vadd.f32 %v5657_v40, %v4626_v28 }
 0xbc5   : > { %6956 = vmatprep.subr.bf16.mxu0 %v7374_v12 }
 0xbc7   : > { %v4631_v35 = vpop.f32.mrb[192].mxu0 }
 0xbc8   : > { %v4632_v26 = vadd.f32 %v5657_v40, %v4631_v35  ;;  %v6709_v47 = vpop.f32.mrb[193].mxu0 }
 0xbca   : > { %v6957_v23 = vpack.c.bf16 %v4632_v26, %v4627_v21 }
 0xbcb   : > { %v4636_v45 = vpop.f32.mrb[194].mxu0 }
 0xbcc   : > { %v6712_v53 = vpop.f32.mrb[195].mxu0  ;;  %6958 = vmatpush3.bf16.msra.mxu0 %v6957_v23  ;;  %v4637_v8 = vadd.f32 %v5657_v40, %v4636_v45 }
 0xbcd   : > { %6774 = vmatprep.subr.mxu0 %v7376_v13 }
 0xbd0   : > { %6775 = vmatpush3.msk.msra.mxu0 %vm3207_vm8, %v4637_v8 }
 0xbd1   : > { %6848 = vmatprep.subr.mxu0 %v7376_v13 }
 0xc3e   : > { %v4128_v20 = vpop.f32.mrb[148].mxu1 }
 0xc3f   : > { %v9237_v27 = vmul.f32 0.5, %v4128_v20  ;;  %v6601_v39 = vpop.f32.mrb[149].mxu1 }
 0xc41   : > { %v4181_v59 = vsel %vm2447_vm9, %v9237_v27, -inf }
 0xc42   : > { %4182 = vmax.xlane.f32.xlu1 %v4181_v59  ;;  %v9241_v18 = vpop.f32.mrb[150].mxu1 }
 0xc43   : > { %v6604_v46 = vpop.f32.mrb[151].mxu1 }
 0xc46   : > { %v9243_v0 = vpop.f32.mrb[152].mxu1 }
 0xc47   : > { %v6607_v56 = vpop.f32.mrb[153].mxu1 }
 0xc4a   : > { %v9245_v19 = vpop.f32.mrb[154].mxu1 }
 0xc4b   : > { %v6610_v40 = vpop.f32.mrb[155].mxu1 }
 0xc4e   : > { %v9247_v58 = vpop.f32.mrb[156].mxu1 }
 0xc4f   : > { %v6613_v32 = vpop.f32.mrb[157].mxu1 }
 0xc52   : > { %v9249_v30 = vpop.f32.mrb[158].mxu1 }
 0xc53   : > { %v6616_v4 = vpop.f32.mrb[159].mxu1 }
 0xc56   : > { %v9251_v49 = vpop.f32.mrb[160].mxu1 }
 0xc57   : > { %v6619_v37 = vpop.f32.mrb[161].mxu1 }
 0xc5a   : > { %v9253_v17 = vpop.f32.mrb[162].mxu1 }
 0xc5b   : > { %v6622_v29 = vpop.f32.mrb[163].mxu1 }
 0xc5e   : > { %v9255_v31 = vpop.f32.mrb[164].mxu1 }
 0xc5f   : > { %v6625_v15 = vpop.f32.mrb[165].mxu1 }
 0xc62   : > { %v4476_v1 = vpop.f32.mrb[166].mxu1 }
 0xc63   : > { %v6659_v16 = vpop.f32.mrb[167].mxu1  ;;  %v4477_v41 = vadd.f32 %v5645_v6, %v4476_v1 }
 0xc66   : > { %v4481_v51 = vpop.f32.mrb[168].mxu1 }
 0xc67   : > { %v4482_v25 = vadd.f32 %v5645_v6, %v4481_v51  ;;  %v6662_v2 = vpop.f32.mrb[169].mxu1 }
 0xc69   : > { %v6932_v28 = vpack.c.bf16 %v4482_v25, %v4477_v41  ;;  %v5633_v41 = vld [vmem:[%s9582_s10 + $0x7] ss:$0 sm:$0xff] }
 0xc6a   : > { %v4486_v34 = vpop.f32.mrb[170].mxu1  ;;  %v4357_v2 = vadd.f32 %v5633_v41, %v9168_v44  ;;  %v4362_v33 = vadd.f32 %v5633_v41, %v9174_v3  ;;  %v4367_v44 = vadd.f32 %v5633_v41, %v9178_v50  ;;  %v4372_v11 = vadd.f32 %v5633_v41, %v9184_v36 }
 0xc6b   : > { %v6665_v35 = vpop.f32.mrb[171].mxu1  ;;  %6934 = vmatpush3.bf16.xpose.msk.msra.mxu1 %vm8221_vm7, %v6932_v28  ;;  %v4487_v26 = vadd.f32 %v5645_v6, %v4486_v34  ;;  %v4377_v38 = vadd.f32 %v5633_v41, %v9190_v24  ;;  %v4387_v42 = vadd.f32 %v5633_v41, %v9202_v9  ;;  %v4397_v5 = vadd.f32 %v5633_v41, %v9214_v61 }
 0xc6c   : > { %6935 = vmatprep.subr.bf16.mxu1 %v7374_v12 }
 0xc6e   : > { %v4491_v21 = vpop.f32.mrb[172].mxu1 }
 0xc6f   : > { %v4492_v47 = vadd.f32 %v5645_v6, %v4491_v21  ;;  %v6668_v23 = vpop.f32.mrb[173].mxu1 }
 0xc71   : > { %v6936_v45 = vpack.c.bf16 %v4492_v47, %v4487_v26 }
 0xc72   : > { %v4496_v53 = vpop.f32.mrb[174].mxu1 }
 0xc73   : > { %v6671_v8 = vpop.f32.mrb[175].mxu1  ;;  %6938 = vmatpush3.bf16.xpose.msk.msra.mxu1 %vm8221_vm7, %v6936_v45  ;;  %v4497_v39 = vadd.f32 %v5645_v6, %v4496_v53 }
 0xc74   : > { %6939 = vmatprep.subr.bf16.mxu1 %v7374_v12 }
 0xc76   : > { %v4501_v20 = vpop.f32.mrb[176].mxu1 }
 0xc77   : > { %v4502_v59 = vadd.f32 %v5645_v6, %v4501_v20  ;;  %v6674_v46 = vpop.f32.mrb[177].mxu1 }
 0xc79   : > { %v6940_v56 = vpack.c.bf16 %v4502_v59, %v4497_v39 }
 0xc7a   : > { %v4506_v40 = vpop.f32.mrb[178].mxu1 }
 0xc7b   : > { %v6677_v32 = vpop.f32.mrb[179].mxu1  ;;  %6942 = vmatpush3.bf16.xpose.msk.msra.mxu1 %vm8221_vm7, %v6940_v56  ;;  %v4507_v37 = vadd.f32 %v5645_v6, %v4506_v40 }
 0xc7c   : > { %6943 = vmatprep.subr.bf16.mxu1 %v7374_v12 }
 0xc7e   : > { %v4511_v4 = vpop.f32.mrb[180].mxu1 }
 0xc7f   : > { %v4512_v29 = vadd.f32 %v5645_v6, %v4511_v4  ;;  %v6680_v15 = vpop.f32.mrb[181].mxu1 }
 0xc81   : > { %v6944_v1 = vpack.c.bf16 %v4512_v29, %v4507_v37 }
 0xc82   : > { %v4516_v16 = vpop.f32.mrb[182].mxu1 }
 0xc83   : > { %v6683_v51 = vpop.f32.mrb[183].mxu1  ;;  %6946 = vmatpush3.bf16.xpose.msk.msra.mxu1 %vm8221_vm7, %v6944_v1  ;;  %v4517_v25 = vadd.f32 %v5645_v6, %v4516_v16 }
 0xc84   : > { %6729 = vmatprep.subr.mxu1 %v7376_v13 }
 0xc8b   : > { %6730 = vmatpush3.xpose.msk.msra.mxu1 %vm1737_vm5, %v4517_v25 }
 0xc8c   : > { %6959 = vmatprep.subr.bf16.mxu1 %v7374_v12 }
 0xc8e   : > { %6732 = vmatmul.mubr.msk.f32.vlgmr.msra.gmra.mrb[184].mxu1 %vm1737_vm5, %v4357_v2 }
 0xc8f   : > { %6961 = vmatpush3.bf16.msra.mxu1 %v6960_v55  ;;  %6734 = vmatprep.mubr.msk.f32.mxu1 %vm7375_vm4, %v7376_v13  ;;  %v4005_v55 = vadd.f32 %v9093_v62, %v9161_v7  ;;  %v4392_v62 = vadd.f32 %v5633_v41, %v9208_v14 }
 0xc90   : > { %6962 = vmatprep.subr.bf16.mxu1 %v7374_v12 }
 0xc92   : > { %6735 = vmatmul.mubr.msk.f32.gmra.mrb[186].mxu1 %vm1737_vm5, %v4362_v33 }
 0xc93   : > { %6964 = vmatpush3.bf16.msra.mxu1 %v6963_v54  ;;  %6737 = vmatprep.mubr.msk.f32.mxu1 %vm7375_vm4, %v7376_v13 }
 0xc94   : > { %6965 = vmatprep.subr.bf16.mxu1 %v7374_v12 }
 0xc96   : > { %6738 = vmatmul.mubr.msk.f32.gmra.mrb[188].mxu1 %vm1737_vm5, %v4367_v44 }
 0xc97   : > { %6967 = vmatpush3.bf16.msra.mxu1 %v6966_v22  ;;  %6740 = vmatprep.mubr.msk.f32.mxu1 %vm7375_vm4, %v7376_v13 }
 0xc98   : > { %6968 = vmatprep.subr.bf16.mxu1 %v7374_v12  ;;  %v4382_v12 = vadd.f32 %v5633_v41, %v9196_v57 }
 0xc9a   : > { %6741 = vmatmul.mubr.msk.f32.gmra.mrb[190].mxu1 %vm1737_vm5, %v4372_v11 }
 0xc9b   : > { %6970 = vmatpush3.bf16.msra.mxu1 %v6969_v10  ;;  %6743 = vmatprep.mubr.msk.f32.mxu1 %vm7375_vm4, %v7376_v13 }
 0xc9c   : > { %6819 = vmatprep.subr.mxu1 %v7376_v13 }
 0xc9e   : > { %6744 = vmatmul.mubr.msk.f32.gmra.mrb[192].mxu1 %vm1737_vm5, %v4377_v38 }
 0xc9f   : > { %6820 = vmatpush3.msk.msra.mxu1 %vm3207_vm8, %v4005_v55  ;;  %6746 = vmatprep.mubr.msk.f32.mxu1 %vm7375_vm4, %v7376_v13 }
 0xca2   : > { %6747 = vmatmul.mubr.msk.f32.gmra.mrb[194].mxu1 %vm1737_vm5, %v4382_v12 }
 0xca3   : > { %6749 = vmatprep.mubr.msk.f32.mxu1 %vm7375_vm4, %v7376_v13 }
 0xca6   : > { %6750 = vmatmul.mubr.msk.f32.gmra.mrb[196].mxu1 %vm1737_vm5, %v4387_v42 }
 0xca7   : > { %6752 = vmatprep.mubr.msk.f32.mxu1 %vm7375_vm4, %v7376_v13 }
 0xcaa   : > { %6753 = vmatmul.mubr.msk.f32.gmra.mrb[198].mxu1 %vm1737_vm5, %v4392_v62 }
 0xcab   : > { %6755 = vmatprep.mubr.msk.f32.mxu1 %vm7375_vm4, %v7376_v13 }
 0xcae   : > { %6756 = vmatmul.mubr.msk.f32.gmra.mrb[200].mxu1 %vm1737_vm5, %v4397_v5 }
 0xcaf   : > { %6821 = vmatprep.mubr.msk.f32.mxu1 %vm7375_vm4, %v7376_v13 }
 0xccf   : > { %v4183_v54 = vpop.xlane.xlu1 %4182 }
 0xcd0   : > { %v4208_v60 = vsub.f32 %v9237_v27, %v4183_v54 }
 0xcd2   : > { %v4217_v63 = vmul.f32 1.442695, %v4208_v60 }
 0xcd4   : > { %7232 = vpow2.f32 %v4217_v63 }
 0xcde   : > { %v7233_v22 = vpop.eup %7232 }
 0xcdf   : > { %v4235_v43 = vsel %vm2447_vm9, %v7233_v22, 0.0 }
 0xce0   : > { %4236 = vadd.xlane.f32.xlu1 %v4235_v43 }
 0xd61   : > { %v4760_v52 = vpop.f32.mrb[184].mxu1 }
 0xd62   : > { %v4804_v10 = vmul.f32 0.5, %v4760_v52  ;;  %v6733_v7 = vpop.f32.mrb[185].mxu1 }
 0xd64   : > { %v4813_v3 = vsel %vm2447_vm9, %v4804_v10, -inf }
 0xd65   : > { %4814 = vmax.xlane.f32.xlu0 %v4813_v3  ;;  %v4765_v50 = vpop.f32.mrb[186].mxu1 }
 0xd66   : > { %v4805_v36 = vmul.f32 0.5, %v4765_v50  ;;  %v6736_v24 = vpop.f32.mrb[187].mxu1 }
 0xd68   : > { %v4816_v57 = vsel %vm2447_vm9, %v4805_v36, -inf }
 0xd69   : > { %4817 = vmax.xlane.f32.xlu1 %v4816_v57  ;;  %v4770_v9 = vpop.f32.mrb[188].mxu1 }
 0xd6a   : > { %v6739_v14 = vpop.f32.mrb[189].mxu1  ;;  %v4806_v44 = vmul.f32 0.5, %v4770_v9 }
 0xd6b   : > { %v4173_v14 = vmul.f32 0.5, %v9241_v18 }
 0xd6c   : > { %v4819_v42 = vsel %vm2447_vm9, %v4806_v44, -inf }
 0xd6d   : > { %v4237_v61 = vpop.xlane.xlu1 %4236  ;;  %v4775_v27 = vpop.f32.mrb[190].mxu1 }
 0xd6e   : > { %7234 = vrcp.f32 %v4237_v61  ;;  %v4807_v6 = vmul.f32 0.5, %v4775_v27  ;;  %v6742_v28 = vpop.f32.mrb[191].mxu1  ;;  %v9368_v27 = vmul.f32 0.5, %v9245_v19 }
 0xd6f   : > { %v9372_v28 = vmul.f32 0.5, %v9249_v30 }
 0xd70   : > { %v4822_v34 = vsel %vm2447_vm9, %v4807_v6, -inf }
 0xd71   : > { %4823 = vmax.xlane.f32.xlu1 %v4822_v34  ;;  %v4780_v35 = vpop.f32.mrb[192].mxu1  ;;  %v4190_v34 = vsel %vm2447_vm9, %v9368_v27, -inf  ;;  %v4196_v18 = vsel %vm2447_vm9, %v9372_v28, -inf }
 0xd72   : > { %v6745_v21 = vpop.f32.mrb[193].mxu1  ;;  %v4808_v55 = vmul.f32 0.5, %v4780_v35  ;;  %v9377_v35 = vmul.f32 0.5, %v9253_v17 }
 0xd74   : > { %v4825_v63 = vsel %vm2447_vm9, %v4808_v55, -inf  ;;  %v4202_v19 = vsel %vm2447_vm9, %v9377_v35, -inf }
 0xd75   : > { %v4785_v26 = vpop.f32.mrb[194].mxu1 }
 0xd76   : > { %v4809_v47 = vmul.f32 0.5, %v4785_v26  ;;  %v6748_v23 = vpop.f32.mrb[195].mxu1 }
 0xd78   : > { %v7235_v45 = vpop.eup %7234  ;;  %v4828_v53 = vsel %vm2447_vm9, %v4809_v47, -inf }
 0xd79   : > { %v4263_v8 = vmul.f32 %v7235_v45, %v7233_v22  ;;  %4829 = vmax.xlane.f32.xlu1 %v4828_v53  ;;  %v4790_v20 = vpop.f32.mrb[196].mxu1 }
 0xd7a   : > { %v6751_v39 = vpop.f32.mrb[197].mxu1  ;;  %v4810_v60 = vmul.f32 0.5, %v4790_v20 }
 0xd7b   : > { %6822 = vmatmul.mubr.msk.f32.vlgmr.msra.gmra.mrb[202].mxu1 %vm2447_vm9, %v4263_v8 }
 0xd7c   : > { %6824 = vmatprep.mubr.msk.f32.mxu1 %vm7375_vm4, %v7376_v13 }
 0xd7d   : > { %v4795_v59 = vpop.f32.mrb[198].mxu1 }
 0xd7e   : > { %v4811_v46 = vmul.f32 0.5, %v4795_v59  ;;  %v6754_v56 = vpop.f32.mrb[199].mxu1 }
 0xd80   : > { %v4834_v40 = vsel %vm2447_vm9, %v4811_v46, -inf }
 0xd81   : > { %4835 = vmax.xlane.f32.xlu1 %v4834_v40  ;;  %v4800_v32 = vpop.f32.mrb[200].mxu1 }
 0xd82   : > { %v6757_v4 = vpop.f32.mrb[201].mxu1  ;;  %v4812_v43 = vmul.f32 0.5, %v4800_v32 }
 0xdf2   : > { %v4815_v37 = vpop.xlane.xlu0 %4814 }
 0xdf3   : > { %v4840_v29 = vsub.f32 %v4804_v10, %v4815_v37  ;;  %v4831_v10 = vsel %vm2447_vm9, %v4810_v60, -inf }
 0xdf5   : > { %v4849_v15 = vmul.f32 1.442695, %v4840_v29 }
 0xdf6   : > { %v4818_v1 = vpop.xlane.xlu1 %4817 }
 0xdf7   : > { %7236 = vpow2.f32 %v4849_v15  ;;  %v4841_v16 = vsub.f32 %v4805_v36, %v4818_v1  ;;  %v4837_v36 = vsel %vm2472_vm10, %v4812_v43, -inf }
 0xdf9   : > { %v4851_v51 = vmul.f32 1.442695, %v4841_v16 }
 0xdfb   : > { %7238 = vpow2.f32 %v4851_v51 }
 0xdfe   : > { %v4824_v41 = vpop.xlane.xlu1 %4823 }
 0xdff   : > { %v4843_v25 = vsub.f32 %v4807_v6, %v4824_v41  ;;  %v4184_v6 = vsel %vm2447_vm9, %v4173_v14, -inf }
 0xe01   : > { %v9342_v2 = vpop.eup %7236  ;;  %v4855_v33 = vmul.f32 1.442695, %v4843_v25 }
 0xe02   : > { %v4867_v11 = vsel %vm2447_vm9, %v9342_v2, 0.0 }
 0xe03   : > { %7240 = vpow2.f32 %v4855_v33  ;;  %4868 = vadd.xlane.f32.xlu0 %v4867_v11 }
 0xe05   : > { %v9346_v38 = vpop.eup %7238 }
 0xe06   : > { %v4830_v12 = vpop.xlane.xlu1 %4829  ;;  %v4870_v62 = vsel %vm2447_vm9, %v9346_v38, 0.0 }
 0xe07   : > { %v4845_v5 = vsub.f32 %v4809_v47, %v4830_v12  ;;  %4820 = vmax.xlane.f32.xlu0 %v4819_v42  ;;  %4871 = vadd.xlane.f32.xlu1 %v4870_v62 }
 0xe09   : > { %v4859_v54 = vmul.f32 1.442695, %v4845_v5 }
 0xe0b   : > { %7242 = vpow2.f32 %v4859_v54  ;;  %4826 = vmax.xlane.f32.xlu0 %v4825_v63  ;;  %v9415_v54 = vmul.f32 0.5, %v9247_v58 }
 0xe0d   : > { %v9352_v22 = vpop.eup %7240 }
 0xe0e   : > { %v4836_v52 = vpop.xlane.xlu1 %4835  ;;  %v4876_v7 = vsel %vm2447_vm9, %v9352_v22, 0.0 }
 0xe0f   : > { %v4847_v3 = vsub.f32 %v4811_v46, %v4836_v52  ;;  %4832 = vmax.xlane.f32.xlu0 %v4831_v10  ;;  %4877 = vadd.xlane.f32.xlu1 %v4876_v7  ;;  %v9421_v52 = vmul.f32 0.5, %v9251_v49  ;;  %v4193_v7 = vsel %vm2447_vm9, %v9415_v54, -inf }
 0xe11   : > { %v4863_v50 = vmul.f32 1.442695, %v4847_v3 }
 0xe13   : > { %7244 = vpow2.f32 %v4863_v50  ;;  %4838 = vmax.xlane.f32.xlu0 %v4837_v36  ;;  %v9427_v50 = vmul.f32 0.5, %v9255_v31 }
 0xe15   : > { %v9358_v24 = vpop.eup %7242 }
 0xe16   : > { %v4882_v57 = vsel %vm2447_vm9, %v9358_v24, 0.0 }
 0xe17   : > { %4883 = vadd.xlane.f32.xlu1 %v4882_v57  ;;  %v4199_v57 = vsel %vm2447_vm9, %v9421_v52, -inf }
 0xe1d   : > { %v9362_v9 = vpop.eup %7244 }
 0xe1e   : > { %v4888_v61 = vsel %vm2447_vm9, %v9362_v9, 0.0 }
 0xe1f   : > { %4889 = vadd.xlane.f32.xlu1 %v4888_v61 }
 0xe23   : > { %4185 = vmax.xlane.f32.xlu1 %v4184_v6  ;;  %v4205_v6 = vsel %vm2472_vm10, %v9427_v50, -inf }
 0xe27   : > { %4191 = vmax.xlane.f32.xlu1 %v4190_v34 }
 0xe2b   : > { %4197 = vmax.xlane.f32.xlu1 %v4196_v18 }
 0xe2f   : > { %4203 = vmax.xlane.f32.xlu1 %v4202_v19 }
 0xe4e   : > { %v9383_v21 = vpop.f32.mrb[202].mxu1 }
 0xe4f   : > { %v6823_v26 = vpop.f32.mrb[203].mxu1 }
 0xe50   : > { %v5177_v26 = vld [vmem:[%s9583_s11] sm:$0xff] }
 0xe90   : > { %v4869_v30 = vpop.xlane.xlu0 %4868 }
 0xe91   : > { %7246 = vrcp.f32 %v4869_v30 }
 0xe94   : > { %v4821_v47 = vpop.xlane.xlu0 %4820  ;;  %v4872_v23 = vpop.xlane.xlu1 %4871 }
 0xe95   : > { %v4842_v45 = vsub.f32 %v4806_v44, %v4821_v47  ;;  %7248 = vrcp.f32 %v4872_v23 }
 0xe97   : > { %v4853_v53 = vmul.f32 1.442695, %v4842_v45 }
 0xe98   : > { %v4827_v17 = vpop.xlane.xlu0 %4826 }
 0xe99   : > { %7250 = vpow2.f32 %v4853_v53  ;;  %v4844_v8 = vsub.f32 %v4808_v55, %v4827_v17  ;;  %v9410_v55 = vmul.f32 0.5, %v9243_v0 }
 0xe9b   : > { %v7247_v20 = vpop.eup %7246  ;;  %v4857_v39 = vmul.f32 1.442695, %v4844_v8  ;;  %v4187_v63 = vsel %vm2447_vm9, %v9410_v55, -inf }
 0xe9c   : > { %v4895_v59 = vmul.f32 %v7247_v20, %v9342_v2  ;;  %v4833_v46 = vpop.xlane.xlu0 %4832  ;;  %v4878_v16 = vpop.xlane.xlu1 %4877 }
 0xe9d   : > { %7252 = vpow2.f32 %v4857_v39  ;;  %v4846_v56 = vsub.f32 %v4810_v60, %v4833_v46 }
 0xe9e   : > { %6777 = vmatmul.mubr.msk.f32.vlgmr.msra.gmra.mrb[196].mxu0 %vm2447_vm9, %v4895_v59 }
 0xe9f   : > { %v7249_v40 = vpop.eup %7248  ;;  %v4861_v32 = vmul.f32 1.442695, %v4846_v56  ;;  %6779 = vmatprep.mubr.msk.f32.mxu0 %vm7375_vm4, %v7376_v13  ;;  %6849 = vmatpush3.msra.mxu0 %v5177_v26 }
 0xea0   : > { %v4839_v4 = vpop.xlane.xlu0 %4838  ;;  %v4897_v37 = vmul.f32 %v7249_v40, %v9346_v38 }
 0xea1   : > { %7254 = vpow2.f32 %v4861_v32  ;;  %v4848_v29 = vsub.f32 %v4812_v43, %v4839_v4 }
 0xea2   : > { %6780 = vmatmul.mubr.msk.f32.gmra.mrb[198].mxu0 %vm2447_vm9, %v4897_v37 }
 0xea3   : > { %v9391_v15 = vpop.eup %7250  ;;  %v4865_v1 = vmul.f32 1.442695, %v4848_v29  ;;  %6782 = vmatprep.mubr.msk.f32.mxu0 %vm7375_vm4, %v7376_v13 }
 0xea4   : > { %v4873_v51 = vsel %vm2447_vm9, %v9391_v15, 0.0  ;;  %v4884_v25 = vpop.xlane.xlu1 %4883 }
 0xea5   : > { %7256 = vpow2.f32 %v4865_v1  ;;  %4874 = vadd.xlane.f32.xlu0 %v4873_v51 }
 0xea7   : > { %v9397_v41 = vpop.eup %7252 }
 0xea8   : > { %v4879_v2 = vsel %vm2447_vm9, %v9397_v41, 0.0 }
 0xea9   : > { %4880 = vadd.xlane.f32.xlu0 %v4879_v2 }
 0xeab   : > { %v9401_v33 = vpop.eup %7254 }
 0xeac   : > { %v9403_v44 = vpop.xlane.xlu1 %4889  ;;  %v4885_v11 = vsel %vm2447_vm9, %v9401_v33, 0.0 }
 0xead   : > { %4886 = vadd.xlane.f32.xlu0 %v4885_v11 }
 0xeaf   : > { %v9407_v38 = vpop.eup %7256 }
 0xeb0   : > { %v4186_v12 = vpop.xlane.xlu1 %4185  ;;  %v4891_v42 = vsel %vm2472_vm10, %v9407_v38, 0.0 }
 0xeb1   : > { %v4209_v62 = vsub.f32 %v4173_v14, %v4186_v12  ;;  %4892 = vadd.xlane.f32.xlu0 %v4891_v42 }
 0xeb3   : > { %v4219_v5 = vmul.f32 1.442695, %v4209_v62 }
 0xeb4   : > { %v4192_v60 = vpop.xlane.xlu1 %4191 }
 0xeb5   : > { %7258 = vpow2.f32 %v4219_v5  ;;  %v4211_v43 = vsub.f32 %v9368_v27, %v4192_v60  ;;  %4188 = vmax.xlane.f32.xlu0 %v4187_v63 }
 0xeb7   : > { %v4223_v0 = vmul.f32 1.442695, %v4211_v43 }
 0xeb8   : > { %v4198_v10 = vpop.xlane.xlu1 %4197 }
 0xeb9   : > { %7260 = vpow2.f32 %v4223_v0  ;;  %v4213_v58 = vsub.f32 %v9372_v28, %v4198_v10  ;;  %4194 = vmax.xlane.f32.xlu0 %v4193_v7 }
 0xebb   : > { %v4227_v3 = vmul.f32 1.442695, %v4213_v58 }
 0xebc   : > { %v4204_v36 = vpop.xlane.xlu1 %4203 }
 0xebd   : > { %7262 = vpow2.f32 %v4227_v3  ;;  %v4215_v49 = vsub.f32 %v9377_v35, %v4204_v36  ;;  %4200 = vmax.xlane.f32.xlu0 %v4199_v57 }
 0xebf   : > { %v9432_v14 = vpop.eup %7258  ;;  %v4231_v61 = vmul.f32 1.442695, %v4215_v49 }
 0xec0   : > { %v4238_v27 = vsel %vm2447_vm9, %v9432_v14, 0.0 }
 0xec1   : > { %7264 = vpow2.f32 %v4231_v61  ;;  %4239 = vadd.xlane.f32.xlu1 %v4238_v27  ;;  %4206 = vmax.xlane.f32.xlu0 %v4205_v6 }
 0xec3   : > { %v9438_v31 = vpop.eup %7260 }
 0xec4   : > { %v4244_v28 = vsel %vm2447_vm9, %v9438_v31, 0.0 }
 0xec5   : > { %4245 = vadd.xlane.f32.xlu1 %v4244_v28 }
 0xec7   : > { %v9442_v34 = vpop.eup %7262 }
 0xec8   : > { %v4250_v35 = vsel %vm2447_vm9, %v9442_v34, 0.0 }
 0xec9   : > { %4251 = vadd.xlane.f32.xlu1 %v4250_v35 }
 0xecb   : > { %v9446_v18 = vpop.eup %7264 }
 0xecc   : > { %v4256_v19 = vsel %vm2447_vm9, %v9446_v18, 0.0 }
 0xecd   : > { %4257 = vadd.xlane.f32.xlu1 %v4256_v19 }
 0xf32   : > { %v4875_v30 = vpop.xlane.xlu0 %4874 }
 0xf33   : > { %7266 = vrcp.f32 %v4875_v30 }
 0xf34   : > { %7268 = vrcp.f32 %v4878_v16 }
 0xf36   : > { %v4881_v47 = vpop.xlane.xlu0 %4880 }
 0xf37   : > { %7270 = vrcp.f32 %v4881_v47 }
 0xf38   : > { %7272 = vrcp.f32 %v4884_v25 }
 0xf3a   : > { %v4887_v23 = vpop.xlane.xlu0 %4886 }
 0xf3b   : > { %7274 = vrcp.f32 %v4887_v23 }
 0xf3c   : > { %7276 = vrcp.f32 %v9403_v44 }
 0xf3d   : > { %v7267_v45 = vpop.eup %7266 }
 0xf3e   : > { %v4893_v53 = vpop.xlane.xlu0 %4892  ;;  %v4899_v17 = vmul.f32 %v7267_v45, %v9391_v15  ;;  %v7269_v8 = vpop.eup %7268 }
 0xf3f   : > { %v4901_v39 = vmul.f32 %v7269_v8, %v9352_v22 }
 0xf40   : > { %6783 = vmatmul.mubr.msk.f32.gmra.mrb[200].mxu0 %vm2447_vm9, %v4899_v17 }
 0xf41   : > { %6785 = vmatprep.mubr.msk.f32.mxu0 %vm7375_vm4, %v7376_v13  ;;  %v7271_v59 = vpop.eup %7270 }
 0xf42   : > { %v4189_v20 = vpop.xlane.xlu0 %4188  ;;  %v4903_v32 = vmul.f32 %v7271_v59, %v9397_v41  ;;  %v7273_v4 = vpop.eup %7272 }
 0xf43   : > { %v4210_v46 = vsub.f32 %v9410_v55, %v4189_v20  ;;  %v4905_v15 = vmul.f32 %v7273_v4, %v9358_v24 }
 0xf44   : > { %6786 = vmatmul.mubr.msk.f32.gmra.mrb[202].mxu0 %vm2447_vm9, %v4901_v39 }
 0xf45   : > { %v4221_v56 = vmul.f32 1.442695, %v4210_v46  ;;  %6788 = vmatprep.mubr.msk.f32.mxu0 %vm7375_vm4, %v7376_v13  ;;  %v7275_v1 = vpop.eup %7274 }
 0xf46   : > { %v4195_v40 = vpop.xlane.xlu0 %4194  ;;  %v4907_v2 = vmul.f32 %v7275_v1, %v9401_v33  ;;  %v7277_v44 = vpop.eup %7276 }
 0xf47   : > { %7278 = vpow2.f32 %v4221_v56  ;;  %v4212_v37 = vsub.f32 %v9415_v54, %v4195_v40  ;;  %v4909_v42 = vmul.f32 %v7277_v44, %v9362_v9 }
 0xf48   : > { %6789 = vmatmul.mubr.msk.f32.gmra.mrb[204].mxu0 %vm2447_vm9, %v4903_v32  ;;  %7280 = vrcp.f32 %v4893_v53 }
 0xf49   : > { %v4225_v22 = vmul.f32 1.442695, %v4212_v37  ;;  %6791 = vmatprep.mubr.msk.f32.mxu0 %vm7375_vm4, %v7376_v13 }
 0xf4a   : > { %v4201_v29 = vpop.xlane.xlu0 %4200 }
 0xf4b   : > { %7282 = vpow2.f32 %v4225_v22  ;;  %v4214_v16 = vsub.f32 %v9421_v52, %v4201_v29 }
 0xf4c   : > { %6792 = vmatmul.mubr.msk.f32.gmra.mrb[206].mxu0 %vm2447_vm9, %v4905_v15 }
 0xf4d   : > { %v4229_v51 = vmul.f32 1.442695, %v4214_v16  ;;  %6794 = vmatprep.mubr.msk.f32.mxu0 %vm7375_vm4, %v7376_v13 }
 0xf4e   : > { %v4240_v41 = vpop.xlane.xlu1 %4239  ;;  %v4207_v25 = vpop.xlane.xlu0 %4206 }
 0xf4f   : > { %7284 = vpow2.f32 %v4229_v51  ;;  %v4216_v11 = vsub.f32 %v9427_v50, %v4207_v25 }
 0xf50   : > { %7286 = vrcp.f32 %v4240_v41  ;;  %6795 = vmatmul.mubr.msk.f32.gmra.mrb[208].mxu0 %vm2447_vm9, %v4907_v2 }
 0xf51   : > { %v7279_v24 = vpop.eup %7278  ;;  %v4233_v55 = vmul.f32 1.442695, %v4216_v11  ;;  %6797 = vmatprep.mubr.msk.f32.mxu0 %vm7375_vm4, %v7376_v13 }
 0xf52   : > { %v4241_v12 = vsel %vm2447_vm9, %v7279_v24, 0.0  ;;  %v7281_v62 = vpop.eup %7280  ;;  %v4246_v36 = vpop.xlane.xlu1 %4245 }
 0xf53   : > { %7288 = vpow2.f32 %v4233_v55  ;;  %4242 = vadd.xlane.f32.xlu0 %v4241_v12  ;;  %v4911_v54 = vmul.f32 %v7281_v62, %v9407_v38 }
 0xf54   : > { %6798 = vmatmul.mubr.msk.f32.gmra.mrb[210].mxu0 %vm2447_vm9, %v4909_v42 }
 0xf55   : > { %v7283_v33 = vpop.eup %7282  ;;  %6800 = vmatprep.mubr.msk.f32.mxu0 %vm7375_vm4, %v7376_v13 }
 0xf56   : > { %v4247_v5 = vsel %vm2447_vm9, %v7283_v33, 0.0 }
 0xf57   : > { %4248 = vadd.xlane.f32.xlu0 %v4247_v5 }
 0xf58   : > { %6801 = vmatmul.mubr.msk.f32.gmra.mrb[212].mxu0 %vm2447_vm9, %v4911_v54 }
 0xf59   : > { %v7285_v60 = vpop.eup %7284  ;;  %6850 = vmatprep.mubr.msk.f32.mxu0 %vm7375_vm4, %v7376_v13 }
 0xf5a   : > { %v7287_v9 = vpop.eup %7286  ;;  %v4253_v63 = vsel %vm2447_vm9, %v7285_v60, 0.0 }
 0xf5b   : > { %4254 = vadd.xlane.f32.xlu0 %v4253_v63  ;;  %v4265_v43 = vmul.f32 %v7287_v9, %v9432_v14  ;;  %v4252_v14 = vpop.xlane.xlu1 %4251 }
 0xf5d   : > { %v7289_v0 = vpop.eup %7288  ;;  %6825 = vmatmul.mubr.msk.f32.gmra.mrb[204].mxu1 %vm2447_vm9, %v4265_v43 }
 0xf5e   : > { %v4259_v52 = vsel %vm2472_vm10, %v7289_v0, 0.0  ;;  %6827 = vmatprep.mubr.msk.f32.mxu1 %vm7375_vm4, %v7376_v13 }
 0xf5f   : > { %4260 = vadd.xlane.f32.xlu0 %v4259_v52 }
 0xf71   : > { %v5008_v38 = vpop.f32.mrb[196].mxu0 }
 0xf72   : > { %v5141_v10 = vadd.f32 %v9383_v21, %v5008_v38  ;;  %v6778_v7 = vpop.f32.mrb[197].mxu0 }
 0xf74   : > { %v5176_v58 = vadd.f32 %v5141_v10, %v8728_v48  ;;  %v4258_v48 = vpop.xlane.xlu1 %4257 }
 0xf75   : > { %v5013_v3 = vpop.f32.mrb[198].mxu0 }
 0xf76   : > { %v6781_v50 = vpop.f32.mrb[199].mxu0  ;;  %6851 = vmatmul.mubr.msk.f32.vlgmr.msra.gmra.mrb[214].mxu0 %vm1737_vm5, %v5176_v58 }
 0xfe0   : > { %v4243_v57 = vpop.xlane.xlu0 %4242 }
 0xfe1   : > { %7290 = vrcp.f32 %v4243_v57 }
 0xfe2   : > { %7292 = vrcp.f32 %v4246_v36 }
 0xfe4   : > { %v4249_v49 = vpop.xlane.xlu0 %4248 }
 0xfe5   : > { %7294 = vrcp.f32 %v4249_v49 }
 0xfe6   : > { %7296 = vrcp.f32 %v4252_v14 }
 0xfe8   : > { %v4255_v27 = vpop.xlane.xlu0 %4254 }
 0xfe9   : > { %7298 = vrcp.f32 %v4255_v27 }
 0xfea   : > { %7300 = vrcp.f32 %v4258_v48 }
 0xfeb   : > { %v7291_v61 = vpop.eup %7290 }
 0xfec   : > { %v4267_v6 = vmul.f32 %v7291_v61, %v7279_v24  ;;  %v7293_v28 = vpop.eup %7292  ;;  %v4261_v19 = vpop.xlane.xlu0 %4260 }
 0xfed   : > { %v4269_v21 = vmul.f32 %v7293_v28, %v9438_v31  ;;  %7302 = vrcp.f32 %v4261_v19 }
 0xfee   : > { %6828 = vmatmul.mubr.msk.f32.gmra.mrb[206].mxu1 %vm2447_vm9, %v4267_v6 }
 0xfef   : > { %6830 = vmatprep.mubr.msk.f32.mxu1 %vm7375_vm4, %v7376_v13  ;;  %v7295_v35 = vpop.eup %7294 }
 0xff0   : > { %v4271_v26 = vmul.f32 %v7295_v35, %v7283_v33  ;;  %v7297_v30 = vpop.eup %7296 }
 0xff1   : > { %v4273_v47 = vmul.f32 %v7297_v30, %v9442_v34 }
 0xff2   : > { %6831 = vmatmul.mubr.msk.f32.gmra.mrb[208].mxu1 %vm2447_vm9, %v4269_v21 }
 0xff3   : > { %6833 = vmatprep.mubr.msk.f32.mxu1 %vm7375_vm4, %v7376_v13  ;;  %v7299_v23 = vpop.eup %7298 }
 0xff4   : > { %v4275_v31 = vmul.f32 %v7299_v23, %v7285_v60  ;;  %v7301_v45 = vpop.eup %7300 }
 0xff5   : > { %v4277_v53 = vmul.f32 %v7301_v45, %v9446_v18 }
 0xff6   : > { %6834 = vmatmul.mubr.msk.f32.gmra.mrb[210].mxu1 %vm2447_vm9, %v4271_v26 }
 0xff7   : > { %6836 = vmatprep.mubr.msk.f32.mxu1 %vm7375_vm4, %v7376_v13  ;;  %v7303_v17 = vpop.eup %7302 }
 0xff8   : > { %v4279_v34 = vmul.f32 %v7303_v17, %v7289_v0 }
 0xffa   : > { %6837 = vmatmul.mubr.msk.f32.gmra.mrb[212].mxu1 %vm2447_vm9, %v4273_v47 }
 0xffb   : > { %6839 = vmatprep.mubr.msk.f32.mxu1 %vm7375_vm4, %v7376_v13 }
 0xffe   : > { %6840 = vmatmul.mubr.msk.f32.gmra.mrb[214].mxu1 %vm2447_vm9, %v4275_v31 }
 0xfff   : > { %6842 = vmatprep.mubr.msk.f32.mxu1 %vm7375_vm4, %v7376_v13 }
0x1002   : > { %6843 = vmatmul.mubr.msk.f32.gmra.mrb[216].mxu1 %vm2447_vm9, %v4277_v53 }
0x1003   : > { %6845 = vmatprep.mubr.msk.f32.mxu1 %vm7375_vm4, %v7376_v13  ;;  %v5178_v13 = vld [vmem:[%s9584_s12] sm:$0x1] }
0x1006   : > { %6846 = vmatmul.mubr.msk.f32.gmra.mrb[218].mxu1 %vm2447_vm9, %v4279_v34 }
0x1013   : > { %v5017_v8 = vpop.f32.mrb[200].mxu0 }
0x1014   : > { %v6784_v20 = vpop.f32.mrb[201].mxu0 }
0x1017   : > { %v5021_v39 = vpop.f32.mrb[202].mxu0 }
0x1018   : > { %v6787_v59 = vpop.f32.mrb[203].mxu0 }
0x101b   : > { %v5025_v46 = vpop.f32.mrb[204].mxu0 }
0x101c   : > { %v6790_v56 = vpop.f32.mrb[205].mxu0 }
0x101f   : > { %v5029_v40 = vpop.f32.mrb[206].mxu0 }
0x1020   : > { %v6793_v32 = vpop.f32.mrb[207].mxu0 }
0x1023   : > { %v5033_v4 = vpop.f32.mrb[208].mxu0 }
0x1024   : > { %v6796_v37 = vpop.f32.mrb[209].mxu0 }
0x1027   : > { %v5037_v18 = vpop.f32.mrb[210].mxu0 }
0x1028   : > { %v6799_v22 = vpop.f32.mrb[211].mxu0 }
0x102b   : > { %v5041_v29 = vpop.f32.mrb[212].mxu0 }
0x102c   : > { %v6802_v15 = vpop.f32.mrb[213].mxu0 }
0x1030   : > { %v5145_v1 = vpop.f32.mrb[204].mxu1 }
0x1031   : > { %v6826_v16 = vpop.f32.mrb[205].mxu1 }
0x1049   : > { %v5248_v51 = vpop.f32.mrb[214].mxu0 }
0x104a   : > { %v5249_v41 = vadd.f32 %v5248_v51, %v5178_v13  ;;  %v6852_v25 = vpop.f32.mrb[215].mxu0 }
0x104c   : > { %v5253_v2 = vsel %vm5252_vm11, %v5249_v41, -inf }
0x104d   : > { %5254 = vmax.xlane.f32.xlu1 %v5253_v2 }
0x10c1   : > { %v5149_v44 = vpop.f32.mrb[206].mxu1 }
0x10c2   : > { %v6829_v11 = vpop.f32.mrb[207].mxu1 }
0x10c5   : > { %v5153_v24 = vpop.f32.mrb[208].mxu1 }
0x10c6   : > { %v6832_v55 = vpop.f32.mrb[209].mxu1 }
0x10c9   : > { %v5157_v12 = vpop.f32.mrb[210].mxu1 }
0x10ca   : > { %v6835_v42 = vpop.f32.mrb[211].mxu1 }
0x10cd   : > { %v5161_v62 = vpop.f32.mrb[212].mxu1 }
0x10ce   : > { %v6838_v33 = vpop.f32.mrb[213].mxu1 }
0x10d1   : > { %v5165_v5 = vpop.f32.mrb[214].mxu1 }
0x10d2   : > { %v6841_v54 = vpop.f32.mrb[215].mxu1 }
0x10d5   : > { %v5169_v60 = vpop.f32.mrb[216].mxu1 }
0x10d6   : > { %v6844_v9 = vpop.f32.mrb[217].mxu1 }
0x10d9   : > { %v5173_v63 = vpop.f32.mrb[218].mxu1 }
0x10da   : > { %v6847_v43 = vpop.f32.mrb[219].mxu1  ;;  %v5255_v0 = vpop.xlane.xlu1 %5254 }
0x10db   : > { %v5256_v52 = vsub.f32 %v5249_v41, %v5255_v0 }
0x10dd   : > { %v5257_v38 = vmul.f32 1.442695, %v5256_v52 }
0x10df   : > { %7304 = vpow2.f32 %v5257_v38 }
0x10e9   : > { %v7305_v10 = vpop.eup %7304 }
0x10ea   : > { %v5259_v7 = vsel %vm5252_vm11, %v7305_v10, 0.0 }
0x10eb   : > { %5260 = vadd.xlane.f32.xlu0 %v5259_v7 }
0x1178   : > { %v5261_v58 = vpop.xlane.xlu0 %5260 }
0x1179   : > { %7306 = vrcp.f32 %v5261_v58 }
0x1183   : > { %v7307_v3 = vpop.eup %7306 }
0x1184   : > { %v5263_v50 = vmul.f32 %v7307_v3, %v7305_v10 }
0x1186   : > { %5264 = vst.msk [vmem:[%s432_s24] sm:$0x1] %vm5252_vm11, %v5263_v50 }
0x1187   : > { %7321 = shalt.err (!%p7318_p3)
}
0x1188   : > { %s7322_s21 = scalar_lea.hbm %s9529_s25, 16  ;;  %s7326_s23 = scalar_lea.hbm %s9585_s13, 32 }
0x1189   : > { %p7323_p4 = scmp.ne.s32.totalorder %s9529_s25, %s7322_s21  ;;  %p7327_p9 = scmp.lt.u32.totalorder %s9529_s25, %s9585_s13 }
0x118a   : > { %p7328_p10 = scmp.lt.u32.totalorder %s7326_s23, %s7322_s21  ;;  %p7330_p12 = scmp.lt.u32.totalorder %s7322_s21, %s9529_s25 }
0x118b   : > { %p7324_p7 = pnand %p7323_p4, %p7486_p5 }
0x118c   : > { %p7329_p11 = por %p7328_p10, %p7327_p9 }
0x118d   : > { %p7325_p8 = pneg %p7324_p7 }
0x118e   : > { %p7331_p13 = por %p7330_p12, %p7329_p11 }
0x1190   : > { %p7332_p0 = pnand %p7331_p13, %p7325_p8 }
0x1192   : > { %7335 = shalt.err (!%p7332_p0)
}
0x1193   : > { %6976 = dma.vmem_to_hbm [thread:$0]  (%p7486_p5), %s9531_s30, 16, %s9529_s25, %s5266_s27  }
0x1194 PF: > { %s9600_s16 = sld [smem:[#allocation5_spill]]  ;;  %p6982_p1 = scmp.ge.s32.totalorder %s7370_s28, 2 }
0x1196   : > { %p6979_p2 = pnand %p6982_p1, %p7490_p6 }
0x119a   : > { %s5290_s29 = sand.u32 1, %s9600_s16  }
0x119b   : > { %s5291_s19 = scalar_lea.sflag [#allocation3], %s5290_s29 }
0x119c   : > { %7353 = dma.done.wait (!%p6979_p2), %s5291_s19, 16  }
0x119d   : > { %7355 = vsyncadd (!%p6979_p2), %s5291_s19, 4294967280  ;;  %s9602_s28 = sld [smem:[#allocation7_spill]]  ;;  %s9603_s20 = sld [smem:[#allocation6_spill]] }
0x119e   : > { %s9604_s27 = sld [smem:[#allocation8_spill]]  ;;  %s9605_s25 = smov %s7362_s26 }
0x11a3   : > { %p23_p3 = scmp.ge.s32.totalorder %s9602_s28, 4   ;;  %s9606_s26 = smov %s9603_s20 }
0x11a5   :  { %25 = sbr.rel (!%p23_p3) target bundleno = 3 (0x3), region = 131 }
0x11ac   :  { %5295 = vsyncpa [#allocation3], 1 }
0x11ad   :  { %5297 = vsyncpa [#allocation3 + $0x1], 1 }

</bundles_post_ra>
